<compile_context>
chip_gen: v7x
topology: tpu7x:2x2x1
jax: 0.10.0
libtpu: 0.0.40
codegen_flags: <defaults>
</compile_context>

<pallas_src>
import math
import jax
import jax.numpy as jnp
from jax.experimental import pallas as pl
from jax.experimental.pallas import tpu as pltpu

# ---------------- configuration (small shapes consistent with the module) ----
B = 2
MPU_CHANNELS = 4
L = 32                       # raw signal length
WINDOW = 4                   # window_size
T = L // WINDOW              # tokens after the strided conv
TC = T + 1                   # + cls token
N_DIM = 32
N_HEAD = 4
HEAD_DIM = N_DIM // N_HEAD
CLS_NUM = 8
DEPTH = 2
LOCAL_SIZE = 3
BLOCK_SIZE = 120
LN_EPS = 1e-5
BN_EPS = 1e-5

BT = B * TC                  # 18 transformer rows
BL = B * L                   # 64 conv rows

# ---------------- packed-operand row layouts --------------------------------
# weight blob, lane width = N_DIM (32)
C1_ROWS = 3 * MPU_CHANNELS
C1_PAD = 16
C1_OFF = 0
C2_OFF = C1_OFF + C1_PAD                                               # 16
C3_OFF = C2_OFF + 3 * N_DIM                                            # 112
PRJ_OFF = tuple(C3_OFF + WINDOW * N_DIM + d * N_DIM for d in range(DEPTH))        # 240,272
FF2_OFF = tuple(PRJ_OFF[0] + DEPTH * N_DIM + d * 4 * N_DIM for d in range(DEPTH)) # 304,432
B32_OFF = FF2_OFF[0] + DEPTH * 4 * N_DIM                               # 560
W32_ROWS = B32_OFF + 8                                                 # 568

# weight blob, lane width = 128
QKV_OFF = tuple(d * N_DIM for d in range(DEPTH))                       # 0,32
FF1_OFF = tuple(DEPTH * N_DIM + d * N_DIM for d in range(DEPTH))       # 64,96
CLSW_OFF = 2 * DEPTH * N_DIM                                           # 128
B128_OFF = CLSW_OFF + N_DIM                                            # 160
W128_ROWS = B128_OFF + 8                                               # 168

# constants blob, lane width = max(B*L, 2*N_DIM)
C64_LANES = max(BL, 2 * N_DIM)                                         # 64
SEL_OFF = 0                                                            # (BT, BL) gather
SLAB_OFF = 24                                                          # (BT, N_DIM) base slab
EDGE_OFF = 48                                                          # (BL, 2*N_DIM) edge keeps
C64_ROWS = EDGE_OFF + BL                                               # 112

# attention mask pack lanes
ACL = max(BT, N_DIM)                                                   # 32


# ============================== fused Pallas kernel ===========================

def fused_forward_kernel(xcol_ref, w32_ref, w128_ref, c64_ref, ac_ref, o_ref):
    f32 = jnp.float32
    bias32 = w32_ref[B32_OFF:B32_OFF + 8, :]        # (8, 32)   rows: b1,b2,(bproj,bff2)*depth
    bias128 = w128_ref[B128_OFF:B128_OFF + 8, :]    # (8, 128)  rows: (bqkv,bff1)*depth, cls_b

    # ---------------- ConvBlock1 (BN folded into weights; Dropout = id) ------
    h1 = jnp.dot(xcol_ref[...], w32_ref[C1_OFF:C1_OFF + C1_ROWS, :],
                 preferred_element_type=f32) + bias32[0:1, :]
    h1 = jnp.maximum(h1, 0.0)                                           # (B*L, D)

    # ---------------- ConvBlock2: 3 accumulated tap dots + residual ----------
    keep_m1 = c64_ref[EDGE_OFF:EDGE_OFF + BL, 0:N_DIM]                  # (B*L, D) edge masks
    keep_p1 = c64_ref[EDGE_OFF:EDGE_OFF + BL, N_DIM:2 * N_DIM]
    h_m1 = pltpu.roll(h1, shift=1, axis=0) * keep_m1                    # h1[i-1]
    h_p1 = pltpu.roll(h1, shift=BL - 1, axis=0) * keep_p1               # h1[i+1]
    h2 = jnp.dot(h_m1, w32_ref[C2_OFF:C2_OFF + N_DIM, :],
                 preferred_element_type=f32)
    h2 = h2 + jnp.dot(h1, w32_ref[C2_OFF + N_DIM:C2_OFF + 2 * N_DIM, :],
                      preferred_element_type=f32)
    h2 = h2 + jnp.dot(h_p1, w32_ref[C2_OFF + 2 * N_DIM:C2_OFF + 3 * N_DIM, :],
                      preferred_element_type=f32)
    h2 = jnp.maximum(h2 + bias32[1:2, :], 0.0) + h1                     # (B*L, D)

    # -------- patch conv (kernel=stride=WINDOW) + BN, fused gather/scatter ---
    # tap accumulation via sublane rolls (wrapped / cross-batch rows are never
    # selected by the gather matrix), then one (B*Tc, B*L) gather matmul that
    # directly lands rows in [cls ; patches]-per-batch order.
    inner = jnp.dot(h2, w32_ref[C3_OFF:C3_OFF + N_DIM, :],
                    preferred_element_type=f32)
    for w in range(1, WINDOW):
        hw = pltpu.roll(h2, shift=BL - w, axis=0)                       # h2[i + w]
        inner = inner + jnp.dot(hw, w32_ref[C3_OFF + w * N_DIM:C3_OFF + (w + 1) * N_DIM, :],
                                preferred_element_type=f32)
    sel = c64_ref[SEL_OFF:SEL_OFF + BT, 0:BL]                           # (B*Tc, B*L)
    base = c64_ref[SLAB_OFF:SLAB_OFF + BT, 0:N_DIM]                     # cls/bias/pos slab
    x = jnp.dot(sel, inner, preferred_element_type=f32) + base          # (B*Tc, D)

    # ---------------- attention constants (per input) ------------------------
    keep = ac_ref[0][:, 0:BT]                 # 1.0 where the score survives
    repl = ac_ref[1][:, 0:BT]                 # -inf / -100 / 0 replacement values
    keepq = ac_ref[2][:, 0:N_DIM]             # 0.0 on padded query rows

    # ---------------- transformer blocks (unrolled, per-head lane slices) ----
    for d in range(DEPTH):
        # pre-LN (gamma/beta + 1/sqrt(head_dim) folded into wqkv offline)
        mu = jnp.mean(x, axis=-1, keepdims=True)
        var = jnp.mean((x - mu) ** 2, axis=-1, keepdims=True)
        hn = (x - mu) * jax.lax.rsqrt(var + LN_EPS)
        qkv = jnp.dot(hn, w128_ref[QKV_OFF[d]:QKV_OFF[d] + N_DIM, :],
                      preferred_element_type=f32) + bias128[2 * d:2 * d + 1, :]   # (BT,128)

        heads = []
        for h in range(N_HEAD):
            q_h = qkv[:, h * HEAD_DIM:(h + 1) * HEAD_DIM]
            k_h = qkv[:, N_DIM + h * HEAD_DIM:N_DIM + (h + 1) * HEAD_DIM]
            v_h = qkv[:, 2 * N_DIM + h * HEAD_DIM:2 * N_DIM + (h + 1) * HEAD_DIM]
            s = jax.lax.dot_general(q_h, k_h, (((1,), (1,)), ((), ())),
                                    preferred_element_type=f32)          # (BT, BT)
            s = s * keep + repl              # one fused mask pass (-inf / -100 / keep)
            m = jnp.max(s, axis=-1, keepdims=True)
            e = jnp.exp(s - m)
            prob = e / jnp.sum(e, axis=-1, keepdims=True)                # exact divide
            heads.append(jnp.dot(prob, v_h, preferred_element_type=f32)) # (BT, hd)
        hc = jnp.concatenate(heads, axis=-1) * keepq                     # zero padded-query rows
        # torch applies the proj (incl. bias) AFTER zeroing attn weights -> bias
        # is added to padded rows too.
        attn_out = jnp.dot(hc, w32_ref[PRJ_OFF[d]:PRJ_OFF[d] + N_DIM, :],
                           preferred_element_type=f32) + bias32[2 + 2 * d:3 + 2 * d, :]
        x = x + attn_out

        # aft-LN (gamma/beta folded into wff1 offline) + FeedForward
        mu2 = jnp.mean(x, axis=-1, keepdims=True)
        var2 = jnp.mean((x - mu2) ** 2, axis=-1, keepdims=True)
        h2n = (x - mu2) * jax.lax.rsqrt(var2 + LN_EPS)
        f = jnp.dot(h2n, w128_ref[FF1_OFF[d]:FF1_OFF[d] + N_DIM, :],
                    preferred_element_type=f32) + bias128[2 * d + 1:2 * d + 2, :]
        f = jnp.maximum(f, 0.0)
        f = jnp.dot(f, w32_ref[FF2_OFF[d]:FF2_OFF[d] + 4 * N_DIM, :],
                    preferred_element_type=f32) + bias32[3 + 2 * d:4 + 2 * d, :]
        x = x + f

    # ---------------- cls head: lane-dense (BT, 128) store --------------------
    o_ref[...] = jnp.dot(x, w128_ref[CLSW_OFF:CLSW_OFF + N_DIM, :],
                         preferred_element_type=f32) + bias128[2 * DEPTH:2 * DEPTH + 1, :]


# ============================== parameters ====================================

def get_position_embedding(seq_len, d_model):
    pos = jnp.arange(d_model // 2, dtype=jnp.float32)
    pos = 2.0 * pos / d_model
    exp_pos = 1.0 / jnp.power(10000.0, pos)
    out = jnp.arange(seq_len, dtype=jnp.float32)[:, None] * exp_pos[None, :]
    pe = jnp.zeros((seq_len, d_model), jnp.float32)
    pe = pe.at[:, 0::2].set(jnp.sin(out))
    pe = pe.at[:, 1::2].set(jnp.cos(out))
    return pe


def init_params(key):
    ks = jax.random.split(key, 16)
    f32 = jnp.float32

    def uni(k, shape, fan_in):
        bound = 1.0 / math.sqrt(fan_in)
        return jax.random.uniform(k, shape, f32, -bound, bound)

    def bn_init():
        return dict(gamma=jnp.ones((N_DIM,), f32), beta=jnp.zeros((N_DIM,), f32),
                    mean=jnp.zeros((N_DIM,), f32), var=jnp.ones((N_DIM,), f32))

    p = {}
    # conv weights stored as flattened (k, Cin, Cout) -> (k*Cin, Cout) im2col form
    p['conv1_w'] = uni(ks[0], (3, MPU_CHANNELS, N_DIM),
                       3 * MPU_CHANNELS).reshape(3 * MPU_CHANNELS, N_DIM)
    p['conv1_b'] = jnp.zeros((N_DIM,), f32)
    p['bn1'] = bn_init()
    p['conv2_w'] = uni(ks[1], (3, N_DIM, N_DIM), 3 * N_DIM).reshape(3 * N_DIM, N_DIM)
    p['conv2_b'] = jnp.zeros((N_DIM,), f32)
    p['bn2'] = bn_init()
    p['conv3_w'] = uni(ks[2], (WINDOW, N_DIM, N_DIM),
                       WINDOW * N_DIM).reshape(WINDOW * N_DIM, N_DIM)
    p['conv3_b'] = jnp.zeros((N_DIM,), f32)
    p['bn3'] = bn_init()

    p['cls_token'] = jax.random.uniform(ks[3], (1, N_DIM), f32)   # torch.rand
    p['alpha'] = jnp.ones((), f32)
    p['pos_embedding'] = get_position_embedding(120, N_DIM)

    wqkv, bqkv, wproj, bproj = [], [], [], []
    wff1, bff1, wff2, bff2 = [], [], [], []
    ln1_g, ln1_b, ln2_g, ln2_b = [], [], [], []
    for d in range(DEPTH):
        bk = jax.random.split(ks[4 + d], 4)
        wqkv.append(uni(bk[0], (N_DIM, 3 * N_DIM), N_DIM))
        bqkv.append(jnp.zeros((3 * N_DIM,), f32))
        wproj.append(uni(bk[1], (N_DIM, N_DIM), N_DIM))
        bproj.append(jnp.zeros((N_DIM,), f32))
        wff1.append(uni(bk[2], (N_DIM, 4 * N_DIM), N_DIM))
        bff1.append(jnp.zeros((4 * N_DIM,), f32))
        wff2.append(uni(bk[3], (4 * N_DIM, N_DIM), 4 * N_DIM))
        bff2.append(jnp.zeros((N_DIM,), f32))
        ln1_g.append(jnp.ones((N_DIM,), f32)); ln1_b.append(jnp.zeros((N_DIM,), f32))
        ln2_g.append(jnp.ones((N_DIM,), f32)); ln2_b.append(jnp.zeros((N_DIM,), f32))
    for name, v in [('wqkv', wqkv), ('bqkv', bqkv), ('wproj', wproj), ('bproj', bproj),
                    ('wff1', wff1), ('bff1', bff1), ('wff2', wff2), ('bff2', bff2),
                    ('ln1_g', ln1_g), ('ln1_b', ln1_b), ('ln2_g', ln2_g), ('ln2_b', ln2_b)]:
        p[name] = jnp.stack(v)

    p['cls_w'] = uni(ks[8], (N_DIM, CLS_NUM), N_DIM)
    p['cls_b'] = jnp.zeros((CLS_NUM,), f32)
    return p


def pack_params(p):
    """Fold all affine constants offline and pack operands into a few blobs."""
    f32 = jnp.float32

    def rpad(a, rows):
        return jnp.pad(a, ((0, rows - a.shape[0]), (0, 0)))

    def lpad(a, lanes):
        return jnp.pad(a, ((0, 0), (0, lanes - a.shape[1])))

    def vpad(v, n):
        return jnp.pad(v, (0, n - v.shape[0]))

    def bn_fold(w, b, bn):
        s = bn['gamma'] / jnp.sqrt(bn['var'] + BN_EPS)
        t = bn['beta'] - bn['mean'] * s
        return w * s[None, :], b * s + t

    # BatchNorm folds
    c1w, c1b = bn_fold(p['conv1_w'], p['conv1_b'], p['bn1'])
    c2w, c2b = bn_fold(p['conv2_w'], p['conv2_b'], p['bn2'])
    c3w, c3b = bn_fold(p['conv3_w'], p['conv3_b'], p['bn3'])

    # LayerNorm / attention-scale folds
    scale = 1.0 / math.sqrt(HEAD_DIM)
    wqkv_f, bqkv_f, wff1_f, bff1_f = [], [], [], []
    for d in range(DEPTH):
        wq = p['ln1_g'][d][:, None] * p['wqkv'][d]
        bq = p['ln1_b'][d] @ p['wqkv'][d] + p['bqkv'][d]
        wq = wq.at[:, :N_DIM].multiply(scale)   # fold 1/sqrt(head_dim) into Q
        bq = bq.at[:N_DIM].multiply(scale)
        wf = p['ln2_g'][d][:, None] * p['wff1'][d]
        bf = p['ln2_b'][d] @ p['wff1'][d] + p['bff1'][d]
        wqkv_f.append(wq); bqkv_f.append(bq); wff1_f.append(wf); bff1_f.append(bf)

    # ---- weight blob, lane width N_DIM ----
    rows32 = [c1b, c2b]
    for d in range(DEPTH):
        rows32 += [p['bproj'][d], p['bff2'][d]]
    while len(rows32) < 8:
        rows32.append(jnp.zeros((N_DIM,), f32))
    bias32 = jnp.stack(rows32)
    w32 = jnp.concatenate(
        [rpad(c1w, C1_PAD), c2w, c3w]
        + [p['wproj'][d] for d in range(DEPTH)]
        + [p['wff2'][d] for d in range(DEPTH)]
        + [bias32], axis=0)
    assert w32.shape == (W32_ROWS, N_DIM)

    # ---- weight blob, lane width 128 ----
    rows128 = []
    for d in range(DEPTH):
        rows128 += [vpad(bqkv_f[d], 128), vpad(bff1_f[d], 128)]
    rows128.append(vpad(p['cls_b'], 128))
    while len(rows128) < 8:
        rows128.append(jnp.zeros((128,), f32))
    bias128 = jnp.stack(rows128)
    w128 = jnp.concatenate(
        [lpad(wqkv_f[d], 128) for d in range(DEPTH)]
        + [lpad(wff1_f[d], 128) for d in range(DEPTH)]
        + [lpad(p['cls_w'], 128), bias128], axis=0)
    assert w128.shape == (W128_ROWS, 128)

    # ---- constants blob: gather matrix + base slab + conv edge masks ----
    pos = p['pos_embedding'][:TC] * p['alpha']
    cls_row = p['cls_token'][0] + pos[0]
    slab_rows = jnp.concatenate([cls_row[None, :], c3b[None, :] + pos[1:]], axis=0)  # (Tc, D)
    slab = jnp.tile(slab_rows, (B, 1))                                               # (B*Tc, D)

    r = jnp.arange(BT)
    b_of, t_of = r // TC, r % TC
    src = b_of * L + (t_of - 1) * WINDOW
    sel = jax.nn.one_hot(jnp.where(t_of > 0, src, -1), BL, dtype=f32)                # cls rows = 0

    pos_l = jnp.arange(BL) % L
    km = (pos_l != 0).astype(f32)[:, None]
    kp = (pos_l != L - 1).astype(f32)[:, None]
    edge = jnp.concatenate([jnp.broadcast_to(km, (BL, N_DIM)),
                            jnp.broadcast_to(kp, (BL, N_DIM))], axis=1)              # (B*L, 2D)

    c64 = jnp.concatenate([
        rpad(lpad(sel, C64_LANES), SLAB_OFF),
        rpad(lpad(slab, C64_LANES), EDGE_OFF - SLAB_OFF),
        lpad(edge, C64_LANES)], axis=0)
    assert c64.shape == (C64_ROWS, C64_LANES)

    # ---- structural attention mask (local band + cross-batch), pad-free part ----
    idx = jnp.arange(BLOCK_SIZE)
    diff = idx[None, :] - idx[:, None]
    lmask = ~((diff <= LOCAL_SIZE) & (diff >= -LOCAL_SIZE))
    lmask = lmask.at[0, :].set(False).at[:, 0].set(False)
    lmask = lmask[:TC, :TC]
    b_of2, t_of2 = r // TC, r % TC
    same_b = b_of2[:, None] == b_of2[None, :]
    local_blocked = lmask[t_of2[:, None], t_of2[None, :]]
    struct_inf = (~same_b) | local_blocked                                           # bool (BT,BT)

    return {'w32': w32, 'w128': w128, 'c64': c64, 'struct_inf': struct_inf}


# ============================== forward (glue + one fused kernel) =============

def forward(x_ncl, packed):
    f32 = jnp.float32
    b_ = x_ncl.shape[0]
    assert b_ == B

    # ---- pad-mask path: conv1d(ones(3), pad=1) twice, ones(window) stride window, ==0
    p0 = x_ncl[:, 0, :]

    def conv_ones3(v):
        vp = jnp.pad(v, ((0, 0), (1, 1)))
        return vp[:, :-2] + vp[:, 1:-1] + vp[:, 2:]

    p2 = conv_ones3(conv_ones3(p0))
    pad_tok = (p2.reshape(b_, T, WINDOW).sum(-1) == 0)                       # (B, T)
    pad_full = jnp.concatenate([jnp.zeros((b_, 1), bool), pad_tok], axis=1)  # (B, Tc)

    # ---- conv1 im2col: (B*L, 3*Cin) with per-batch zero padding
    x_blc = jnp.transpose(x_ncl, (0, 2, 1))
    x_m1 = jnp.pad(x_blc, ((0, 0), (1, 0), (0, 0)))[:, :L, :]
    x_p1 = jnp.pad(x_blc, ((0, 0), (0, 1), (0, 0)))[:, 1:, :]
    x_col = jnp.concatenate([x_m1, x_blc, x_p1], -1).reshape(b_ * L, 3 * MPU_CHANNELS)

    # ---- per-input attention mask pack: keep / replacement / query-keep ----
    # torch order: local band (and here cross-batch) -> -inf; padded key that is
    # not local-masked -> -100 (applied to the scaled scores).
    pad_flat = pad_full.reshape(-1)
    struct_inf = packed['struct_inf']
    blocked_100 = (~struct_inf) & pad_flat[None, :]
    keep = ((~struct_inf) & (~pad_flat[None, :])).astype(f32)
    repl = jnp.where(struct_inf, -jnp.inf,
                     jnp.where(blocked_100, -100.0, 0.0)).astype(f32)
    keepq = jnp.broadcast_to(1.0 - pad_flat.astype(f32)[:, None], (BT, N_DIM))

    def lpad(a, lanes):
        return jnp.pad(a, ((0, 0), (0, lanes - a.shape[1])))

    attn_const = jnp.stack([lpad(keep, ACL), lpad(repl, ACL), lpad(keepq, ACL)], axis=0)

    out = pl.pallas_call(
        fused_forward_kernel,
        out_shape=jax.ShapeDtypeStruct((BT, 128), f32),   # lane-dense, sliced below
    )(x_col, packed['w32'], packed['w128'], packed['c64'], attn_const)

    logits = out[:, :CLS_NUM].reshape(b_, TC, CLS_NUM)
    cls_logits = logits[:, 0, :]
    seq_logits = logits[:, 1:, :]
    log_probs = jax.nn.log_softmax(seq_logits, axis=-1)

    # TODO(synk): nn.CTCLoss, greedy CTC decode (host-side Python loops), accuracy
    # bookkeeping and the word2num.json lookup have no clean Pallas equivalent;
    # the kernel pipeline stops at the (log-)logits the torch module feeds them.
    return {'cls_logits': cls_logits, 'log_probs': log_probs, 'pad_mask': pad_full}


# ============================== main ==========================================

if __name__ == "__main__":
    key = jax.random.PRNGKey(0)
    pkey, dkey = jax.random.split(key)
    params = init_params(pkey)
    packed = pack_params(params)

    x = jax.random.normal(dkey, (B, MPU_CHANNELS, L), jnp.float32)
    # zero out the tail so the pad-mask / masked-softmax / query-zeroing paths run
    valid = (jnp.arange(L) < (L - 2 * WINDOW)).astype(jnp.float32)
    x = x * valid[None, None, :]

    out = jax.jit(forward)(x, packed)
    jax.tree_util.tree_map(jax.block_until_ready, out)
    assert out['cls_logits'].shape == (B, CLS_NUM)
    assert out['log_probs'].shape == (B, T, CLS_NUM)
    print("KERNEL_OK")
</pallas_src>

<mosaic_0001>
module attributes {stable_mosaic.version = 11 : i64} {
  func.func @fused_forward_kernel(%arg0: memref<64x12xf32, #tpu.memory_space<vmem>>, %arg1: memref<568x32xf32, #tpu.memory_space<vmem>>, %arg2: memref<168x128xf32, #tpu.memory_space<vmem>>, %arg3: memref<112x64xf32, #tpu.memory_space<vmem>>, %arg4: memref<3x18x32xf32, #tpu.memory_space<vmem>>, %arg5: memref<18x128xf32, #tpu.memory_space<vmem>>) attributes {dimension_semantics = [], scalar_prefetch = 0 : i64, scratch_operands = 0 : i64, tpu.core_type = #tpu.core_type<tc>} {
    %c560 = arith.constant 560 : index
    %c0 = arith.constant 0 : index
    %0 = vector.load %arg1[%c560, %c0] : memref<568x32xf32, #tpu.memory_space<vmem>>, vector<8x32xf32>
    %c160 = arith.constant 160 : index
    %c0_0 = arith.constant 0 : index
    %1 = vector.load %arg2[%c160, %c0_0] : memref<168x128xf32, #tpu.memory_space<vmem>>, vector<8x128xf32>
    %c0_1 = arith.constant 0 : index
    %c0_2 = arith.constant 0 : index
    %2 = vector.load %arg0[%c0_1, %c0_2] : memref<64x12xf32, #tpu.memory_space<vmem>>, vector<64x12xf32>
    %c0_3 = arith.constant 0 : index
    %c0_4 = arith.constant 0 : index
    %3 = vector.load %arg1[%c0_3, %c0_4] : memref<568x32xf32, #tpu.memory_space<vmem>>, vector<12x32xf32>
    %cst = arith.constant dense<0.000000e+00> : vector<64x32xf32>
    %4 = tpu.matmul %2, %3, %cst {dimension_numbers = #tpu.dot_dimension_numbers<[1], [0], [0], [1], [0, 0, 1, 1], [], []>} : vector<64x12xf32>, vector<12x32xf32>, vector<64x32xf32> -> vector<64x32xf32>
    %5 = vector.extract_strided_slice %0 {offsets = [0, 0], sizes = [1, 32], strides = [1, 1]} : vector<8x32xf32> to vector<1x32xf32>
    %6 = vector.broadcast %5 : vector<1x32xf32> to vector<64x32xf32>
    %7 = arith.addf %4, %6 : vector<64x32xf32>
    %cst_5 = arith.constant 0.000000e+00 : f32
    %8 = vector.broadcast %cst_5 : f32 to vector<64x32xf32>
    %9 = arith.maximumf %7, %8 : vector<64x32xf32>
    %c48 = arith.constant 48 : index
    %c0_6 = arith.constant 0 : index
    %10 = vector.load %arg3[%c48, %c0_6] : memref<112x64xf32, #tpu.memory_space<vmem>>, vector<64x32xf32>
    %c48_7 = arith.constant 48 : index
    %c32 = arith.constant 32 : index
    %11 = vector.load %arg3[%c48_7, %c32] : memref<112x64xf32, #tpu.memory_space<vmem>>, vector<64x32xf32>
    %c1_i32 = arith.constant 1 : i32
    %12 = tpu.dynamic_rotate %9 by %c1_i32 dim 0 : vector<64x32xf32>, i32 -> vector<64x32xf32>
    %13 = arith.mulf %12, %10 : vector<64x32xf32>
    %c63_i32 = arith.constant 63 : i32
    %14 = tpu.dynamic_rotate %9 by %c63_i32 dim 0 : vector<64x32xf32>, i32 -> vector<64x32xf32>
    %15 = arith.mulf %14, %11 : vector<64x32xf32>
    %c16 = arith.constant 16 : index
    %c0_8 = arith.constant 0 : index
    %16 = vector.load %arg1[%c16, %c0_8] : memref<568x32xf32, #tpu.memory_space<vmem>>, vector<32x32xf32>
    %cst_9 = arith.constant dense<0.000000e+00> : vector<64x32xf32>
    %17 = tpu.matmul %13, %16, %cst_9 {dimension_numbers = #tpu.dot_dimension_numbers<[1], [0], [0], [1], [0, 0, 1, 1], [], []>} : vector<64x32xf32>, vector<32x32xf32>, vector<64x32xf32> -> vector<64x32xf32>
    %c48_10 = arith.constant 48 : index
    %c0_11 = arith.constant 0 : index
    %18 = vector.load %arg1[%c48_10, %c0_11] : memref<568x32xf32, #tpu.memory_space<vmem>>, vector<32x32xf32>
    %cst_12 = arith.constant dense<0.000000e+00> : vector<64x32xf32>
    %19 = tpu.matmul %9, %18, %cst_12 {dimension_numbers = #tpu.dot_dimension_numbers<[1], [0], [0], [1], [0, 0, 1, 1], [], []>} : vector<64x32xf32>, vector<32x32xf32>, vector<64x32xf32> -> vector<64x32xf32>
    %20 = arith.addf %17, %19 : vector<64x32xf32>
    %c80 = arith.constant 80 : index
    %c0_13 = arith.constant 0 : index
    %21 = vector.load %arg1[%c80, %c0_13] : memref<568x32xf32, #tpu.memory_space<vmem>>, vector<32x32xf32>
    %cst_14 = arith.constant dense<0.000000e+00> : vector<64x32xf32>
    %22 = tpu.matmul %15, %21, %cst_14 {dimension_numbers = #tpu.dot_dimension_numbers<[1], [0], [0], [1], [0, 0, 1, 1], [], []>} : vector<64x32xf32>, vector<32x32xf32>, vector<64x32xf32> -> vector<64x32xf32>
    %23 = arith.addf %20, %22 : vector<64x32xf32>
    %24 = vector.extract_strided_slice %0 {offsets = [1, 0], sizes = [1, 32], strides = [1, 1]} : vector<8x32xf32> to vector<1x32xf32>
    %25 = vector.broadcast %24 : vector<1x32xf32> to vector<64x32xf32>
    %26 = arith.addf %23, %25 : vector<64x32xf32>
    %cst_15 = arith.constant 0.000000e+00 : f32
    %27 = vector.broadcast %cst_15 : f32 to vector<64x32xf32>
    %28 = arith.maximumf %26, %27 : vector<64x32xf32>
    %29 = arith.addf %28, %9 : vector<64x32xf32>
    %c112 = arith.constant 112 : index
    %c0_16 = arith.constant 0 : index
    %30 = vector.load %arg1[%c112, %c0_16] : memref<568x32xf32, #tpu.memory_space<vmem>>, vector<32x32xf32>
    %cst_17 = arith.constant dense<0.000000e+00> : vector<64x32xf32>
    %31 = tpu.matmul %29, %30, %cst_17 {dimension_numbers = #tpu.dot_dimension_numbers<[1], [0], [0], [1], [0, 0, 1, 1], [], []>} : vector<64x32xf32>, vector<32x32xf32>, vector<64x32xf32> -> vector<64x32xf32>
    %c63_i32_18 = arith.constant 63 : i32
    %32 = tpu.dynamic_rotate %29 by %c63_i32_18 dim 0 : vector<64x32xf32>, i32 -> vector<64x32xf32>
    %c144 = arith.constant 144 : index
    %c0_19 = arith.constant 0 : index
    %33 = vector.load %arg1[%c144, %c0_19] : memref<568x32xf32, #tpu.memory_space<vmem>>, vector<32x32xf32>
    %cst_20 = arith.constant dense<0.000000e+00> : vector<64x32xf32>
    %34 = tpu.matmul %32, %33, %cst_20 {dimension_numbers = #tpu.dot_dimension_numbers<[1], [0], [0], [1], [0, 0, 1, 1], [], []>} : vector<64x32xf32>, vector<32x32xf32>, vector<64x32xf32> -> vector<64x32xf32>
    %35 = arith.addf %31, %34 : vector<64x32xf32>
    %c62_i32 = arith.constant 62 : i32
    %36 = tpu.dynamic_rotate %29 by %c62_i32 dim 0 : vector<64x32xf32>, i32 -> vector<64x32xf32>
    %c176 = arith.constant 176 : index
    %c0_21 = arith.constant 0 : index
    %37 = vector.load %arg1[%c176, %c0_21] : memref<568x32xf32, #tpu.memory_space<vmem>>, vector<32x32xf32>
    %cst_22 = arith.constant dense<0.000000e+00> : vector<64x32xf32>
    %38 = tpu.matmul %36, %37, %cst_22 {dimension_numbers = #tpu.dot_dimension_numbers<[1], [0], [0], [1], [0, 0, 1, 1], [], []>} : vector<64x32xf32>, vector<32x32xf32>, vector<64x32xf32> -> vector<64x32xf32>
    %39 = arith.addf %35, %38 : vector<64x32xf32>
    %c61_i32 = arith.constant 61 : i32
    %40 = tpu.dynamic_rotate %29 by %c61_i32 dim 0 : vector<64x32xf32>, i32 -> vector<64x32xf32>
    %c208 = arith.constant 208 : index
    %c0_23 = arith.constant 0 : index
    %41 = vector.load %arg1[%c208, %c0_23] : memref<568x32xf32, #tpu.memory_space<vmem>>, vector<32x32xf32>
    %cst_24 = arith.constant dense<0.000000e+00> : vector<64x32xf32>
    %42 = tpu.matmul %40, %41, %cst_24 {dimension_numbers = #tpu.dot_dimension_numbers<[1], [0], [0], [1], [0, 0, 1, 1], [], []>} : vector<64x32xf32>, vector<32x32xf32>, vector<64x32xf32> -> vector<64x32xf32>
    %43 = arith.addf %39, %42 : vector<64x32xf32>
    %c0_25 = arith.constant 0 : index
    %c0_26 = arith.constant 0 : index
    %44 = vector.load %arg3[%c0_25, %c0_26] : memref<112x64xf32, #tpu.memory_space<vmem>>, vector<18x64xf32>
    %c24 = arith.constant 24 : index
    %c0_27 = arith.constant 0 : index
    %45 = vector.load %arg3[%c24, %c0_27] : memref<112x64xf32, #tpu.memory_space<vmem>>, vector<18x32xf32>
    %cst_28 = arith.constant dense<0.000000e+00> : vector<18x32xf32>
    %46 = tpu.matmul %44, %43, %cst_28 {dimension_numbers = #tpu.dot_dimension_numbers<[1], [0], [0], [1], [0, 0, 1, 1], [], []>} : vector<18x64xf32>, vector<64x32xf32>, vector<18x32xf32> -> vector<18x32xf32>
    %47 = arith.addf %46, %45 : vector<18x32xf32>
    %c0_29 = arith.constant 0 : index
    %c0_30 = arith.constant 0 : index
    %c0_31 = arith.constant 0 : index
    %48 = vector.load %arg4[%c0_29, %c0_30, %c0_31] : memref<3x18x32xf32, #tpu.memory_space<vmem>>, vector<1x18x32xf32>
    %49 = vector.shape_cast %48 : vector<1x18x32xf32> to vector<18x32xf32>
    %50 = vector.extract_strided_slice %49 {offsets = [0, 0], sizes = [18, 18], strides = [1, 1]} : vector<18x32xf32> to vector<18x18xf32>
    %c1 = arith.constant 1 : index
    %c0_32 = arith.constant 0 : index
    %c0_33 = arith.constant 0 : index
    %51 = vector.load %arg4[%c1, %c0_32, %c0_33] : memref<3x18x32xf32, #tpu.memory_space<vmem>>, vector<1x18x32xf32>
    %52 = vector.shape_cast %51 : vector<1x18x32xf32> to vector<18x32xf32>
    %53 = vector.extract_strided_slice %52 {offsets = [0, 0], sizes = [18, 18], strides = [1, 1]} : vector<18x32xf32> to vector<18x18xf32>
    %c2 = arith.constant 2 : index
    %c0_34 = arith.constant 0 : index
    %c0_35 = arith.constant 0 : index
    %54 = vector.load %arg4[%c2, %c0_34, %c0_35] : memref<3x18x32xf32, #tpu.memory_space<vmem>>, vector<1x18x32xf32>
    %55 = vector.shape_cast %54 : vector<1x18x32xf32> to vector<18x32xf32>
    %cst_36 = arith.constant dense<0.000000e+00> : vector<18xf32>
    %56 = vector.multi_reduction <add>, %47, %cst_36 [1] : vector<18x32xf32> to vector<18xf32>
    %57 = vector.shape_cast %56 : vector<18xf32> to vector<18x1xf32>
    %cst_37 = arith.constant 3.200000e+01 : f32
    %58 = vector.broadcast %cst_37 : f32 to vector<18x1xf32>
    %59 = arith.divf %57, %58 : vector<18x1xf32>
    %60 = vector.broadcast %59 : vector<18x1xf32> to vector<18x32xf32>
    %61 = arith.subf %47, %60 : vector<18x32xf32>
    %62 = arith.mulf %61, %61 : vector<18x32xf32>
    %cst_38 = arith.constant dense<0.000000e+00> : vector<18xf32>
    %63 = vector.multi_reduction <add>, %62, %cst_38 [1] : vector<18x32xf32> to vector<18xf32>
    %64 = vector.shape_cast %63 : vector<18xf32> to vector<18x1xf32>
    %cst_39 = arith.constant 3.200000e+01 : f32
    %65 = vector.broadcast %cst_39 : f32 to vector<18x1xf32>
    %66 = arith.divf %64, %65 : vector<18x1xf32>
    %67 = vector.broadcast %59 : vector<18x1xf32> to vector<18x32xf32>
    %68 = arith.subf %47, %67 : vector<18x32xf32>
    %cst_40 = arith.constant 9.99999974E-6 : f32
    %69 = vector.broadcast %cst_40 : f32 to vector<18x1xf32>
    %70 = arith.addf %66, %69 : vector<18x1xf32>
    %71 = math.rsqrt %70 : vector<18x1xf32>
    %72 = vector.broadcast %71 : vector<18x1xf32> to vector<18x32xf32>
    %73 = arith.mulf %68, %72 : vector<18x32xf32>
    %c0_41 = arith.constant 0 : index
    %c0_42 = arith.constant 0 : index
    %74 = vector.load %arg2[%c0_41, %c0_42] : memref<168x128xf32, #tpu.memory_space<vmem>>, vector<32x128xf32>
    %cst_43 = arith.constant dense<0.000000e+00> : vector<18x128xf32>
    %75 = tpu.matmul %73, %74, %cst_43 {dimension_numbers = #tpu.dot_dimension_numbers<[1], [0], [0], [1], [0, 0, 1, 1], [], []>} : vector<18x32xf32>, vector<32x128xf32>, vector<18x128xf32> -> vector<18x128xf32>
    %76 = vector.extract_strided_slice %1 {offsets = [0, 0], sizes = [1, 128], strides = [1, 1]} : vector<8x128xf32> to vector<1x128xf32>
    %77 = vector.broadcast %76 : vector<1x128xf32> to vector<18x128xf32>
    %78 = arith.addf %75, %77 : vector<18x128xf32>
    %79 = vector.extract_strided_slice %78 {offsets = [0, 0], sizes = [18, 8], strides = [1, 1]} : vector<18x128xf32> to vector<18x8xf32>
    %80 = vector.extract_strided_slice %78 {offsets = [0, 32], sizes = [18, 8], strides = [1, 1]} : vector<18x128xf32> to vector<18x8xf32>
    %81 = vector.extract_strided_slice %78 {offsets = [0, 64], sizes = [18, 8], strides = [1, 1]} : vector<18x128xf32> to vector<18x8xf32>
    %cst_44 = arith.constant dense<0.000000e+00> : vector<18x18xf32>
    %82 = tpu.matmul %79, %80, %cst_44 {dimension_numbers = #tpu.dot_dimension_numbers<[1], [1], [0], [0], [0, 0, 1, 0], [], []>} : vector<18x8xf32>, vector<18x8xf32>, vector<18x18xf32> -> vector<18x18xf32>
    %83 = arith.mulf %82, %50 : vector<18x18xf32>
    %84 = arith.addf %83, %53 : vector<18x18xf32>
    %cst_45 = arith.constant dense<0xFF800000> : vector<18xf32>
    %85 = vector.multi_reduction <maximumf>, %84, %cst_45 [1] : vector<18x18xf32> to vector<18xf32>
    %86 = vector.shape_cast %85 : vector<18xf32> to vector<18x1xf32>
    %87 = vector.broadcast %86 : vector<18x1xf32> to vector<18x18xf32>
    %88 = arith.subf %84, %87 : vector<18x18xf32>
    %89 = math.exp %88 : vector<18x18xf32>
    %cst_46 = arith.constant dense<0.000000e+00> : vector<18xf32>
    %90 = vector.multi_reduction <add>, %89, %cst_46 [1] : vector<18x18xf32> to vector<18xf32>
    %91 = vector.shape_cast %90 : vector<18xf32> to vector<18x1xf32>
    %92 = vector.broadcast %91 : vector<18x1xf32> to vector<18x18xf32>
    %93 = arith.divf %89, %92 : vector<18x18xf32>
    %cst_47 = arith.constant dense<0.000000e+00> : vector<18x8xf32>
    %94 = tpu.matmul %93, %81, %cst_47 {dimension_numbers = #tpu.dot_dimension_numbers<[1], [0], [0], [1], [0, 0, 1, 1], [], []>} : vector<18x18xf32>, vector<18x8xf32>, vector<18x8xf32> -> vector<18x8xf32>
    %95 = vector.extract_strided_slice %78 {offsets = [0, 8], sizes = [18, 8], strides = [1, 1]} : vector<18x128xf32> to vector<18x8xf32>
    %96 = vector.extract_strided_slice %78 {offsets = [0, 40], sizes = [18, 8], strides = [1, 1]} : vector<18x128xf32> to vector<18x8xf32>
    %97 = vector.extract_strided_slice %78 {offsets = [0, 72], sizes = [18, 8], strides = [1, 1]} : vector<18x128xf32> to vector<18x8xf32>
    %cst_48 = arith.constant dense<0.000000e+00> : vector<18x18xf32>
    %98 = tpu.matmul %95, %96, %cst_48 {dimension_numbers = #tpu.dot_dimension_numbers<[1], [1], [0], [0], [0, 0, 1, 0], [], []>} : vector<18x8xf32>, vector<18x8xf32>, vector<18x18xf32> -> vector<18x18xf32>
    %99 = arith.mulf %98, %50 : vector<18x18xf32>
    %100 = arith.addf %99, %53 : vector<18x18xf32>
    %cst_49 = arith.constant dense<0xFF800000> : vector<18xf32>
    %101 = vector.multi_reduction <maximumf>, %100, %cst_49 [1] : vector<18x18xf32> to vector<18xf32>
    %102 = vector.shape_cast %101 : vector<18xf32> to vector<18x1xf32>
    %103 = vector.broadcast %102 : vector<18x1xf32> to vector<18x18xf32>
    %104 = arith.subf %100, %103 : vector<18x18xf32>
    %105 = math.exp %104 : vector<18x18xf32>
    %cst_50 = arith.constant dense<0.000000e+00> : vector<18xf32>
    %106 = vector.multi_reduction <add>, %105, %cst_50 [1] : vector<18x18xf32> to vector<18xf32>
    %107 = vector.shape_cast %106 : vector<18xf32> to vector<18x1xf32>
    %108 = vector.broadcast %107 : vector<18x1xf32> to vector<18x18xf32>
    %109 = arith.divf %105, %108 : vector<18x18xf32>
    %cst_51 = arith.constant dense<0.000000e+00> : vector<18x8xf32>
    %110 = tpu.matmul %109, %97, %cst_51 {dimension_numbers = #tpu.dot_dimension_numbers<[1], [0], [0], [1], [0, 0, 1, 1], [], []>} : vector<18x18xf32>, vector<18x8xf32>, vector<18x8xf32> -> vector<18x8xf32>
    %111 = vector.extract_strided_slice %78 {offsets = [0, 16], sizes = [18, 8], strides = [1, 1]} : vector<18x128xf32> to vector<18x8xf32>
    %112 = vector.extract_strided_slice %78 {offsets = [0, 48], sizes = [18, 8], strides = [1, 1]} : vector<18x128xf32> to vector<18x8xf32>
    %113 = vector.extract_strided_slice %78 {offsets = [0, 80], sizes = [18, 8], strides = [1, 1]} : vector<18x128xf32> to vector<18x8xf32>
    %cst_52 = arith.constant dense<0.000000e+00> : vector<18x18xf32>
    %114 = tpu.matmul %111, %112, %cst_52 {dimension_numbers = #tpu.dot_dimension_numbers<[1], [1], [0], [0], [0, 0, 1, 0], [], []>} : vector<18x8xf32>, vector<18x8xf32>, vector<18x18xf32> -> vector<18x18xf32>
    %115 = arith.mulf %114, %50 : vector<18x18xf32>
    %116 = arith.addf %115, %53 : vector<18x18xf32>
    %cst_53 = arith.constant dense<0xFF800000> : vector<18xf32>
    %117 = vector.multi_reduction <maximumf>, %116, %cst_53 [1] : vector<18x18xf32> to vector<18xf32>
    %118 = vector.shape_cast %117 : vector<18xf32> to vector<18x1xf32>
    %119 = vector.broadcast %118 : vector<18x1xf32> to vector<18x18xf32>
    %120 = arith.subf %116, %119 : vector<18x18xf32>
    %121 = math.exp %120 : vector<18x18xf32>
    %cst_54 = arith.constant dense<0.000000e+00> : vector<18xf32>
    %122 = vector.multi_reduction <add>, %121, %cst_54 [1] : vector<18x18xf32> to vector<18xf32>
    %123 = vector.shape_cast %122 : vector<18xf32> to vector<18x1xf32>
    %124 = vector.broadcast %123 : vector<18x1xf32> to vector<18x18xf32>
    %125 = arith.divf %121, %124 : vector<18x18xf32>
    %cst_55 = arith.constant dense<0.000000e+00> : vector<18x8xf32>
    %126 = tpu.matmul %125, %113, %cst_55 {dimension_numbers = #tpu.dot_dimension_numbers<[1], [0], [0], [1], [0, 0, 1, 1], [], []>} : vector<18x18xf32>, vector<18x8xf32>, vector<18x8xf32> -> vector<18x8xf32>
    %127 = vector.extract_strided_slice %78 {offsets = [0, 24], sizes = [18, 8], strides = [1, 1]} : vector<18x128xf32> to vector<18x8xf32>
    %128 = vector.extract_strided_slice %78 {offsets = [0, 56], sizes = [18, 8], strides = [1, 1]} : vector<18x128xf32> to vector<18x8xf32>
    %129 = vector.extract_strided_slice %78 {offsets = [0, 88], sizes = [18, 8], strides = [1, 1]} : vector<18x128xf32> to vector<18x8xf32>
    %cst_56 = arith.constant dense<0.000000e+00> : vector<18x18xf32>
    %130 = tpu.matmul %127, %128, %cst_56 {dimension_numbers = #tpu.dot_dimension_numbers<[1], [1], [0], [0], [0, 0, 1, 0], [], []>} : vector<18x8xf32>, vector<18x8xf32>, vector<18x18xf32> -> vector<18x18xf32>
    %131 = arith.mulf %130, %50 : vector<18x18xf32>
    %132 = arith.addf %131, %53 : vector<18x18xf32>
    %cst_57 = arith.constant dense<0xFF800000> : vector<18xf32>
    %133 = vector.multi_reduction <maximumf>, %132, %cst_57 [1] : vector<18x18xf32> to vector<18xf32>
    %134 = vector.shape_cast %133 : vector<18xf32> to vector<18x1xf32>
    %135 = vector.broadcast %134 : vector<18x1xf32> to vector<18x18xf32>
    %136 = arith.subf %132, %135 : vector<18x18xf32>
    %137 = math.exp %136 : vector<18x18xf32>
    %cst_58 = arith.constant dense<0.000000e+00> : vector<18xf32>
    %138 = vector.multi_reduction <add>, %137, %cst_58 [1] : vector<18x18xf32> to vector<18xf32>
    %139 = vector.shape_cast %138 : vector<18xf32> to vector<18x1xf32>
    %140 = vector.broadcast %139 : vector<18x1xf32> to vector<18x18xf32>
    %141 = arith.divf %137, %140 : vector<18x18xf32>
    %cst_59 = arith.constant dense<0.000000e+00> : vector<18x8xf32>
    %142 = tpu.matmul %141, %129, %cst_59 {dimension_numbers = #tpu.dot_dimension_numbers<[1], [0], [0], [1], [0, 0, 1, 1], [], []>} : vector<18x18xf32>, vector<18x8xf32>, vector<18x8xf32> -> vector<18x8xf32>
    %143 = tpu.concatenate %94, %110, %126, %142 in 1 : vector<18x8xf32>, vector<18x8xf32>, vector<18x8xf32>, vector<18x8xf32> -> vector<18x32xf32>
    %144 = arith.mulf %143, %55 : vector<18x32xf32>
    %c240 = arith.constant 240 : index
    %c0_60 = arith.constant 0 : index
    %145 = vector.load %arg1[%c240, %c0_60] : memref<568x32xf32, #tpu.memory_space<vmem>>, vector<32x32xf32>
    %cst_61 = arith.constant dense<0.000000e+00> : vector<18x32xf32>
    %146 = tpu.matmul %144, %145, %cst_61 {dimension_numbers = #tpu.dot_dimension_numbers<[1], [0], [0], [1], [0, 0, 1, 1], [], []>} : vector<18x32xf32>, vector<32x32xf32>, vector<18x32xf32> -> vector<18x32xf32>
    %147 = vector.extract_strided_slice %0 {offsets = [2, 0], sizes = [1, 32], strides = [1, 1]} : vector<8x32xf32> to vector<1x32xf32>
    %148 = vector.broadcast %147 : vector<1x32xf32> to vector<18x32xf32>
    %149 = arith.addf %146, %148 : vector<18x32xf32>
    %150 = arith.addf %47, %149 : vector<18x32xf32>
    %cst_62 = arith.constant dense<0.000000e+00> : vector<18xf32>
    %151 = vector.multi_reduction <add>, %150, %cst_62 [1] : vector<18x32xf32> to vector<18xf32>
    %152 = vector.shape_cast %151 : vector<18xf32> to vector<18x1xf32>
    %cst_63 = arith.constant 3.200000e+01 : f32
    %153 = vector.broadcast %cst_63 : f32 to vector<18x1xf32>
    %154 = arith.divf %152, %153 : vector<18x1xf32>
    %155 = vector.broadcast %154 : vector<18x1xf32> to vector<18x32xf32>
    %156 = arith.subf %150, %155 : vector<18x32xf32>
    %157 = arith.mulf %156, %156 : vector<18x32xf32>
    %cst_64 = arith.constant dense<0.000000e+00> : vector<18xf32>
    %158 = vector.multi_reduction <add>, %157, %cst_64 [1] : vector<18x32xf32> to vector<18xf32>
    %159 = vector.shape_cast %158 : vector<18xf32> to vector<18x1xf32>
    %cst_65 = arith.constant 3.200000e+01 : f32
    %160 = vector.broadcast %cst_65 : f32 to vector<18x1xf32>
    %161 = arith.divf %159, %160 : vector<18x1xf32>
    %162 = vector.broadcast %154 : vector<18x1xf32> to vector<18x32xf32>
    %163 = arith.subf %150, %162 : vector<18x32xf32>
    %cst_66 = arith.constant 9.99999974E-6 : f32
    %164 = vector.broadcast %cst_66 : f32 to vector<18x1xf32>
    %165 = arith.addf %161, %164 : vector<18x1xf32>
    %166 = math.rsqrt %165 : vector<18x1xf32>
    %167 = vector.broadcast %166 : vector<18x1xf32> to vector<18x32xf32>
    %168 = arith.mulf %163, %167 : vector<18x32xf32>
    %c64 = arith.constant 64 : index
    %c0_67 = arith.constant 0 : index
    %169 = vector.load %arg2[%c64, %c0_67] : memref<168x128xf32, #tpu.memory_space<vmem>>, vector<32x128xf32>
    %cst_68 = arith.constant dense<0.000000e+00> : vector<18x128xf32>
    %170 = tpu.matmul %168, %169, %cst_68 {dimension_numbers = #tpu.dot_dimension_numbers<[1], [0], [0], [1], [0, 0, 1, 1], [], []>} : vector<18x32xf32>, vector<32x128xf32>, vector<18x128xf32> -> vector<18x128xf32>
    %171 = vector.extract_strided_slice %1 {offsets = [1, 0], sizes = [1, 128], strides = [1, 1]} : vector<8x128xf32> to vector<1x128xf32>
    %172 = vector.broadcast %171 : vector<1x128xf32> to vector<18x128xf32>
    %173 = arith.addf %170, %172 : vector<18x128xf32>
    %cst_69 = arith.constant 0.000000e+00 : f32
    %174 = vector.broadcast %cst_69 : f32 to vector<18x128xf32>
    %175 = arith.maximumf %173, %174 : vector<18x128xf32>
    %c304 = arith.constant 304 : index
    %c0_70 = arith.constant 0 : index
    %176 = vector.load %arg1[%c304, %c0_70] : memref<568x32xf32, #tpu.memory_space<vmem>>, vector<128x32xf32>
    %cst_71 = arith.constant dense<0.000000e+00> : vector<18x32xf32>
    %177 = tpu.matmul %175, %176, %cst_71 {dimension_numbers = #tpu.dot_dimension_numbers<[1], [0], [0], [1], [0, 0, 1, 1], [], []>} : vector<18x128xf32>, vector<128x32xf32>, vector<18x32xf32> -> vector<18x32xf32>
    %178 = vector.extract_strided_slice %0 {offsets = [3, 0], sizes = [1, 32], strides = [1, 1]} : vector<8x32xf32> to vector<1x32xf32>
    %179 = vector.broadcast %178 : vector<1x32xf32> to vector<18x32xf32>
    %180 = arith.addf %177, %179 : vector<18x32xf32>
    %181 = arith.addf %150, %180 : vector<18x32xf32>
    %cst_72 = arith.constant dense<0.000000e+00> : vector<18xf32>
    %182 = vector.multi_reduction <add>, %181, %cst_72 [1] : vector<18x32xf32> to vector<18xf32>
    %183 = vector.shape_cast %182 : vector<18xf32> to vector<18x1xf32>
    %cst_73 = arith.constant 3.200000e+01 : f32
    %184 = vector.broadcast %cst_73 : f32 to vector<18x1xf32>
    %185 = arith.divf %183, %184 : vector<18x1xf32>
    %186 = vector.broadcast %185 : vector<18x1xf32> to vector<18x32xf32>
    %187 = arith.subf %181, %186 : vector<18x32xf32>
    %188 = arith.mulf %187, %187 : vector<18x32xf32>
    %cst_74 = arith.constant dense<0.000000e+00> : vector<18xf32>
    %189 = vector.multi_reduction <add>, %188, %cst_74 [1] : vector<18x32xf32> to vector<18xf32>
    %190 = vector.shape_cast %189 : vector<18xf32> to vector<18x1xf32>
    %cst_75 = arith.constant 3.200000e+01 : f32
    %191 = vector.broadcast %cst_75 : f32 to vector<18x1xf32>
    %192 = arith.divf %190, %191 : vector<18x1xf32>
    %193 = vector.broadcast %185 : vector<18x1xf32> to vector<18x32xf32>
    %194 = arith.subf %181, %193 : vector<18x32xf32>
    %cst_76 = arith.constant 9.99999974E-6 : f32
    %195 = vector.broadcast %cst_76 : f32 to vector<18x1xf32>
    %196 = arith.addf %192, %195 : vector<18x1xf32>
    %197 = math.rsqrt %196 : vector<18x1xf32>
    %198 = vector.broadcast %197 : vector<18x1xf32> to vector<18x32xf32>
    %199 = arith.mulf %194, %198 : vector<18x32xf32>
    %c32_77 = arith.constant 32 : index
    %c0_78 = arith.constant 0 : index
    %200 = vector.load %arg2[%c32_77, %c0_78] : memref<168x128xf32, #tpu.memory_space<vmem>>, vector<32x128xf32>
    %cst_79 = arith.constant dense<0.000000e+00> : vector<18x128xf32>
    %201 = tpu.matmul %199, %200, %cst_79 {dimension_numbers = #tpu.dot_dimension_numbers<[1], [0], [0], [1], [0, 0, 1, 1], [], []>} : vector<18x32xf32>, vector<32x128xf32>, vector<18x128xf32> -> vector<18x128xf32>
    %202 = vector.extract_strided_slice %1 {offsets = [2, 0], sizes = [1, 128], strides = [1, 1]} : vector<8x128xf32> to vector<1x128xf32>
    %203 = vector.broadcast %202 : vector<1x128xf32> to vector<18x128xf32>
    %204 = arith.addf %201, %203 : vector<18x128xf32>
    %205 = vector.extract_strided_slice %204 {offsets = [0, 0], sizes = [18, 8], strides = [1, 1]} : vector<18x128xf32> to vector<18x8xf32>
    %206 = vector.extract_strided_slice %204 {offsets = [0, 32], sizes = [18, 8], strides = [1, 1]} : vector<18x128xf32> to vector<18x8xf32>
    %207 = vector.extract_strided_slice %204 {offsets = [0, 64], sizes = [18, 8], strides = [1, 1]} : vector<18x128xf32> to vector<18x8xf32>
    %cst_80 = arith.constant dense<0.000000e+00> : vector<18x18xf32>
    %208 = tpu.matmul %205, %206, %cst_80 {dimension_numbers = #tpu.dot_dimension_numbers<[1], [1], [0], [0], [0, 0, 1, 0], [], []>} : vector<18x8xf32>, vector<18x8xf32>, vector<18x18xf32> -> vector<18x18xf32>
    %209 = arith.mulf %208, %50 : vector<18x18xf32>
    %210 = arith.addf %209, %53 : vector<18x18xf32>
    %cst_81 = arith.constant dense<0xFF800000> : vector<18xf32>
    %211 = vector.multi_reduction <maximumf>, %210, %cst_81 [1] : vector<18x18xf32> to vector<18xf32>
    %212 = vector.shape_cast %211 : vector<18xf32> to vector<18x1xf32>
    %213 = vector.broadcast %212 : vector<18x1xf32> to vector<18x18xf32>
    %214 = arith.subf %210, %213 : vector<18x18xf32>
    %215 = math.exp %214 : vector<18x18xf32>
    %cst_82 = arith.constant dense<0.000000e+00> : vector<18xf32>
    %216 = vector.multi_reduction <add>, %215, %cst_82 [1] : vector<18x18xf32> to vector<18xf32>
    %217 = vector.shape_cast %216 : vector<18xf32> to vector<18x1xf32>
    %218 = vector.broadcast %217 : vector<18x1xf32> to vector<18x18xf32>
    %219 = arith.divf %215, %218 : vector<18x18xf32>
    %cst_83 = arith.constant dense<0.000000e+00> : vector<18x8xf32>
    %220 = tpu.matmul %219, %207, %cst_83 {dimension_numbers = #tpu.dot_dimension_numbers<[1], [0], [0], [1], [0, 0, 1, 1], [], []>} : vector<18x18xf32>, vector<18x8xf32>, vector<18x8xf32> -> vector<18x8xf32>
    %221 = vector.extract_strided_slice %204 {offsets = [0, 8], sizes = [18, 8], strides = [1, 1]} : vector<18x128xf32> to vector<18x8xf32>
    %222 = vector.extract_strided_slice %204 {offsets = [0, 40], sizes = [18, 8], strides = [1, 1]} : vector<18x128xf32> to vector<18x8xf32>
    %223 = vector.extract_strided_slice %204 {offsets = [0, 72], sizes = [18, 8], strides = [1, 1]} : vector<18x128xf32> to vector<18x8xf32>
    %cst_84 = arith.constant dense<0.000000e+00> : vector<18x18xf32>
    %224 = tpu.matmul %221, %222, %cst_84 {dimension_numbers = #tpu.dot_dimension_numbers<[1], [1], [0], [0], [0, 0, 1, 0], [], []>} : vector<18x8xf32>, vector<18x8xf32>, vector<18x18xf32> -> vector<18x18xf32>
    %225 = arith.mulf %224, %50 : vector<18x18xf32>
    %226 = arith.addf %225, %53 : vector<18x18xf32>
    %cst_85 = arith.constant dense<0xFF800000> : vector<18xf32>
    %227 = vector.multi_reduction <maximumf>, %226, %cst_85 [1] : vector<18x18xf32> to vector<18xf32>
    %228 = vector.shape_cast %227 : vector<18xf32> to vector<18x1xf32>
    %229 = vector.broadcast %228 : vector<18x1xf32> to vector<18x18xf32>
    %230 = arith.subf %226, %229 : vector<18x18xf32>
    %231 = math.exp %230 : vector<18x18xf32>
    %cst_86 = arith.constant dense<0.000000e+00> : vector<18xf32>
    %232 = vector.multi_reduction <add>, %231, %cst_86 [1] : vector<18x18xf32> to vector<18xf32>
    %233 = vector.shape_cast %232 : vector<18xf32> to vector<18x1xf32>
    %234 = vector.broadcast %233 : vector<18x1xf32> to vector<18x18xf32>
    %235 = arith.divf %231, %234 : vector<18x18xf32>
    %cst_87 = arith.constant dense<0.000000e+00> : vector<18x8xf32>
    %236 = tpu.matmul %235, %223, %cst_87 {dimension_numbers = #tpu.dot_dimension_numbers<[1], [0], [0], [1], [0, 0, 1, 1], [], []>} : vector<18x18xf32>, vector<18x8xf32>, vector<18x8xf32> -> vector<18x8xf32>
    %237 = vector.extract_strided_slice %204 {offsets = [0, 16], sizes = [18, 8], strides = [1, 1]} : vector<18x128xf32> to vector<18x8xf32>
    %238 = vector.extract_strided_slice %204 {offsets = [0, 48], sizes = [18, 8], strides = [1, 1]} : vector<18x128xf32> to vector<18x8xf32>
    %239 = vector.extract_strided_slice %204 {offsets = [0, 80], sizes = [18, 8], strides = [1, 1]} : vector<18x128xf32> to vector<18x8xf32>
    %cst_88 = arith.constant dense<0.000000e+00> : vector<18x18xf32>
    %240 = tpu.matmul %237, %238, %cst_88 {dimension_numbers = #tpu.dot_dimension_numbers<[1], [1], [0], [0], [0, 0, 1, 0], [], []>} : vector<18x8xf32>, vector<18x8xf32>, vector<18x18xf32> -> vector<18x18xf32>
    %241 = arith.mulf %240, %50 : vector<18x18xf32>
    %242 = arith.addf %241, %53 : vector<18x18xf32>
    %cst_89 = arith.constant dense<0xFF800000> : vector<18xf32>
    %243 = vector.multi_reduction <maximumf>, %242, %cst_89 [1] : vector<18x18xf32> to vector<18xf32>
    %244 = vector.shape_cast %243 : vector<18xf32> to vector<18x1xf32>
    %245 = vector.broadcast %244 : vector<18x1xf32> to vector<18x18xf32>
    %246 = arith.subf %242, %245 : vector<18x18xf32>
    %247 = math.exp %246 : vector<18x18xf32>
    %cst_90 = arith.constant dense<0.000000e+00> : vector<18xf32>
    %248 = vector.multi_reduction <add>, %247, %cst_90 [1] : vector<18x18xf32> to vector<18xf32>
    %249 = vector.shape_cast %248 : vector<18xf32> to vector<18x1xf32>
    %250 = vector.broadcast %249 : vector<18x1xf32> to vector<18x18xf32>
    %251 = arith.divf %247, %250 : vector<18x18xf32>
    %cst_91 = arith.constant dense<0.000000e+00> : vector<18x8xf32>
    %252 = tpu.matmul %251, %239, %cst_91 {dimension_numbers = #tpu.dot_dimension_numbers<[1], [0], [0], [1], [0, 0, 1, 1], [], []>} : vector<18x18xf32>, vector<18x8xf32>, vector<18x8xf32> -> vector<18x8xf32>
    %253 = vector.extract_strided_slice %204 {offsets = [0, 24], sizes = [18, 8], strides = [1, 1]} : vector<18x128xf32> to vector<18x8xf32>
    %254 = vector.extract_strided_slice %204 {offsets = [0, 56], sizes = [18, 8], strides = [1, 1]} : vector<18x128xf32> to vector<18x8xf32>
    %255 = vector.extract_strided_slice %204 {offsets = [0, 88], sizes = [18, 8], strides = [1, 1]} : vector<18x128xf32> to vector<18x8xf32>
    %cst_92 = arith.constant dense<0.000000e+00> : vector<18x18xf32>
    %256 = tpu.matmul %253, %254, %cst_92 {dimension_numbers = #tpu.dot_dimension_numbers<[1], [1], [0], [0], [0, 0, 1, 0], [], []>} : vector<18x8xf32>, vector<18x8xf32>, vector<18x18xf32> -> vector<18x18xf32>
    %257 = arith.mulf %256, %50 : vector<18x18xf32>
    %258 = arith.addf %257, %53 : vector<18x18xf32>
    %cst_93 = arith.constant dense<0xFF800000> : vector<18xf32>
    %259 = vector.multi_reduction <maximumf>, %258, %cst_93 [1] : vector<18x18xf32> to vector<18xf32>
    %260 = vector.shape_cast %259 : vector<18xf32> to vector<18x1xf32>
    %261 = vector.broadcast %260 : vector<18x1xf32> to vector<18x18xf32>
    %262 = arith.subf %258, %261 : vector<18x18xf32>
    %263 = math.exp %262 : vector<18x18xf32>
    %cst_94 = arith.constant dense<0.000000e+00> : vector<18xf32>
    %264 = vector.multi_reduction <add>, %263, %cst_94 [1] : vector<18x18xf32> to vector<18xf32>
    %265 = vector.shape_cast %264 : vector<18xf32> to vector<18x1xf32>
    %266 = vector.broadcast %265 : vector<18x1xf32> to vector<18x18xf32>
    %267 = arith.divf %263, %266 : vector<18x18xf32>
    %cst_95 = arith.constant dense<0.000000e+00> : vector<18x8xf32>
    %268 = tpu.matmul %267, %255, %cst_95 {dimension_numbers = #tpu.dot_dimension_numbers<[1], [0], [0], [1], [0, 0, 1, 1], [], []>} : vector<18x18xf32>, vector<18x8xf32>, vector<18x8xf32> -> vector<18x8xf32>
    %269 = tpu.concatenate %220, %236, %252, %268 in 1 : vector<18x8xf32>, vector<18x8xf32>, vector<18x8xf32>, vector<18x8xf32> -> vector<18x32xf32>
    %270 = arith.mulf %269, %55 : vector<18x32xf32>
    %c272 = arith.constant 272 : index
    %c0_96 = arith.constant 0 : index
    %271 = vector.load %arg1[%c272, %c0_96] : memref<568x32xf32, #tpu.memory_space<vmem>>, vector<32x32xf32>
    %cst_97 = arith.constant dense<0.000000e+00> : vector<18x32xf32>
    %272 = tpu.matmul %270, %271, %cst_97 {dimension_numbers = #tpu.dot_dimension_numbers<[1], [0], [0], [1], [0, 0, 1, 1], [], []>} : vector<18x32xf32>, vector<32x32xf32>, vector<18x32xf32> -> vector<18x32xf32>
    %273 = vector.extract_strided_slice %0 {offsets = [4, 0], sizes = [1, 32], strides = [1, 1]} : vector<8x32xf32> to vector<1x32xf32>
    %274 = vector.broadcast %273 : vector<1x32xf32> to vector<18x32xf32>
    %275 = arith.addf %272, %274 : vector<18x32xf32>
    %276 = arith.addf %181, %275 : vector<18x32xf32>
    %cst_98 = arith.constant dense<0.000000e+00> : vector<18xf32>
    %277 = vector.multi_reduction <add>, %276, %cst_98 [1] : vector<18x32xf32> to vector<18xf32>
    %278 = vector.shape_cast %277 : vector<18xf32> to vector<18x1xf32>
    %cst_99 = arith.constant 3.200000e+01 : f32
    %279 = vector.broadcast %cst_99 : f32 to vector<18x1xf32>
    %280 = arith.divf %278, %279 : vector<18x1xf32>
    %281 = vector.broadcast %280 : vector<18x1xf32> to vector<18x32xf32>
    %282 = arith.subf %276, %281 : vector<18x32xf32>
    %283 = arith.mulf %282, %282 : vector<18x32xf32>
    %cst_100 = arith.constant dense<0.000000e+00> : vector<18xf32>
    %284 = vector.multi_reduction <add>, %283, %cst_100 [1] : vector<18x32xf32> to vector<18xf32>
    %285 = vector.shape_cast %284 : vector<18xf32> to vector<18x1xf32>
    %cst_101 = arith.constant 3.200000e+01 : f32
    %286 = vector.broadcast %cst_101 : f32 to vector<18x1xf32>
    %287 = arith.divf %285, %286 : vector<18x1xf32>
    %288 = vector.broadcast %280 : vector<18x1xf32> to vector<18x32xf32>
    %289 = arith.subf %276, %288 : vector<18x32xf32>
    %cst_102 = arith.constant 9.99999974E-6 : f32
    %290 = vector.broadcast %cst_102 : f32 to vector<18x1xf32>
    %291 = arith.addf %287, %290 : vector<18x1xf32>
    %292 = math.rsqrt %291 : vector<18x1xf32>
    %293 = vector.broadcast %292 : vector<18x1xf32> to vector<18x32xf32>
    %294 = arith.mulf %289, %293 : vector<18x32xf32>
    %c96 = arith.constant 96 : index
    %c0_103 = arith.constant 0 : index
    %295 = vector.load %arg2[%c96, %c0_103] : memref<168x128xf32, #tpu.memory_space<vmem>>, vector<32x128xf32>
    %cst_104 = arith.constant dense<0.000000e+00> : vector<18x128xf32>
    %296 = tpu.matmul %294, %295, %cst_104 {dimension_numbers = #tpu.dot_dimension_numbers<[1], [0], [0], [1], [0, 0, 1, 1], [], []>} : vector<18x32xf32>, vector<32x128xf32>, vector<18x128xf32> -> vector<18x128xf32>
    %297 = vector.extract_strided_slice %1 {offsets = [3, 0], sizes = [1, 128], strides = [1, 1]} : vector<8x128xf32> to vector<1x128xf32>
    %298 = vector.broadcast %297 : vector<1x128xf32> to vector<18x128xf32>
    %299 = arith.addf %296, %298 : vector<18x128xf32>
    %cst_105 = arith.constant 0.000000e+00 : f32
    %300 = vector.broadcast %cst_105 : f32 to vector<18x128xf32>
    %301 = arith.maximumf %299, %300 : vector<18x128xf32>
    %c432 = arith.constant 432 : index
    %c0_106 = arith.constant 0 : index
    %302 = vector.load %arg1[%c432, %c0_106] : memref<568x32xf32, #tpu.memory_space<vmem>>, vector<128x32xf32>
    %cst_107 = arith.constant dense<0.000000e+00> : vector<18x32xf32>
    %303 = tpu.matmul %301, %302, %cst_107 {dimension_numbers = #tpu.dot_dimension_numbers<[1], [0], [0], [1], [0, 0, 1, 1], [], []>} : vector<18x128xf32>, vector<128x32xf32>, vector<18x32xf32> -> vector<18x32xf32>
    %304 = vector.extract_strided_slice %0 {offsets = [5, 0], sizes = [1, 32], strides = [1, 1]} : vector<8x32xf32> to vector<1x32xf32>
    %305 = vector.broadcast %304 : vector<1x32xf32> to vector<18x32xf32>
    %306 = arith.addf %303, %305 : vector<18x32xf32>
    %307 = arith.addf %276, %306 : vector<18x32xf32>
    %c128 = arith.constant 128 : index
    %c0_108 = arith.constant 0 : index
    %308 = vector.load %arg2[%c128, %c0_108] : memref<168x128xf32, #tpu.memory_space<vmem>>, vector<32x128xf32>
    %cst_109 = arith.constant dense<0.000000e+00> : vector<18x128xf32>
    %309 = tpu.matmul %307, %308, %cst_109 {dimension_numbers = #tpu.dot_dimension_numbers<[1], [0], [0], [1], [0, 0, 1, 1], [], []>} : vector<18x32xf32>, vector<32x128xf32>, vector<18x128xf32> -> vector<18x128xf32>
    %310 = vector.extract_strided_slice %1 {offsets = [4, 0], sizes = [1, 128], strides = [1, 1]} : vector<8x128xf32> to vector<1x128xf32>
    %311 = vector.broadcast %310 : vector<1x128xf32> to vector<18x128xf32>
    %312 = arith.addf %309, %311 : vector<18x128xf32>
    %c0_110 = arith.constant 0 : index
    %c0_111 = arith.constant 0 : index
    %313 = vector.load %arg5[%c0_110, %c0_111] : memref<18x128xf32, #tpu.memory_space<vmem>>, vector<18x128xf32>
    tpu.vector_store %arg5[%c0_110, %c0_111], %312 {strides = array<i32>} : memref<18x128xf32, #tpu.memory_space<vmem>>, vector<18x128xf32>,
    return
  }
}

</mosaic_0001>

<bundles_post_ra>
// kernel: forward.1
= control target key start
LH: loop header
LB: loop body
LE: loop exit
PB: predicated region body
PF: predicated region fallthrough
CT: control target
= control target key end

     0   :  { %vm61_vm0 = vcmask 1043456   ;;  %vm36_vm1 = vcmask 97280   ;;  %vm6085_vm2 = vmmov 1   ;;  %s6086_s28 = smov 96   ;;  %v32_v28 = vlaneseq  ;;  %s6090_s10 = smov 88   ;;  %s7718_s1 = inlined_call_operand.vmem [shape: f32[568,32], index: 1, kind: input, shape index: {}]   ;;  %s7719_s0 = inlined_call_operand.vmem [shape: f32[64,12], index: 0, kind: input, shape index: {}]   ;;  %s7720_s3 = inlined_call_operand.vmem [shape: f32[112,64], index: 3, kind: input, shape index: {}]   ;;  %s7721_s2 = inlined_call_operand.vmem [shape: f32[168,128], index: 2, kind: input, shape index: {}]   ;;  %s7722_s4 = inlined_call_operand.vmem [shape: f32[3,18,32], index: 4, kind: input, shape index: {}]   ;;  %s7723_s5 = inlined_call_operand.vmem [shape: f32[18,128], index: 5, kind: output, shape index: {}]  }
   0x1   :  { %v30_v0 = vld [vmem:[%s7718_s1] sm:$0xff]  ;;  %v31_v1 = vld [vmem:[%s7718_s1 + $0x8] sm:$0xf]  ;;  %vm5591_vm3 = vmpackc.low %vm61_vm0, %vm6085_vm2  ;;  %vm278_vm4 = vcmask 261120   ;;  %vm6088_vm9 = vmmov 0   ;;  %vm1310_vm10 = vcmask 523264  }
   0x2   :  { %v5590_v2 = vpack.c.bf16 %v31_v1, %v30_v0  ;;  %v22_v3 = vld [vmem:[%s7719_s0] sm:$0xff]  ;;  %v23_v5 = vld [vmem:[%s7719_s0 + $0x8] sm:$0xff]  ;;  %v6156_v6 = vld [vmem:[%s7720_s3 + $0x30] sm:$0xff]  ;;  %v6245_v29 = vshrl.u32 %v32_v28, 7  ;;  %vm1417_vm11 = vcmask 254976   ;;  %s6091_s11 = smov 80  }
   0x3   :  { %4972 = vmatprep.mubr.msk.f32.mxu0 %vm36_vm1, %v22_v3  ;;  %v6146_v4 = vld [vmem:[%s7720_s3 + $0x40] sm:$0xff]  ;;  %v24_v7 = vld [vmem:[%s7719_s0 + $0x10] sm:$0xff]  ;;  %238 = vrot.lane.b32.xlu0 %v6156_v6, %s6086_s28  ;;  %v6166_v8 = vld [vmem:[%s7720_s3 + $0x48] sm:$0xff]  ;;  %s6092_s12 = smov 120   ;;  %s6093_s13 = smov 112   ;;  %vm1558_vm12 = vcmask 64512  }
   0x4   :  { %5592 = vmatprep.subr.msk.bf16.mxu0 %vm5591_vm3, %v5590_v2  ;;  %242 = vrot.lane.b32.xlu1 %v6146_v4, %s6086_s28  ;;  %v6171_v9 = vld [vmem:[%s7720_s3 + $0x38] sm:$0xff]  ;;  %v274_v10 = vld [vmem:[%s7718_s1 + $0x30] sm:$0xff]  ;;  %v26_v14 = vld [vmem:[%s7719_s0 + $0x20] sm:$0xff]  ;;  %v34_v30 = vsub.s32 0, %v6245_v29  ;;  %vm196_vm5 = vcmp.lt.s32.totalorder %v6245_v29, 1  ;;  %vm221_vm6 = vcmp.lt.s32.totalorder %v6245_v29, 7 }
   0x5   :  { %5595 = vmatpush3.bf16.msk.msra.mxu0 %vm5591_vm3, %v5590_v2  ;;  %v275_v11 = vld [vmem:[%s7718_s1 + $0x38] sm:$0xff]  ;;  %v6199_v16 = vld [vmem:[%s7720_s3 + $0x50] sm:$0xff]  ;;  %v27_v17 = vld [vmem:[%s7719_s0 + $0x28] sm:$0xff]  ;;  %vm996_vm7 = vcmp.lt.s32.totalorder %v6245_v29, 6  ;;  %vm1154_vm8 = vcmp.lt.s32.totalorder %v6245_v29, 5  ;;  %s6095_s14 = smov 104  }
   0x6   :  { %v5596_v12 = vpack.c.bf16 %v275_v11, %v274_v10  ;;  %v25_v13 = vld [vmem:[%s7719_s0 + $0x18] sm:$0xff]  ;;  %v28_v18 = vld [vmem:[%s7719_s0 + $0x30] sm:$0xff]  ;;  %v6216_v19 = vld [vmem:[%s7720_s3 + $0x68] sm:$0xff]  ;;  %s6096_s15 = smov 64   ;;  %vm1709_vm14 = vcmask 1041408   ;;  %vm1657_vm15 = vcmask 146432  }
   0x7   :  { %240 = vrot.lane.b32.xlu0 %v6171_v9, %s6086_s28  ;;  %v6194_v15 = vld [vmem:[%s7720_s3 + $0x58] sm:$0xff]  ;;  %v6221_v20 = vld [vmem:[%s7720_s3 + $0x60] sm:$0xff]  ;;  %v277_v23 = vld [vmem:[%s7718_s1 + $0x48] sm:$0xff]  ;;  %vm1664_vm0 = vcmask 140288   ;;  %s6097_s27 = smov 56   ;;  %s6098_s29 = smov 48  }
   0x8   :  { %4973 = vmatmul.mubr.msk.f32.vlgmr.msra.gmra.mrb[0].mxu0 %vm36_vm1, %v23_v5  ;;  %244 = vrot.lane.b32.xlu1 %v6166_v8, %s6086_s28  ;;  %v29_v21 = vld [vmem:[%s7719_s0 + $0x38] sm:$0xff]  ;;  %v276_v22 = vld [vmem:[%s7718_s1 + $0x40] sm:$0xff]  ;;  %v270_v25 = vld [vmem:[%s7718_s1 + $0x10] sm:$0xff]  ;;  %s6094_s0 = smov 72   ;;  %s6099_s30 = smov 40   ;;  %vm2561_vm2 = vcmask 195584  }
   0x9   :  { %4975 = vmatprep.mubr.msk.f32.mxu0 %vm36_vm1, %v24_v7  ;;  %5597 = vmatprep.subr.bf16.mxu0 %v5596_v12  ;;  %v5600_v24 = vpack.c.bf16 %v277_v23, %v276_v22  ;;  %v271_v26 = vld [vmem:[%s7718_s1 + $0x18] sm:$0xff]  ;;  %v6251_v31 = vld [vmem:[%s7718_s1 + $0x230] sm:$0xff]  ;;  %v272_v49 = vld [vmem:[%s7718_s1 + $0x20] sm:$0xff]  ;;  %s6100_s6 = smov 8   ;;  %s6101_s17 = smov 16  }
   0xa   :  { %5599 = vmatpush3.bf16.msra.mxu0 %v5596_v12  ;;  %5810 = vmatprep.subr.bf16.mxu1 %v5596_v12  ;;  %v5604_v27 = vpack.c.bf16 %v271_v26, %v270_v25  ;;  %v35_v32 = vrot.slane %v6251_v31, %v34_v30  ;;  %v273_v50 = vld [vmem:[%s7718_s1 + $0x28] sm:$0xff]  ;;  %v537_v60 = vld [vmem:[%s7718_s1 + $0x50] sm:$0xff]  ;;  %v538_v61 = vld [vmem:[%s7718_s1 + $0x58] sm:$0xff]  ;;  %s6102_s22 = smov 24  }
   0xb   :  { %5812 = vmatpush3.bf16.msra.mxu1 %v5596_v12  ;;  %246 = vrot.lane.b32.xlu0 %v6199_v16, %s6086_s28  ;;  %v5608_v56 = vpack.c.bf16 %v273_v50, %v272_v49  ;;  %v5612_v2 = vpack.c.bf16 %v538_v61, %v537_v60  ;;  %v539_v7 = vld [vmem:[%s7718_s1 + $0x60] sm:$0xff]  ;;  %v540_v10 = vld [vmem:[%s7718_s1 + $0x68] sm:$0xff]  ;;  %vm6704_vm13 = vmpackc.low %vm1558_vm12, %vm1558_vm12 }
   0xc   :  { %4976 = vmatmul.mubr.msk.f32.gmra.mrb[2].mxu0 %vm36_vm1, %v25_v13  ;;  %248 = vrot.lane.b32.xlu1 %v6194_v15, %s6086_s28 }
   0xd   :  { %4978 = vmatprep.mubr.msk.f32.mxu0 %vm36_vm1, %v26_v14  ;;  %5601 = vmatprep.subr.bf16.mxu0 %v5600_v24 }
   0xe   :  { %5811 = vmatprep.subr.bf16.mxu1 %v5600_v24  ;;  %5603 = vmatpush3.bf16.msra.mxu0 %v5600_v24 }
   0xf   :  { %250 = vrot.lane.b32.xlu0 %v6221_v20, %s6086_s28  ;;  %5813 = vmatpush3.bf16.msra.mxu1 %v5600_v24 }
  0x10   :  { %4979 = vmatmul.mubr.msk.f32.gmra.mrb[4].mxu0 %vm36_vm1, %v27_v17  ;;  %252 = vrot.lane.b32.xlu1 %v6216_v19, %s6086_s28 }
  0x11   :  { %4981 = vmatprep.mubr.msk.f32.mxu0 %vm36_vm1, %v28_v18  ;;  %5605 = vmatprep.subr.bf16.mxu1 %v5604_v27  ;;  %v5616_v18 = vpack.c.bf16 %v540_v10, %v539_v7  ;;  %v726_v7 = vld [vmem:[%s7718_s1 + $0x90] sm:$0xff]  ;;  %v727_v10 = vld [vmem:[%s7718_s1 + $0x98] sm:$0xff] }
  0x14   :  { %4982 = vmatmul.mubr.msk.f32.gmra.mrb[6].mxu0 %vm36_vm1, %v29_v21  ;;  %vm2557_vm1 = vcmask 130048  }
  0xdb   :  { %v4974_v33 = vpop.f32.mrb[0].mxu0 }
  0xdc   :  { %v137_v34 = vadd.f32 %v4974_v33, %v35_v32  ;;  %v131_v35 = vpop.f32.mrb[1].mxu0  ;;  %v243_v33 = vpop.permute.xlu1 %242 }
  0xdd   :  { %v132_v36 = vadd.f32 %v131_v35, %v35_v32 }
  0xde   :  { %v6258_v39 = vmax.f32 %v137_v34, 0.0 }
  0xdf   :  { %v6256_v37 = vmax.f32 %v132_v36, 0.0  ;;  %v4977_v38 = vpop.f32.mrb[2].mxu0 }
  0xe0   :  { %v147_v40 = vadd.f32 %v4977_v38, %v35_v32  ;;  %v141_v41 = vpop.f32.mrb[3].mxu0  ;;  %v187_v57 = vrot.slane %v6258_v39, 7  ;;  %v214_v28 = vrot.slane %v6258_v39, 1 }
  0xe1   :  { %v142_v42 = vadd.f32 %v141_v41, %v35_v32  ;;  %4992 = vmatprep.mubr.msk.f32.mxu0 %vm278_vm4, %v6256_v37  ;;  %v186_v58 = vrot.slane %v6256_v37, 7 }
  0xe2   :  { %4993 = vmatmul.mubr.msk.f32.vlgmr.msra.gmra.mrb[8].mxu0 %vm278_vm4, %v6258_v39  ;;  %v6266_v45 = vmax.f32 %v147_v40, 0.0 }
  0xe3   :  { %v6264_v43 = vmax.f32 %v142_v42, 0.0  ;;  %v4980_v44 = vpop.f32.mrb[4].mxu0  ;;  %v203_v3 = vsel %vm196_vm5, %v186_v58, %v187_v57  ;;  %v245_v42 = vpop.permute.xlu1 %244 }
  0xe4   :  { %v151_v46 = vpop.f32.mrb[5].mxu0  ;;  %v157_v47 = vadd.f32 %v4980_v44, %v35_v32  ;;  %v189_v5 = vrot.slane %v6266_v45, 7  ;;  %v206_v17 = vmul.f32 %v203_v3, %v6171_v9  ;;  %v239_v9 = vpop.permute.xlu0 %238  ;;  %v216_v36 = vrot.slane %v6266_v45, 1 }
  0xe5   :  { %v152_v48 = vadd.f32 %v151_v46, %v35_v32  ;;  %4995 = vmatprep.mubr.msk.f32.mxu0 %vm278_vm4, %v6264_v43  ;;  %v188_v62 = vrot.slane %v6264_v43, 7 }
  0xe6   :  { %4996 = vmatmul.mubr.msk.f32.gmra.mrb[10].mxu0 %vm278_vm4, %v6266_v45  ;;  %v6280_v53 = vmax.f32 %v157_v47, 0.0 }
  0xe7   :  { %v6278_v51 = vmax.f32 %v152_v48, 0.0  ;;  %v4983_v52 = vpop.f32.mrb[6].mxu0  ;;  %v202_v13 = vsel %vm196_vm5, %v187_v57, %v188_v62  ;;  %v201_v23 = vsel %vm196_vm5, %v188_v62, %v189_v5 }
  0xe8   :  { %v167_v54 = vadd.f32 %v4983_v52, %v35_v32  ;;  %v161_v55 = vpop.f32.mrb[7].mxu0  ;;  %v191_v21 = vrot.slane %v6280_v53, 7  ;;  %v207_v22 = vmul.f32 %v202_v13, %v6146_v4  ;;  %v208_v25 = vmul.f32 %v201_v23, %v6166_v8  ;;  %v241_v40 = vpop.permute.xlu0 %240  ;;  %v729_v13 = vld [vmem:[%s7718_s1 + $0xa8] sm:$0xff] }
  0xe9   :  { %v162_v59 = vadd.f32 %v161_v55, %v35_v32  ;;  %4998 = vmatprep.mubr.msk.f32.mxu1 %vm278_vm4, %v6278_v51  ;;  %v190_v11 = vrot.slane %v6278_v51, 7  ;;  %v217_v44 = vrot.slane %v6278_v51, 1  ;;  %v218_v47 = vrot.slane %v6280_v53, 1 }
  0xea   :  { %v6294_v63 = vmax.f32 %v167_v54, 0.0  ;;  %4999 = vmatmul.mubr.msk.f32.vlgmr.msra.gmra.mrb[0].mxu1 %vm278_vm4, %v6280_v53 }
  0xeb   :  { %v6298_v0 = vmax.f32 %v162_v59, 0.0  ;;  %5607 = vmatpush3.bf16.msra.mxu1 %v5604_v27  ;;  %v199_v4 = vsel %vm196_vm5, %v190_v11, %v191_v21  ;;  %v213_v27 = vrot.slane %v6256_v37, 1  ;;  %v224_v54 = vsel %vm221_vm6, %v217_v44, %v218_v47 }
  0xec   :  { %v193_v1 = vrot.slane %v6294_v63, 7  ;;  %5609 = vmatprep.subr.bf16.mxu1 %v5608_v56  ;;  %v210_v8 = vmul.f32 %v199_v4, %v6194_v15  ;;  %v247_v49 = vpop.permute.xlu0 %246  ;;  %v220_v55 = vrot.slane %v6294_v63, 1 }
  0xed   :  { %5001 = vmatprep.mubr.msk.f32.mxu1 %vm278_vm4, %v6298_v0  ;;  %v192_v24 = vrot.slane %v6298_v0, 7  ;;  %v228_v38 = vsel %vm221_vm6, %v213_v27, %v214_v28  ;;  %v219_v52 = vrot.slane %v6298_v0, 1  ;;  %v266_v59 = vmul.f32 %v247_v49, %v224_v54 }
  0xee   :  { %5002 = vmatmul.mubr.msk.f32.gmra.mrb[2].mxu1 %vm278_vm4, %v6294_v63  ;;  %v204_v12 = vsel %vm196_vm5, %v193_v1, %v186_v58  ;;  %v262_v15 = vmul.f32 %v239_v9, %v228_v38  ;;  %v680_v9 = vsub.s32 1, %v6245_v29  ;;  %v709_v38 = vld [vmem:[%s7718_s1 + $0x88] sm:$0xff] }
  0xef   :  { %5611 = vmatpush3.bf16.msra.mxu1 %v5608_v56  ;;  %v205_v14 = vmul.f32 %v204_v12, %v6156_v6  ;;  %v200_v6 = vsel %vm196_vm5, %v189_v5, %v190_v11  ;;  %v198_v32 = vsel %vm196_vm5, %v191_v21, %v192_v24  ;;  %v197_v35 = vsel %vm196_vm5, %v192_v24, %v193_v1  ;;  %v249_v56 = vpop.permute.xlu1 %248  ;;  %v728_v12 = vld [vmem:[%s7718_s1 + $0xa0] sm:$0xff] }
  0xf0   :  { %5613 = vmatprep.subr.bf16.mxu1 %v5612_v2  ;;  %v209_v26 = vmul.f32 %v200_v6, %v6199_v16  ;;  %v215_v16 = vrot.slane %v6264_v43, 1  ;;  %v211_v34 = vmul.f32 %v198_v32, %v6221_v20  ;;  %v212_v41 = vmul.f32 %v197_v35, %v6216_v19  ;;  %v251_v60 = vpop.permute.xlu0 %250 }
  0xf1   :  { %5012 = vmatprep.mubr.msk.f32.mxu1 %vm278_vm4, %v205_v14  ;;  %v225_v19 = vsel %vm221_vm6, %v216_v36, %v217_v44  ;;  %v223_v58 = vsel %vm221_vm6, %v218_v47, %v219_v52  ;;  %v222_v61 = vsel %vm221_vm6, %v219_v52, %v220_v55  ;;  %v5620_v11 = vpack.c.bf16 %v727_v10, %v726_v7 }
  0xf2   :  { %5013 = vmatmul.mubr.msk.f32.vlgmr.msra.gmra.mrb[4].mxu1 %vm278_vm4, %v206_v17  ;;  %v227_v20 = vsel %vm221_vm6, %v214_v28, %v215_v16  ;;  %v226_v46 = vsel %vm221_vm6, %v215_v16, %v216_v36  ;;  %v265_v57 = vmul.f32 %v245_v42, %v225_v19  ;;  %v267_v62 = vmul.f32 %v249_v56, %v223_v58  ;;  %v706_v17 = vld [vmem:[%s7718_s1 + $0x70] sm:$0xff]  ;;  %v708_v16 = vld [vmem:[%s7718_s1 + $0x80] sm:$0xff] }
  0xf3   :  { %5015 = vmatprep.mubr.msk.f32.mxu1 %vm278_vm4, %v207_v22  ;;  %5615 = vmatpush3.bf16.msra.mxu1 %v5612_v2  ;;  %v263_v48 = vmul.f32 %v241_v40, %v227_v20  ;;  %v264_v50 = vmul.f32 %v243_v33, %v226_v46  ;;  %v253_v1 = vpop.permute.xlu1 %252  ;;  %v229_v2 = vsel %vm221_vm6, %v220_v55, %v213_v27  ;;  %v1006_v40 = vld [vmem:[%s7718_s1 + $0xb8] sm:$0xff] }
  0xf4   :  { %5617 = vmatprep.subr.bf16.mxu1 %v5616_v18  ;;  %v268_v3 = vmul.f32 %v251_v60, %v222_v61  ;;  %v269_v5 = vmul.f32 %v253_v1, %v229_v2  ;;  %5621 = vmatprep.subr.bf16.mxu0 %v5620_v11  ;;  %v5624_v14 = vpack.c.bf16 %v729_v13, %v728_v12 }
  0xf5   :  { %5623 = vmatpush3.bf16.msra.mxu0 %v5620_v11 }
  0xf6   :  { %5016 = vmatmul.mubr.msk.f32.gmra.mrb[6].mxu1 %vm278_vm4, %v208_v25  ;;  %5625 = vmatprep.subr.bf16.mxu0 %v5624_v14  ;;  %v681_v25 = vrot.slane %v6251_v31, %v680_v9  ;;  %v1005_v31 = vld [vmem:[%s7718_s1 + $0xb0] sm:$0xff] }
  0xf7   :  { %5018 = vmatprep.mubr.msk.f32.mxu1 %vm278_vm4, %v209_v26  ;;  %5619 = vmatpush3.bf16.msra.mxu1 %v5616_v18  ;;  %v707_v18 = vld [vmem:[%s7718_s1 + $0x78] sm:$0xff]  ;;  %v6427_v49 = vpack.c.bf16 %v1006_v40, %v1005_v31 }
  0xf8   :  { %v6398_v21 = vpack.c.bf16 %v707_v18, %v706_v17 }
  0xf9   :  { %5627 = vmatpush3.bf16.msra.mxu0 %v5624_v14 }
  0xfa   :  { %5019 = vmatmul.mubr.msk.f32.gmra.mrb[0].mxu1 %vm278_vm4, %v210_v8  ;;  %5629 = vmatprep.subr.bf16.mxu0 %v6398_v21 }
  0xfb   :  { %5021 = vmatprep.mubr.msk.f32.mxu1 %vm278_vm4, %v211_v34 }
  0xfe   :  { %5022 = vmatmul.mubr.msk.f32.gmra.mrb[2].mxu1 %vm278_vm4, %v212_v41 }
  0xff   :  { %5032 = vmatprep.mubr.msk.f32.mxu1 %vm278_vm4, %v262_v15 }
 0x102   :  { %5033 = vmatmul.mubr.msk.f32.vlgmr.msra.gmra.mrb[4].mxu1 %vm278_vm4, %v263_v48  ;;  %v6425_v48 = vpack.c.bf16 %v709_v38, %v708_v16 }
 0x103   :  { %5035 = vmatprep.mubr.msk.f32.mxu1 %vm278_vm4, %v264_v50 }
 0x106   :  { %5036 = vmatmul.mubr.msk.f32.gmra.mrb[6].mxu1 %vm278_vm4, %v265_v57 }
 0x107   :  { %5038 = vmatprep.mubr.msk.f32.mxu1 %vm278_vm4, %v266_v59 }
 0x10a   :  { %5039 = vmatmul.mubr.msk.f32.gmra.mrb[0].mxu1 %vm278_vm4, %v267_v62 }
 0x10b   :  { %5041 = vmatprep.mubr.msk.f32.mxu1 %vm278_vm4, %v268_v3 }
 0x10e   :  { %5042 = vmatmul.mubr.msk.f32.gmra.mrb[2].mxu1 %vm278_vm4, %v269_v5 }
 0x1b5   :  { %v4994_v22 = vpop.f32.mrb[8].mxu0 }
 0x1b6   :  { %v369_v23 = vpop.f32.mrb[9].mxu0 }
 0x1b9   :  { %v4997_v24 = vpop.f32.mrb[10].mxu0 }
 0x1ba   :  { %v379_v6 = vpop.f32.mrb[11].mxu0 }
 0x1d5   :  { %v5034_v26 = vpop.f32.mrb[4].mxu1 }
 0x1d6   :  { %v5814_v4 = vadd.f32 %v5034_v26, %v4994_v22  ;;  %v631_v27 = vpop.f32.mrb[5].mxu1 }
 0x1d7   :  { %v5815_v28 = vadd.f32 %v631_v27, %v369_v23 }
 0x1d8   :  { %v683_v32 = vadd.f32 %v5814_v4, %v681_v25 }
 0x1d9   :  { %v682_v33 = vadd.f32 %v5815_v28, %v681_v25  ;;  %v5037_v8 = vpop.f32.mrb[6].mxu1 }
 0x1da   :  { %v691_v34 = vmax.f32 %v683_v32, 0.0  ;;  %v5816_v35 = vadd.f32 %v5037_v8, %v4997_v24  ;;  %v641_v36 = vpop.f32.mrb[7].mxu1 }
 0x1db   :  { %v690_v41 = vmax.f32 %v682_v33, 0.0  ;;  %v5817_v15 = vadd.f32 %v641_v36, %v379_v6 }
 0x1dc   :  { %v6418_v42 = vadd.f32 %v691_v34, %v6258_v39  ;;  %v685_v44 = vadd.f32 %v5816_v35, %v681_v25 }
 0x1dd   :  { %v6423_v20 = vadd.f32 %v690_v41, %v6256_v37  ;;  %v684_v46 = vadd.f32 %v5817_v15, %v681_v25  ;;  %v5040_v47 = vpop.f32.mrb[0].mxu1 }
 0x1de   :  { %v693_v50 = vmax.f32 %v685_v44, 0.0  ;;  %v687_v19 = vadd.f32 %v5040_v47, %v681_v25  ;;  %v651_v52 = vpop.f32.mrb[1].mxu1  ;;  %v711_v39 = vrot.slane %v6418_v42, 1  ;;  %v989_v54 = vrot.slane %v6418_v42, 2 }
 0x1df   :  { %v692_v55 = vmax.f32 %v684_v46, 0.0  ;;  %v686_v56 = vadd.f32 %v681_v25, %v651_v52  ;;  %v710_v57 = vrot.slane %v6423_v20, 1  ;;  %v988_v37 = vrot.slane %v6423_v20, 2 }
 0x1e0   :  { %v6434_v58 = vadd.f32 %v693_v50, %v6266_v45  ;;  %v695_v59 = vmax.f32 %v687_v19, 0.0  ;;  %v1146_v60 = vrot.slane %v6423_v20, 3  ;;  %v1147_v61 = vrot.slane %v6418_v42, 3 }
 0x1e1   :  { %v6439_v62 = vadd.f32 %v692_v55, %v6264_v43  ;;  %v694_v1 = vmax.f32 %v686_v56, 0.0  ;;  %v5043_v2 = vpop.f32.mrb[2].mxu1  ;;  %v724_v3 = vsel %vm221_vm6, %v710_v57, %v711_v39  ;;  %v6445_v5 = vsel %vm996_vm7, %v988_v37, %v989_v54 }
 0x1e2   :  { %v6448_v45 = vadd.f32 %v695_v59, %v6280_v53  ;;  %v689_v7 = vadd.f32 %v5043_v2, %v681_v25  ;;  %v661_v10 = vpop.f32.mrb[3].mxu1  ;;  %5052 = vmatprep.mubr.msk.f32.mxu0 %vm278_vm4, %v724_v3  ;;  %v713_v11 = vrot.slane %v6434_v58, 1  ;;  %v991_v43 = vrot.slane %v6434_v58, 2  ;;  %v1007_v59 = vld [vmem:[%s7718_s1 + $0xc0] sm:$0xff]  ;;  %v1163_v2 = vld [vmem:[%s7718_s1 + $0xd0] sm:$0xff] }
 0x1e3   :  { %v6454_v12 = vadd.f32 %v694_v1, %v6278_v51  ;;  %v688_v13 = vadd.f32 %v681_v25, %v661_v10  ;;  %v712_v14 = vrot.slane %v6439_v62, 1  ;;  %v990_v17 = vrot.slane %v6439_v62, 2 }
 0x1e4   :  { %v697_v18 = vmax.f32 %v689_v7, 0.0  ;;  %v715_v53 = vrot.slane %v6448_v45, 1  ;;  %v993_v22 = vrot.slane %v6448_v45, 2  ;;  %v6464_v23 = vsel %vm1154_vm8, %v1146_v60, %v1147_v61 }
 0x1e5   :  { %v696_v24 = vmax.f32 %v688_v13, 0.0  ;;  %v723_v51 = vsel %vm221_vm6, %v711_v39, %v712_v14  ;;  %v722_v6 = vsel %vm221_vm6, %v712_v14, %v713_v11  ;;  %v714_v25 = vrot.slane %v6454_v12, 1 }
 0x1e6   :  { %v705_v26 = vadd.f32 %v697_v18, %v6294_v63  ;;  %5053 = vmatmul.mubr.msk.f32.vlgmr.msra.gmra.mrb[12].mxu0 %vm278_vm4, %v723_v51  ;;  %v6475_v4 = vsel %vm996_vm7, %v989_v54, %v990_v17  ;;  %v6479_v27 = vsel %vm996_vm7, %v990_v17, %v991_v43  ;;  %v992_v28 = vrot.slane %v6454_v12, 2  ;;  %v1307_v51 = vld [vmem:[%s7720_s3 + $0x18] sm:$0xff] }
 0x1e7   :  { %v704_v32 = vadd.f32 %v696_v24, %v6298_v0  ;;  %5055 = vmatprep.mubr.msk.f32.mxu0 %vm278_vm4, %v722_v6  ;;  %v721_v33 = vsel %vm221_vm6, %v713_v11, %v714_v25  ;;  %v720_v63 = vsel %vm221_vm6, %v714_v25, %v715_v53  ;;  %5631 = vmatpush3.bf16.msra.mxu0 %v6398_v21  ;;  %v1148_v8 = vrot.slane %v6439_v62, 3  ;;  %v1306_v24 = vld [vmem:[%s7720_s3 + $0x10] sm:$0x3] }
 0x1e8   :  { %v717_v16 = vrot.slane %v705_v26, 1  ;;  %5633 = vmatprep.subr.bf16.mxu0 %v6425_v48  ;;  %v1000_v34 = vsel %vm996_vm7, %v991_v43, %v992_v28  ;;  %v999_v0 = vsel %vm996_vm7, %v992_v28, %v993_v22  ;;  %v995_v35 = vrot.slane %v705_v26, 2 }
 0x1e9   :  { %v716_v36 = vrot.slane %v704_v32, 1  ;;  %v994_v38 = vrot.slane %v704_v32, 2  ;;  %v1160_v31 = vsel %vm1154_vm8, %v1147_v61, %v1148_v8  ;;  %v1149_v40 = vrot.slane %v6434_v58, 3  ;;  %v1008_v61 = vld [vmem:[%s7718_s1 + $0xc8] sm:$0xff] }
 0x1ea   :  { %5056 = vmatmul.mubr.msk.f32.gmra.mrb[14].mxu0 %vm278_vm4, %v721_v33  ;;  %v725_v21 = vsel %vm221_vm6, %v717_v16, %v710_v57  ;;  %v1004_v41 = vsel %vm996_vm7, %v995_v35, %v988_v37  ;;  %v1150_v15 = vrot.slane %v6454_v12, 3  ;;  %v1151_v44 = vrot.slane %v6448_v45, 3 }
 0x1eb   :  { %5058 = vmatprep.mubr.msk.f32.mxu0 %vm278_vm4, %v720_v63  ;;  %v719_v46 = vsel %vm221_vm6, %v715_v53, %v716_v36  ;;  %v718_v47 = vsel %vm221_vm6, %v716_v36, %v717_v16  ;;  %5635 = vmatpush3.bf16.msra.mxu0 %v6425_v48  ;;  %v998_v50 = vsel %vm996_vm7, %v993_v22, %v994_v38  ;;  %v1152_v19 = vrot.slane %v704_v32, 3  ;;  %v1304_v22 = vld [vmem:[%s7720_s3] sm:$0xff]  ;;  %v1309_v63 = vld [vmem:[%s7720_s3 + $0x28] sm:$0x3] }
 0x1ec   :  { %5637 = vmatprep.subr.bf16.mxu0 %v6427_v49  ;;  %v997_v52 = vsel %vm996_vm7, %v994_v38, %v995_v35  ;;  %v1159_v39 = vsel %vm1154_vm8, %v1148_v8, %v1149_v40  ;;  %v1158_v54 = vsel %vm1154_vm8, %v1149_v40, %v1150_v15  ;;  %v1157_v55 = vsel %vm1154_vm8, %v1150_v15, %v1151_v44 }
 0x1ed   :  { %v1156_v48 = vsel %vm1154_vm8, %v1151_v44, %v1152_v19  ;;  %v1153_v56 = vrot.slane %v705_v26, 3  ;;  %v5640_v1 = vpack.c.bf16 %v1008_v61, %v1007_v59 }
 0x1ee   :  { %5059 = vmatmul.mubr.msk.f32.gmra.mrb[16].mxu0 %vm278_vm4, %v719_v46 }
 0x1ef   :  { %5061 = vmatprep.mubr.msk.f32.mxu0 %vm278_vm4, %v718_v47  ;;  %v1155_v57 = vsel %vm1154_vm8, %v1152_v19, %v1153_v56  ;;  %v1162_v37 = vsel %vm1154_vm8, %v1153_v56, %v1146_v60  ;;  %v1164_v60 = vld [vmem:[%s7718_s1 + $0xd8] sm:$0xff] }
 0x1f0   :  { %v5644_v3 = vpack.c.bf16 %v1164_v60, %v1163_v2 }
 0x1f2   :  { %5062 = vmatmul.mubr.msk.f32.gmra.mrb[18].mxu0 %vm278_vm4, %v725_v21 }
 0x1f3   :  { %5072 = vmatprep.mubr.msk.f32.mxu0 %vm278_vm4, %v6423_v20  ;;  %v1166_v20 = vld [vmem:[%s7718_s1 + $0xe8] sm:$0xff] }
 0x1f6   :  { %5073 = vmatmul.mubr.msk.f32.vlgmr.msra.gmra.mrb[12].mxu0 %vm278_vm4, %v6418_v42  ;;  %v1165_v42 = vld [vmem:[%s7718_s1 + $0xe0] sm:$0xff] }
 0x1f7   :  { %5075 = vmatprep.mubr.msk.f32.mxu0 %vm278_vm4, %v6439_v62  ;;  %5639 = vmatpush3.bf16.msra.mxu0 %v6427_v49  ;;  %v5648_v49 = vpack.c.bf16 %v1166_v20, %v1165_v42  ;;  %v6089_v62 = vmov 0.0  }
 0x1f8   :  { %5641 = vmatprep.subr.bf16.mxu0 %v5640_v1  ;;  %5140 = vmatprep.mubr.msk.f32.mxu1 %vm6088_vm9, %v6089_v62 }
 0x1fa   :  { %5076 = vmatmul.mubr.msk.f32.gmra.mrb[14].mxu0 %vm278_vm4, %v6434_v58  ;;  %v6087_v58 = vmov 0.0|0.0  }
 0x1fb   :  { %5078 = vmatprep.mubr.msk.f32.mxu0 %vm278_vm4, %v6454_v12  ;;  %5643 = vmatpush3.bf16.msra.mxu0 %v5640_v1 }
 0x1fc   :  { %5645 = vmatprep.subr.bf16.mxu0 %v5644_v3  ;;  %5652 = vmatprep.subr.bf16.mxu1 %v6087_v58 }
 0x1fe   :  { %5079 = vmatmul.mubr.msk.f32.gmra.mrb[16].mxu0 %vm278_vm4, %v6448_v45 }
 0x1ff   :  { %5081 = vmatprep.mubr.msk.f32.mxu0 %vm278_vm4, %v704_v32 }
 0x202   :  { %5082 = vmatmul.mubr.msk.f32.gmra.mrb[18].mxu0 %vm278_vm4, %v705_v26 }
 0x203   :  { %5092 = vmatprep.mubr.msk.f32.mxu0 %vm278_vm4, %v6445_v5 }
 0x206   :  { %5093 = vmatmul.mubr.msk.f32.vlgmr.msra.gmra.mrb[12].mxu0 %vm278_vm4, %v6475_v4  ;;  %v1308_v4 = vld [vmem:[%s7720_s3 + $0x20] sm:$0xff] }
 0x207   :  { %5095 = vmatprep.mubr.msk.f32.mxu0 %vm278_vm4, %v6479_v27  ;;  %5647 = vmatpush3.bf16.msra.mxu0 %v5644_v3 }
 0x208   :  { %5649 = vmatprep.subr.bf16.mxu0 %v5648_v49 }
 0x20a   :  { %5096 = vmatmul.mubr.msk.f32.gmra.mrb[14].mxu0 %vm278_vm4, %v1000_v34 }
 0x20b   :  { %5098 = vmatprep.mubr.msk.f32.mxu0 %vm278_vm4, %v999_v0  ;;  %5651 = vmatpush3.bf16.msra.mxu0 %v5648_v49 }
 0x20c   :  { %5674 = vmatprep.subr.bf16.mxu0 %v6087_v58 }
 0x20e   :  { %5099 = vmatmul.mubr.msk.f32.gmra.mrb[16].mxu0 %vm278_vm4, %v998_v50 }
 0x20f   :  { %5101 = vmatprep.mubr.msk.f32.mxu0 %vm278_vm4, %v997_v52 }
 0x212   :  { %5102 = vmatmul.mubr.msk.f32.gmra.mrb[18].mxu0 %vm278_vm4, %v1004_v41 }
 0x213   :  { %5112 = vmatprep.mubr.msk.f32.mxu0 %vm278_vm4, %v6464_v23  ;;  %v1305_v23 = vld [vmem:[%s7720_s3 + $0x8] sm:$0xff] }
 0x216   :  { %5113 = vmatmul.mubr.msk.f32.vlgmr.msra.gmra.mrb[12].mxu0 %vm278_vm4, %v1160_v31 }
 0x217   :  { %5115 = vmatprep.mubr.msk.f32.mxu0 %vm278_vm4, %v1159_v39 }
 0x21a   :  { %5116 = vmatmul.mubr.msk.f32.gmra.mrb[14].mxu0 %vm278_vm4, %v1158_v54 }
 0x21b   :  { %5118 = vmatprep.mubr.msk.f32.mxu0 %vm278_vm4, %v1157_v55  ;;  %v1452_v55 = vld [vmem:[%s7721_s2] sm:$0xff] }
 0x21e   :  { %5119 = vmatmul.mubr.msk.f32.gmra.mrb[16].mxu0 %vm278_vm4, %v1156_v48  ;;  %v1453_v48 = vld [vmem:[%s7721_s2 + $0x8] sm:$0xff] }
 0x21f   :  { %5121 = vmatprep.mubr.msk.f32.mxu0 %vm278_vm4, %v1155_v57  ;;  %v5665_v56 = vpack.c.bf16 %v1453_v48, %v1452_v55  ;;  %v1454_v57 = vld [vmem:[%s7721_s2 + $0x10] sm:$0xff] }
 0x222   :  { %5122 = vmatmul.mubr.msk.f32.gmra.mrb[18].mxu0 %vm278_vm4, %v1162_v37  ;;  %v1455_v37 = vld [vmem:[%s7721_s2 + $0x18] sm:$0xff] }
 0x223   :  { %5187 = vmatprep.mubr.msk.f32.mxu0 %vm6088_vm9, %v6089_v62  ;;  %v5668_v59 = vpack.c.bf16 %v1455_v37, %v1454_v57 }
 0x2e9   :  { %v5114_v5 = vpop.f32.mrb[12].mxu0 }
 0x2ea   :  { %v1257_v45 = vpop.f32.mrb[13].mxu0 }
 0x2eb   :  { %v5653_v7 = vpack.c.bf16 %v5114_v5, %v1257_v45 }
 0x2ed   :  { %v5117_v10 = vpop.f32.mrb[14].mxu0  ;;  %5654 = vmatpush3.bf16.msra.mxu1 %v5653_v7 }
 0x2ee   :  { %v1267_v11 = vpop.f32.mrb[15].mxu0  ;;  %5655 = vmatprep.subr.bf16.mxu1 %v6087_v58 }
 0x2ef   :  { %v5656_v43 = vpack.c.bf16 %v5117_v10, %v1267_v11 }
 0x2f1   :  { %v5120_v12 = vpop.f32.mrb[16].mxu0  ;;  %5657 = vmatpush3.bf16.msra.mxu1 %v5656_v43 }
 0x2f2   :  { %v1277_v13 = vpop.f32.mrb[17].mxu0  ;;  %5658 = vmatprep.subr.bf16.mxu1 %v6087_v58 }
 0x2f3   :  { %v5659_v14 = vpack.c.bf16 %v5120_v12, %v1277_v13  ;;  %v21_v13 = vld [vmem:[%s7721_s2 + $0xa0] sm:$0xff] }
 0x2f5   :  { %v5123_v17 = vpop.f32.mrb[18].mxu0  ;;  %5660 = vmatpush3.bf16.msra.mxu1 %v5659_v14 }
 0x2f6   :  { %v1287_v18 = vpop.f32.mrb[19].mxu0  ;;  %5661 = vmatprep.subr.bf16.mxu1 %v6087_v58 }
 0x2f7   :  { %v5662_v53 = vpack.c.bf16 %v5123_v17, %v1287_v18  ;;  %v1459_v17 = vrot.slane %v21_v13, %v34_v30 }
 0x2f9   :  { %5663 = vmatpush3.bf16.msra.mxu1 %v5662_v53 }
 0x2fa   :  { %5664 = vmatprep.subr.bf16.mxu1 %v6087_v58 }
 0x2fc   :  { %5141 = vmatmul.mubr.msk.f32.vlgmr.msra.gmra.mrb[8].mxu1 %vm1310_vm10, %v1304_v22 }
 0x2fd   :  { %5143 = vmatprep.mubr.msk.f32.mxu1 %vm6088_vm9, %v6089_v62  ;;  %5666 = vmatpush3.bf16.msra.mxu1 %v5665_v56 }
 0x2fe   :  { %5667 = vmatprep.subr.bf16.mxu1 %v6087_v58 }
 0x300   :  { %5144 = vmatmul.mubr.msk.f32.gmra.mrb[10].mxu1 %vm1310_vm10, %v1305_v23 }
 0x301   :  { %5146 = vmatprep.mubr.msk.f32.mxu1 %vm6088_vm9, %v6089_v62  ;;  %5669 = vmatpush3.bf16.msra.mxu1 %v5668_v59 }
 0x302   :  { %5670 = vmatprep.subr.bf16.mxu1 %v6087_v58 }
 0x304   :  { %5147 = vmatmul.mubr.msk.f32.gmra.mrb[12].mxu1 %vm1310_vm10, %v1306_v24 }
 0x305   :  { %5157 = vmatprep.mubr.msk.f32.mxu1 %vm6088_vm9, %v6089_v62 }
 0x3cf   :  { %v1386_v6 = vpop.f32.mrb[8].mxu1 }
 0x3d0   :  { %v6614_v25 = vadd.f32 %v1386_v6, %v1307_v51  ;;  %v5142_v26 = vpop.f32.mrb[9].mxu1 }
 0x3d2   :  { %v1411_v27 = vsel %vm278_vm4, %v6614_v25, 0.0 }
 0x3d3   :  { %1412 = vadd.xlane.f32.xlu0 %v1411_v27  ;;  %v1391_v28 = vpop.f32.mrb[10].mxu1 }
 0x3d4   :  { %v6621_v32 = vadd.f32 %v1391_v28, %v1308_v4  ;;  %v5145_v33 = vpop.f32.mrb[11].mxu1 }
 0x3d6   :  { %v1414_v8 = vsel %vm278_vm4, %v6621_v32, 0.0 }
 0x3d7   :  { %1415 = vadd.xlane.f32.xlu1 %v1414_v8  ;;  %v1396_v16 = vpop.f32.mrb[12].mxu1 }
 0x3d8   :  { %v6628_v34 = vadd.f32 %v1396_v16, %v1309_v63  ;;  %v5148_v0 = vpop.f32.mrb[13].mxu1 }
 0x3da   :  { %v1418_v35 = vsel %vm1417_vm11, %v6628_v34, 0.0 }
 0x3db   :  { %1419 = vadd.xlane.f32.xlu0 %v1418_v35 }
 0x460   :  { %v1413_v36 = vpop.xlane.xlu0 %1412 }
 0x461   :  { %v1422_v38 = vmul.f32 0.03125, %v1413_v36 }
 0x463   :  { %v1425_v31 = vsub.f32 %v6614_v25, %v1422_v38 }
 0x464   :  { %v1416_v40 = vpop.xlane.xlu1 %1415 }
 0x465   :  { %v1423_v21 = vmul.f32 0.03125, %v1416_v40  ;;  %v1428_v41 = vmul.f32 %v1425_v31, %v1425_v31 }
 0x467   :  { %v1426_v15 = vsub.f32 %v6621_v32, %v1423_v21  ;;  %v1431_v44 = vsel %vm278_vm4, %v1428_v41, 0.0 }
 0x468   :  { %1432 = vadd.xlane.f32.xlu0 %v1431_v44  ;;  %v1420_v46 = vpop.xlane.xlu0 %1419 }
 0x469   :  { %v1424_v47 = vmul.f32 0.03125, %v1420_v46  ;;  %v1429_v50 = vmul.f32 %v1426_v15, %v1426_v15 }
 0x46b   :  { %v1427_v19 = vsub.f32 %v6628_v34, %v1424_v47  ;;  %v1434_v52 = vsel %vm278_vm4, %v1429_v50, 0.0 }
 0x46c   :  { %1435 = vadd.xlane.f32.xlu1 %v1434_v52 }
 0x46d   :  { %v1430_v39 = vmul.f32 %v1427_v19, %v1427_v19 }
 0x46f   :  { %v1437_v54 = vsel %vm1417_vm11, %v1430_v39, 0.0 }
 0x470   :  { %1438 = vadd.xlane.f32.xlu0 %v1437_v54 }
 0x4f5   :  { %v1433_v61 = vpop.xlane.xlu0 %1432 }
 0x4f6   :  { %v1440_v1 = vmul.f32 0.03125, %v1433_v61 }
 0x4f8   :  { %v1443_v2 = vadd.f32 1e-05, %v1440_v1 }
 0x4f9   :  { %v1436_v60 = vpop.xlane.xlu1 %1435 }
 0x4fa   :  { %5952 = vrsqrt.f32 %v1443_v2  ;;  %v1441_v3 = vmul.f32 0.03125, %v1436_v60 }
 0x4fc   :  { %v1444_v42 = vadd.f32 1e-05, %v1441_v3 }
 0x4fd   :  { %v1439_v20 = vpop.xlane.xlu0 %1438 }
 0x4fe   :  { %5954 = vrsqrt.f32 %v1444_v42  ;;  %v1442_v49 = vmul.f32 0.03125, %v1439_v20  ;;  %v1400_v42 = vld [vmem:[%s7722_s4] sm:$0xff] }
 0x500   :  { %v1445_v5 = vadd.f32 1e-05, %v1442_v49  ;;  %v4573_v49 = vld [vmem:[%s7722_s4 + $0x18] sm:$0xff] }
 0x502   :  { %5956 = vrsqrt.f32 %v1445_v5 }
 0x504   :  { %v5953_v45 = vpop.eup %5952 }
 0x505   :  { %v1449_v7 = vmul.f32 %v5953_v45, %v1425_v31 }
 0x507   :  { %5158 = vmatmul.mubr.msk.f32.vlgmr.msra.gmra.mrb[14].mxu1 %vm278_vm4, %v1449_v7  ;;  %v6777_v7 = vld [vmem:[%s7722_s4 + $0x8] sm:$0xff] }
 0x508   :  { %v5955_v10 = vpop.eup %5954  ;;  %5160 = vmatprep.mubr.msk.f32.mxu1 %vm6088_vm9, %v6089_v62 }
 0x509   :  { %v1450_v11 = vmul.f32 %v5955_v10, %v1426_v15 }
 0x50b   :  { %5161 = vmatmul.mubr.msk.f32.gmra.mrb[16].mxu1 %vm278_vm4, %v1450_v11 }
 0x50c   :  { %v5957_v43 = vpop.eup %5956  ;;  %5163 = vmatprep.mubr.msk.f32.mxu1 %vm6088_vm9, %v6089_v62 }
 0x50d   :  { %v1451_v12 = vmul.f32 %v5957_v43, %v1427_v19  ;;  %v6784_v43 = vld [vmem:[%s7722_s4 + $0x20] sm:$0xff] }
 0x50f   :  { %5164 = vmatmul.mubr.msk.f32.gmra.mrb[18].mxu1 %vm278_vm4, %v1451_v12 }
 0x510   :  { %5172 = vmatprep.mubr.msk.f32.mxu1 %vm6088_vm9, %v6089_v62 }
 0x5da   :  { %v1535_v14 = vpop.f32.mrb[14].mxu1 }
 0x5db   :  { %v5159_v18 = vpop.f32.mrb[15].mxu1  ;;  %v1536_v22 = vadd.f32 %v1535_v14, %v1459_v17 }
 0x5de   :  { %v1540_v53 = vpop.f32.mrb[16].mxu1 }
 0x5df   :  { %v1541_v23 = vadd.f32 %v1540_v53, %v1459_v17  ;;  %v5162_v24 = vpop.f32.mrb[17].mxu1 }
 0x5e1   :  { %v6666_v51 = vpack.i.bf16 %v1541_v23, %v1536_v22 }
 0x5e2   :  { %v1545_v6 = vpop.f32.mrb[18].mxu1 }
 0x5e3   :  { %v6668_v26 = vadd.f32 %v1545_v6, %v1459_v17  ;;  %5873 = vrot.lane.b32.xlu1 %v6666_v51, %s6086_s28  ;;  %v5165_v4 = vpop.f32.mrb[19].mxu1  ;;  %v1402_v17 = vld [vmem:[%s7722_s4 + $0x10] sm:$0x3] }
 0x5e5   :  { %1556 = vrot.lane.b32.xlu0 %v6668_v26, %s6086_s28 }
 0x5e7   :  { %5878 = vrot.lane.b32.xlu1 %v6666_v51, %s6090_s10 }
 0x5e9   :  { %5883 = vrot.lane.b32.xlu0 %v6666_v51, %s6091_s11 }
 0x5eb   :  { %1802 = vrot.lane.b32.xlu1 %v6668_v26, %s6090_s10 }
 0x5ed   :  { %1794 = vrot.lane.b32.xlu0 %v1541_v23, %s6092_s12 }
 0x5ef   :  { %1792 = vrot.lane.b32.xlu1 %v1536_v22, %s6092_s12 }
 0x5f1   :  { %2044 = vrot.lane.b32.xlu0 %v6668_v26, %s6091_s11 }
 0x5f3   :  { %1796 = vrot.lane.b32.xlu1 %v6668_v26, %s6092_s12 }
 0x5f5   :  { %2034 = vrot.lane.b32.xlu0 %v1536_v22, %s6093_s13 }
 0x5f7   :  { %5888 = vrot.lane.b32.xlu1 %v6666_v51, %s6094_s0 }
 0x5f9   :  { %2038 = vrot.lane.b32.xlu0 %v6668_v26, %s6093_s13 }
 0x5fb   :  { %2036 = vrot.lane.b32.xlu1 %v1541_v23, %s6093_s13 }
 0x5fd   :  { %2276 = vrot.lane.b32.xlu0 %v1536_v22, %s6095_s14 }
 0x5ff   :  { %2286 = vrot.lane.b32.xlu1 %v6668_v26, %s6094_s0 }
 0x601   :  { %2280 = vrot.lane.b32.xlu0 %v6668_v26, %s6095_s14 }
 0x603   :  { %2278 = vrot.lane.b32.xlu1 %v1541_v23, %s6095_s14 }
 0x605   :  { %1696 = vrot.lane.b32.xlu0 %v6668_v26, %s6096_s15 }
 0x607   :  { %5893 = vrot.lane.b32.xlu1 %v6666_v51, %s6096_s15 }
 0x655   :  { %v5874_v30 = vpop.permute.xlu1 %5873 }
 0x656   :  { %v5876_v27 = vunpack.i.h.bf16 %v5874_v30  ;;  %v5875_v28 = vunpack.i.l.bf16 %v5874_v30 }
 0x657   :  { %v1557_v33 = vpop.permute.xlu0 %1556 }
 0x658   :  { %v5671_v8 = vpack.c.bf16 %v5876_v27, %v5875_v28 }
 0x659   :  { %v5879_v16 = vpop.permute.xlu1 %5878 }
 0x65a   :  { %5673 = vmatpush3.bf16.xpose.msk.msra.mxu1 %vm6704_vm13, %v5671_v8  ;;  %v5881_v38 = vunpack.i.h.bf16 %v5879_v16  ;;  %v5880_v31 = vunpack.i.l.bf16 %v5879_v16 }
 0x65b   :  { %v5884_v0 = vpop.permute.xlu0 %5883  ;;  %5170 = vmatprep.subr.mxu1 %v6089_v62 }
 0x65c   :  { %v5678_v41 = vpack.c.bf16 %v5881_v38, %v5880_v31  ;;  %v5886_v47 = vunpack.i.h.bf16 %v5884_v0  ;;  %v5885_v50 = vunpack.i.l.bf16 %v5884_v0 }
 0x65d   :  { %v1803_v35 = vpop.permute.xlu1 %1802 }
 0x65e   :  { %v5685_v39 = vpack.c.bf16 %v5886_v47, %v5885_v50 }
 0x65f   :  { %v1795_v36 = vpop.permute.xlu0 %1794 }
 0x661   :  { %v1793_v40 = vpop.permute.xlu1 %1792 }
 0x662   :  { %5171 = vmatpush3.xpose.msk.msra.mxu1 %vm1558_vm12, %v1557_v33 }
 0x663   :  { %v2045_v21 = vpop.permute.xlu0 %2044  ;;  %5677 = vmatprep.subr.bf16.mxu1 %v6087_v58 }
 0x665   :  { %v1797_v15 = vpop.permute.xlu1 %1796  ;;  %5173 = vmatmul.mubr.msk.f32.vlgmr.msra.gmra.mrb[20].mxu1 %vm1558_vm12, %v1536_v22  ;;  %v4575_v22 = vld [vmem:[%s7722_s4 + $0x28] sm:$0x3] }
 0x666   :  { %5680 = vmatpush3.bf16.xpose.msk.msra.mxu1 %vm6704_vm13, %v5678_v41  ;;  %5175 = vmatprep.mubr.msk.f32.mxu1 %vm6088_vm9, %v6089_v62 }
 0x667   :  { %5200 = vmatprep.subr.mxu1 %v6089_v62  ;;  %v2035_v44 = vpop.permute.xlu0 %2034 }
 0x669   :  { %v5889_v46 = vpop.permute.xlu1 %5888  ;;  %5176 = vmatmul.mubr.msk.f32.gmra.mrb[22].mxu1 %vm1558_vm12, %v1541_v23 }
 0x66a   :  { %5178 = vmatprep.mubr.msk.f32.mxu1 %vm6088_vm9, %v6089_v62  ;;  %v5891_v56 = vunpack.i.h.bf16 %v5889_v46  ;;  %v5890_v57 = vunpack.i.l.bf16 %v5889_v46 }
 0x66b   :  { %v2039_v52 = vpop.permute.xlu0 %2038 }
 0x66c   :  { %v5692_v2 = vpack.c.bf16 %v5891_v56, %v5890_v57 }
 0x66d   :  { %v2037_v19 = vpop.permute.xlu1 %2036  ;;  %5179 = vmatmul.mubr.msk.f32.gmra.mrb[24].mxu1 %vm1558_vm12, %v6668_v26 }
 0x66e   :  { %5201 = vmatpush3.xpose.msk.msra.mxu1 %vm1558_vm12, %v1803_v35  ;;  %5202 = vmatprep.mubr.msk.f32.mxu1 %vm6088_vm9, %v6089_v62 }
 0x66f   :  { %5684 = vmatprep.subr.bf16.mxu1 %v6087_v58  ;;  %v2277_v55 = vpop.permute.xlu0 %2276 }
 0x671   :  { %v2287_v54 = vpop.permute.xlu1 %2286  ;;  %5203 = vmatmul.mubr.msk.f32.vlgmr.msra.gmra.mrb[26].mxu1 %vm1558_vm12, %v1793_v40 }
 0x672   :  { %5687 = vmatpush3.bf16.xpose.msk.msra.mxu1 %vm6704_vm13, %v5685_v39  ;;  %5205 = vmatprep.mubr.msk.f32.mxu1 %vm6088_vm9, %v6089_v62 }
 0x673   :  { %5230 = vmatprep.subr.mxu1 %v6089_v62  ;;  %v2281_v1 = vpop.permute.xlu0 %2280 }
 0x675   :  { %v2279_v48 = vpop.permute.xlu1 %2278  ;;  %5206 = vmatmul.mubr.msk.f32.gmra.mrb[28].mxu1 %vm1558_vm12, %v1795_v36 }
 0x676   :  { %5208 = vmatprep.mubr.msk.f32.mxu1 %vm6088_vm9, %v6089_v62 }
 0x677   :  { %v1697_v3 = vpop.permute.xlu0 %1696 }
 0x679   :  { %v5894_v37 = vpop.permute.xlu1 %5893  ;;  %5209 = vmatmul.mubr.msk.f32.gmra.mrb[30].mxu1 %vm1558_vm12, %v1797_v15 }
 0x67a   :  { %v5896_v59 = vunpack.i.h.bf16 %v5894_v37  ;;  %v5895_v61 = vunpack.i.l.bf16 %v5894_v37  ;;  %5231 = vmatpush3.xpose.msk.msra.mxu1 %vm1558_vm12, %v2045_v21  ;;  %5232 = vmatprep.mubr.msk.f32.mxu1 %vm6088_vm9, %v6089_v62 }
 0x67b   :  { %5691 = vmatprep.subr.bf16.mxu1 %v6087_v58 }
 0x67c   :  { %v5675_v60 = vpack.c.bf16 %v5896_v59, %v5895_v61 }
 0x67d   :  { %5233 = vmatmul.mubr.msk.f32.vlgmr.msra.gmra.mrb[32].mxu1 %vm1558_vm12, %v2035_v44 }
 0x67e   :  { %5676 = vmatpush3.bf16.msra.mxu0 %v5675_v60  ;;  %5694 = vmatpush3.bf16.xpose.msk.msra.mxu1 %vm6704_vm13, %v5692_v2 }
 0x67f   :  { %5235 = vmatprep.mubr.msk.f32.mxu1 %vm6088_vm9, %v6089_v62  ;;  %5185 = vmatprep.subr.mxu0 %v6089_v62 }
 0x680   :  { %5260 = vmatprep.subr.mxu1 %v6089_v62 }
 0x681   :  { %5236 = vmatmul.mubr.msk.f32.gmra.mrb[34].mxu1 %vm1558_vm12, %v2037_v19 }
 0x682   :  { %5186 = vmatpush3.msk.msra.mxu0 %vm1709_vm14, %v1697_v3  ;;  %5238 = vmatprep.mubr.msk.f32.mxu1 %vm6088_vm9, %v6089_v62 }
 0x683   :  { %5681 = vmatprep.subr.bf16.mxu0 %v6087_v58 }
 0x685   :  { %5239 = vmatmul.mubr.msk.f32.gmra.mrb[36].mxu1 %vm1558_vm12, %v2039_v52 }
 0x686   :  { %5261 = vmatpush3.xpose.msk.msra.mxu1 %vm1558_vm12, %v2287_v54  ;;  %5262 = vmatprep.mubr.msk.f32.mxu1 %vm6088_vm9, %v6089_v62 }
 0x687   :  { %5698 = vmatprep.subr.bf16.mxu1 %v6087_v58 }
 0x689   :  { %5263 = vmatmul.mubr.msk.f32.vlgmr.msra.gmra.mrb[38].mxu1 %vm1558_vm12, %v2277_v55 }
 0x68a   :  { %5265 = vmatprep.mubr.msk.f32.mxu1 %vm6088_vm9, %v6089_v62 }
 0x68d   :  { %5266 = vmatmul.mubr.msk.f32.gmra.mrb[40].mxu1 %vm1558_vm12, %v2279_v48 }
 0x68e   :  { %5268 = vmatprep.mubr.msk.f32.mxu1 %vm6088_vm9, %v6089_v62 }
 0x691   :  { %5269 = vmatmul.mubr.msk.f32.gmra.mrb[42].mxu1 %vm1558_vm12, %v2281_v1 }
 0x692   :  { %5294 = vmatprep.mubr.msk.f32.mxu1 %vm6088_vm9, %v6089_v62 }
 0x738   :  { %v1637_v20 = vpop.f32.mrb[20].mxu1 }
 0x739   :  { %v1651_v5 = vmul.f32 %v1637_v20, %v1400_v42  ;;  %v5174_v45 = vpop.f32.mrb[21].mxu1 }
 0x73b   :  { %v6779_v10 = vadd.f32 %v4573_v49, %v1651_v5 }
 0x73c   :  { %v1642_v11 = vpop.f32.mrb[22].mxu1 }
 0x73d   :  { %v1652_v12 = vmul.f32 %v1642_v11, %v6777_v7  ;;  %v5177_v13 = vpop.f32.mrb[23].mxu1  ;;  %v1658_v14 = vsel %vm1657_vm15, %v6779_v10, -inf }
 0x73e   :  { %1659 = vmax.xlane.f32.xlu1 %v1658_v14 }
 0x73f   :  { %v6793_v18 = vadd.f32 %v6784_v43, %v1652_v12 }
 0x740   :  { %v1647_v53 = vpop.f32.mrb[24].mxu1 }
 0x741   :  { %v1653_v23 = vmul.f32 %v1647_v53, %v1402_v17  ;;  %v5180_v24 = vpop.f32.mrb[25].mxu1  ;;  %v1661_v6 = vsel %vm1657_vm15, %v6793_v18, -inf }
 0x742   :  { %1662 = vmax.xlane.f32.xlu0 %v1661_v6 }
 0x743   :  { %v6800_v4 = vadd.f32 %v4575_v22, %v1653_v23 }
 0x744   :  { %v1882_v30 = vpop.f32.mrb[26].mxu1 }
 0x745   :  { %v1896_v27 = vmul.f32 %v1882_v30, %v1400_v42  ;;  %v5204_v28 = vpop.f32.mrb[27].mxu1  ;;  %v1665_v33 = vsel %vm1664_vm0, %v6800_v4, -inf }
 0x746   :  { %1666 = vmax.xlane.f32.xlu0 %v1665_v33 }
 0x747   :  { %v6804_v8 = vadd.f32 %v4573_v49, %v1896_v27 }
 0x748   :  { %v1887_v16 = vpop.f32.mrb[28].mxu1 }
 0x749   :  { %v1897_v0 = vmul.f32 %v1887_v16, %v6777_v7  ;;  %v5207_v35 = vpop.f32.mrb[29].mxu1  ;;  %v1902_v36 = vsel %vm1657_vm15, %v6804_v8, -inf }
 0x74a   :  { %1903 = vmax.xlane.f32.xlu1 %v1902_v36 }
 0x74b   :  { %v6810_v38 = vadd.f32 %v6784_v43, %v1897_v0 }
 0x74c   :  { %v1892_v31 = vpop.f32.mrb[30].mxu1 }
 0x74d   :  { %v1898_v40 = vmul.f32 %v1892_v31, %v1402_v17  ;;  %v5210_v21 = vpop.f32.mrb[31].mxu1  ;;  %v1905_v41 = vsel %vm1657_vm15, %v6810_v38, -inf }
 0x74e   :  { %1906 = vmax.xlane.f32.xlu0 %v1905_v41 }
 0x74f   :  { %v6814_v15 = vadd.f32 %v4575_v22, %v1898_v40 }
 0x750   :  { %v2124_v44 = vpop.f32.mrb[32].mxu1 }
 0x751   :  { %v2138_v46 = vmul.f32 %v2124_v44, %v1400_v42  ;;  %v5234_v47 = vpop.f32.mrb[33].mxu1  ;;  %v1908_v50 = vsel %vm1664_vm0, %v6814_v15, -inf }
 0x752   :  { %1909 = vmax.xlane.f32.xlu1 %v1908_v50 }
 0x753   :  { %v6818_v19 = vadd.f32 %v4573_v49, %v2138_v46 }
 0x754   :  { %v2129_v52 = vpop.f32.mrb[34].mxu1 }
 0x755   :  { %v2139_v39 = vmul.f32 %v2129_v52, %v6777_v7  ;;  %v5237_v54 = vpop.f32.mrb[35].mxu1  ;;  %v2144_v55 = vsel %vm1657_vm15, %v6818_v19, -inf }
 0x756   :  { %2145 = vmax.xlane.f32.xlu0 %v2144_v55 }
 0x757   :  { %v2142_v48 = vadd.f32 %v6784_v43, %v2139_v39 }
 0x758   :  { %v2134_v56 = vpop.f32.mrb[36].mxu1 }
 0x759   :  { %v5240_v57 = vpop.f32.mrb[37].mxu1  ;;  %v2147_v37 = vsel %vm1657_vm15, %v2142_v48, -inf }
 0x75a   :  { %2148 = vmax.xlane.f32.xlu1 %v2147_v37 }
 0x75c   :  { %v2366_v59 = vpop.f32.mrb[38].mxu1 }
 0x75d   :  { %v2380_v61 = vmul.f32 %v2366_v59, %v1400_v42  ;;  %v5264_v1 = vpop.f32.mrb[39].mxu1  ;;  %v2140_v42 = vmul.f32 %v2134_v56, %v1402_v17 }
 0x75f   :  { %v2383_v2 = vadd.f32 %v4573_v49, %v2380_v61  ;;  %v6835_v14 = vadd.f32 %v4575_v22, %v2140_v42 }
 0x760   :  { %v2371_v60 = vpop.f32.mrb[40].mxu1 }
 0x761   :  { %v5267_v3 = vpop.f32.mrb[41].mxu1  ;;  %v2386_v20 = vsel %vm1657_vm15, %v2383_v2, -inf  ;;  %v2381_v49 = vmul.f32 %v2371_v60, %v6777_v7  ;;  %v2150_v53 = vsel %vm1664_vm0, %v6835_v14, -inf }
 0x762   :  { %2387 = vmax.xlane.f32.xlu1 %v2386_v20 }
 0x763   :  { %v6840_v23 = vadd.f32 %v6784_v43, %v2381_v49 }
 0x764   :  { %v2376_v5 = vpop.f32.mrb[42].mxu1 }
 0x765   :  { %v2382_v45 = vmul.f32 %v2376_v5, %v1402_v17  ;;  %v5270_v11 = vpop.f32.mrb[43].mxu1  ;;  %v2389_v24 = vsel %vm1657_vm15, %v6840_v23, -inf }
 0x767   :  { %v6826_v12 = vadd.f32 %v4575_v22, %v2382_v45 }
 0x769   :  { %v2392_v13 = vsel %vm1664_vm0, %v6826_v12, -inf }
 0x76a   :  { %2393 = vmax.xlane.f32.xlu1 %v2392_v13 }
 0x76c   :  { %5898 = vrot.lane.b32.xlu0 %v6666_v51, %s6097_s27 }
 0x77b   :  { %1939 = vrot.lane.b32.xlu1 %v6668_v26, %s6097_s27 }
 0x78b   :  { %2151 = vmax.xlane.f32.xlu0 %v2150_v53 }
 0x78f   :  { %2390 = vmax.xlane.f32.xlu0 %v2389_v24 }
 0x7cb   :  { %v1660_v6 = vpop.xlane.xlu1 %1659 }
 0x7cc   :  { %v1668_v30 = vsub.f32 %v6779_v10, %v1660_v6 }
 0x7ce   :  { %v1671_v27 = vmul.f32 1.442695, %v1668_v30 }
 0x7cf   :  { %v1663_v17 = vpop.xlane.xlu0 %1662 }
 0x7d0   :  { %5958 = vpow2.f32 %v1671_v27  ;;  %v1669_v7 = vsub.f32 %v6793_v18, %v1663_v17 }
 0x7d2   :  { %v1673_v22 = vmul.f32 1.442695, %v1669_v7 }
 0x7d3   :  { %v1667_v52 = vpop.xlane.xlu0 %1666 }
 0x7d4   :  { %5960 = vpow2.f32 %v1673_v22  ;;  %v1670_v39 = vsub.f32 %v6800_v4, %v1667_v52 }
 0x7d7   :  { %v1904_v28 = vpop.xlane.xlu1 %1903 }
 0x7d8   :  { %v1911_v33 = vsub.f32 %v6804_v8, %v1904_v28 }
 0x7da   :  { %v6847_v43 = vpop.eup %5958  ;;  %v1914_v16 = vmul.f32 1.442695, %v1911_v33 }
 0x7db   :  { %v1677_v0 = vsel %vm1657_vm15, %v6847_v43, 0.0  ;;  %v1907_v54 = vpop.xlane.xlu0 %1906 }
 0x7dc   :  { %5962 = vpow2.f32 %v1914_v16  ;;  %1678 = vadd.xlane.f32.xlu0 %v1677_v0  ;;  %v1912_v56 = vsub.f32 %v6810_v38, %v1907_v54 }
 0x7de   :  { %v6851_v35 = vpop.eup %5960  ;;  %v1916_v37 = vmul.f32 1.442695, %v1912_v56 }
 0x7df   :  { %v1680_v10 = vsel %vm1657_vm15, %v6851_v35, 0.0  ;;  %v1910_v18 = vpop.xlane.xlu1 %1909 }
 0x7e0   :  { %1681 = vadd.xlane.f32.xlu1 %v1680_v10  ;;  %v1913_v59 = vsub.f32 %v6814_v15, %v1910_v18 }
 0x7e2   :  { %v1918_v1 = vmul.f32 1.442695, %v1913_v59 }
 0x7e3   :  { %v2146_v61 = vpop.xlane.xlu0 %2145 }
 0x7e6   :  { %v6855_v36 = vpop.eup %5962 }
 0x7e7   :  { %v2149_v31 = vpop.xlane.xlu1 %2148  ;;  %v1920_v8 = vsel %vm1657_vm15, %v6855_v36, 0.0  ;;  %v5899_v15 = vpop.permute.xlu0 %5898 }
 0x7e8   :  { %v2154_v40 = vsub.f32 %v2142_v48, %v2149_v31  ;;  %1921 = vadd.xlane.f32.xlu1 %v1920_v8  ;;  %v1675_v48 = vmul.f32 1.442695, %v1670_v39  ;;  %v5901_v10 = vunpack.i.h.bf16 %v5899_v15  ;;  %v5900_v18 = vunpack.i.l.bf16 %v5899_v15 }
 0x7ea   :  { %v2158_v21 = vmul.f32 1.442695, %v2154_v40  ;;  %v5682_v40 = vpack.c.bf16 %v5901_v10, %v5900_v18  ;;  %v2569_v18 = vld [vmem:[%s7718_s1 + $0xf8] sm:$0xff] }
 0x7ec   :  { %5964 = vpow2.f32 %v2158_v21 }
 0x7ef   :  { %v2388_v41 = vpop.xlane.xlu1 %2387 }
 0x7f0   :  { %v2395_v44 = vsub.f32 %v2383_v2, %v2388_v41  ;;  %v2153_v2 = vsub.f32 %v6818_v19, %v2146_v61 }
 0x7f2   :  { %v2398_v46 = vmul.f32 1.442695, %v2395_v44  ;;  %5903 = vrot.lane.b32.xlu0 %v6666_v51, %s6098_s29  ;;  %v2156_v4 = vmul.f32 1.442695, %v2153_v2 }
 0x7f4   :  { %5966 = vpow2.f32 %v2398_v46 }
 0x7f5   :  { %5968 = vpow2.f32 %v1675_v48 }
 0x7f6   :  { %v6861_v47 = vpop.eup %5964  ;;  %5970 = vpow2.f32 %v1916_v37 }
 0x7f7   :  { %v2165_v50 = vsel %vm1657_vm15, %v6861_v47, 0.0  ;;  %5972 = vpow2.f32 %v1918_v1  ;;  %v2394_v49 = vpop.xlane.xlu1 %2393 }
 0x7f8   :  { %2166 = vadd.xlane.f32.xlu1 %v2165_v50  ;;  %5974 = vpow2.f32 %v2156_v4  ;;  %v2397_v30 = vsub.f32 %v6826_v12, %v2394_v49 }
 0x7fa   :  { %v2402_v17 = vmul.f32 1.442695, %v2397_v30 }
 0x7fb   :  { %v1940_v33 = vpop.permute.xlu1 %1939 }
 0x7fe   :  { %v6866_v55 = vpop.eup %5966 }
 0x7ff   :  { %v2404_v57 = vsel %vm1657_vm15, %v6866_v55, 0.0  ;;  %v6873_v60 = vpop.eup %5968 }
 0x800   :  { %2405 = vadd.xlane.f32.xlu1 %v2404_v57  ;;  %v1683_v38 = vsel %vm1664_vm0, %v6873_v60, 0.0  ;;  %v6877_v3 = vpop.eup %5970 }
 0x801   :  { %v1923_v20 = vsel %vm1657_vm15, %v6877_v3, 0.0  ;;  %v6883_v5 = vpop.eup %5972 }
 0x802   :  { %v1926_v45 = vsel %vm1664_vm0, %v6883_v5, 0.0  ;;  %v6887_v11 = vpop.eup %5974 }
 0x803   :  { %v2162_v24 = vsel %vm1657_vm15, %v6887_v11, 0.0 }
 0x811   :  { %1684 = vadd.xlane.f32.xlu0 %v1683_v38  ;;  %2181 = vrot.lane.b32.xlu1 %v6668_v26, %s6098_s29 }
 0x815   :  { %1924 = vadd.xlane.f32.xlu0 %v1923_v20 }
 0x818   :  { %v2152_v19 = vpop.xlane.xlu0 %2151 }
 0x819   :  { %v2155_v13 = vsub.f32 %v6835_v14, %v2152_v19  ;;  %1927 = vadd.xlane.f32.xlu0 %v1926_v45 }
 0x81b   :  { %v2160_v42 = vmul.f32 1.442695, %v2155_v13 }
 0x81c   :  { %v2391_v53 = vpop.xlane.xlu0 %2390 }
 0x81d   :  { %5976 = vpow2.f32 %v2160_v42  ;;  %v2396_v6 = vsub.f32 %v6840_v23, %v2391_v53  ;;  %2163 = vadd.xlane.f32.xlu0 %v2162_v24 }
 0x81f   :  { %v2400_v27 = vmul.f32 1.442695, %v2396_v6 }
 0x821   :  { %5978 = vpow2.f32 %v2400_v27 }
 0x822   :  { %5980 = vpow2.f32 %v2402_v17 }
 0x827   :  { %v6894_v7 = vpop.eup %5976 }
 0x828   :  { %v2168_v14 = vsel %vm1664_vm0, %v6894_v7, 0.0 }
 0x829   :  { %2169 = vadd.xlane.f32.xlu0 %v2168_v14 }
 0x82b   :  { %v6898_v22 = vpop.eup %5978 }
 0x82c   :  { %v2407_v28 = vsel %vm1657_vm15, %v6898_v22, 0.0  ;;  %v6902_v23 = vpop.eup %5980 }
 0x82d   :  { %2408 = vadd.xlane.f32.xlu0 %v2407_v28  ;;  %v2410_v12 = vsel %vm1664_vm0, %v6902_v23, 0.0 }
 0x835   :  { %2411 = vadd.xlane.f32.xlu1 %v2410_v12 }
 0x843   :  { %5908 = vrot.lane.b32.xlu0 %v6666_v51, %s6099_s30 }
 0x847   :  { %2423 = vrot.lane.b32.xlu0 %v6668_v26, %s6099_s30 }
 0x869   :  { %v1679_v16 = vpop.xlane.xlu0 %1678 }
 0x86a   :  { %5982 = vrcp.f32 %v1679_v16 }
 0x86d   :  { %v1682_v0 = vpop.xlane.xlu1 %1681  ;;  %v5904_v26 = vpop.permute.xlu0 %5903 }
 0x86e   :  { %5984 = vrcp.f32 %v1682_v0  ;;  %v5906_v48 = vunpack.i.h.bf16 %v5904_v26  ;;  %v5905_v56 = vunpack.i.l.bf16 %v5904_v26 }
 0x870   :  { %v5689_v61 = vpack.c.bf16 %v5906_v48, %v5905_v56 }
 0x874   :  { %v5983_v31 = vpop.eup %5982 }
 0x875   :  { %v1687_v8 = vmul.f32 %v5983_v31, %v6847_v43  ;;  %v1922_v43 = vpop.xlane.xlu1 %1921 }
 0x877   :  { %5188 = vmatmul.mubr.msk.f32.vlgmr.msra.gmra.mrb[20].mxu0 %vm1657_vm15, %v1687_v8 }
 0x878   :  { %v5985_v21 = vpop.eup %5984  ;;  %5683 = vmatpush3.bf16.msra.mxu0 %v5682_v40  ;;  %5190 = vmatprep.mubr.msk.f32.mxu0 %vm6088_vm9, %v6089_v62 }
 0x879   :  { %5215 = vmatprep.subr.mxu0 %v6089_v62  ;;  %v1689_v51 = vmul.f32 %v5985_v21, %v6851_v35 }
 0x87b   :  { %5191 = vmatmul.mubr.msk.f32.gmra.mrb[22].mxu0 %vm1657_vm15, %v1689_v51 }
 0x87c   :  { %5216 = vmatpush3.msk.msra.mxu0 %vm1709_vm14, %v1940_v33  ;;  %5193 = vmatprep.mubr.msk.f32.mxu0 %vm6088_vm9, %v6089_v62 }
 0x87d   :  { %5688 = vmatprep.subr.bf16.mxu0 %v6087_v58 }
 0x885   :  { %v2167_v35 = vpop.xlane.xlu1 %2166 }
 0x88d   :  { %v2406_v37 = vpop.xlane.xlu1 %2405 }
 0x891   :  { %v2182_v4 = vpop.permute.xlu1 %2181 }
 0x89e   :  { %v1685_v41 = vpop.xlane.xlu0 %1684 }
 0x89f   :  { %5986 = vrcp.f32 %v1685_v41  ;;  %v2571_v41 = vld [vmem:[%s7718_s1 + $0x108] sm:$0xff] }
 0x8a0   :  { %5988 = vrcp.f32 %v1922_v43  ;;  %v2570_v43 = vld [vmem:[%s7718_s1 + $0x100] sm:$0xff] }
 0x8a2   :  { %v1925_v44 = vpop.xlane.xlu0 %1924 }
 0x8a3   :  { %5990 = vrcp.f32 %v1925_v44  ;;  %v5702_v44 = vpack.c.bf16 %v2571_v41, %v2570_v43 }
 0x8a6   :  { %v1928_v46 = vpop.xlane.xlu0 %1927 }
 0x8a7   :  { %5992 = vrcp.f32 %v1928_v46 }
 0x8a9   :  { %v5987_v50 = vpop.eup %5986 }
 0x8aa   :  { %v2164_v52 = vpop.xlane.xlu0 %2163  ;;  %v1691_v39 = vmul.f32 %v5987_v50, %v6873_v60  ;;  %v5989_v54 = vpop.eup %5988 }
 0x8ab   :  { %5994 = vrcp.f32 %v2164_v52  ;;  %v1930_v57 = vmul.f32 %v5989_v54, %v6855_v36 }
 0x8ac   :  { %5194 = vmatmul.mubr.msk.f32.gmra.mrb[24].mxu0 %vm1657_vm15, %v1691_v39  ;;  %5996 = vrcp.f32 %v2167_v35 }
 0x8ad   :  { %5217 = vmatprep.mubr.msk.f32.mxu0 %vm6088_vm9, %v6089_v62  ;;  %v5991_v59 = vpop.eup %5990 }
 0x8ae   :  { %v1932_v1 = vmul.f32 %v5991_v59, %v6877_v3 }
 0x8b0   :  { %5218 = vmatmul.mubr.msk.f32.vlgmr.msra.gmra.mrb[26].mxu0 %vm1657_vm15, %v1930_v57 }
 0x8b1   :  { %5690 = vmatpush3.bf16.msra.mxu0 %v5689_v61  ;;  %5220 = vmatprep.mubr.msk.f32.mxu0 %vm6088_vm9, %v6089_v62  ;;  %v5993_v2 = vpop.eup %5992 }
 0x8b2   :  { %5245 = vmatprep.subr.mxu0 %v6089_v62  ;;  %v1934_v60 = vmul.f32 %v5993_v2, %v6883_v5 }
 0x8b4   :  { %5221 = vmatmul.mubr.msk.f32.gmra.mrb[28].mxu0 %vm1657_vm15, %v1932_v1 }
 0x8b5   :  { %5246 = vmatpush3.msk.msra.mxu0 %vm1709_vm14, %v2182_v4  ;;  %5223 = vmatprep.mubr.msk.f32.mxu0 %vm6088_vm9, %v6089_v62  ;;  %v5995_v38 = vpop.eup %5994  ;;  %v4576_v4 = vld [vmem:[%s7722_s4 + $0x30] sm:$0xff] }
 0x8b6   :  { %v2170_v36 = vpop.xlane.xlu0 %2169  ;;  %5695 = vmatprep.subr.bf16.mxu0 %v6087_v58  ;;  %v2172_v3 = vmul.f32 %v5995_v38, %v6887_v11  ;;  %v5997_v20 = vpop.eup %5996 }
 0x8b7   :  { %5998 = vrcp.f32 %v2170_v36  ;;  %v2174_v19 = vmul.f32 %v5997_v20, %v6861_v47 }
 0x8b8   :  { %5224 = vmatmul.mubr.msk.f32.gmra.mrb[30].mxu0 %vm1657_vm15, %v1934_v60  ;;  %6000 = vrcp.f32 %v2406_v37 }
 0x8b9   :  { %5247 = vmatprep.mubr.msk.f32.mxu0 %vm6088_vm9, %v6089_v62 }
 0x8ba   :  { %v2409_v15 = vpop.xlane.xlu0 %2408 }
 0x8bb   :  { %6002 = vrcp.f32 %v2409_v15 }
 0x8bc   :  { %5248 = vmatmul.mubr.msk.f32.vlgmr.msra.gmra.mrb[32].mxu0 %vm1657_vm15, %v2172_v3 }
 0x8bd   :  { %5250 = vmatprep.mubr.msk.f32.mxu0 %vm6088_vm9, %v6089_v62 }
 0x8be   :  { %v5909_v5 = vpop.permute.xlu0 %5908 }
 0x8bf   :  { %v5911_v45 = vunpack.i.h.bf16 %v5909_v5  ;;  %v5910_v13 = vunpack.i.l.bf16 %v5909_v5  ;;  %v4577_v5 = vld [vmem:[%s7722_s4 + $0x38] sm:$0xff] }
 0x8c0   :  { %5251 = vmatmul.mubr.msk.f32.gmra.mrb[34].mxu0 %vm1657_vm15, %v2174_v19 }
 0x8c1   :  { %v5999_v42 = vpop.eup %5998  ;;  %v5696_v49 = vpack.c.bf16 %v5911_v45, %v5910_v13  ;;  %5253 = vmatprep.mubr.msk.f32.mxu0 %vm6088_vm9, %v6089_v62 }
 0x8c2   :  { %v2412_v11 = vpop.xlane.xlu1 %2411  ;;  %v2176_v53 = vmul.f32 %v5999_v42, %v6894_v7  ;;  %v6001_v24 = vpop.eup %6000 }
 0x8c3   :  { %6004 = vrcp.f32 %v2412_v11  ;;  %5697 = vmatpush3.bf16.msra.mxu0 %v5696_v49  ;;  %v2414_v47 = vmul.f32 %v6001_v24, %v6866_v55  ;;  %v2424_v6 = vpop.permute.xlu0 %2423  ;;  %v4578_v24 = vld [vmem:[%s7722_s4 + $0x40] sm:$0x3] }
 0x8c4   :  { %5254 = vmatmul.mubr.msk.f32.gmra.mrb[36].mxu0 %vm1657_vm15, %v2176_v53  ;;  %5275 = vmatprep.subr.mxu0 %v6089_v62 }
 0x8c5   :  { %5277 = vmatprep.mubr.msk.f32.mxu0 %vm6088_vm9, %v6089_v62  ;;  %v6003_v30 = vpop.eup %6002 }
 0x8c6   :  { %v2416_v27 = vmul.f32 %v6003_v30, %v6898_v22 }
 0x8c7   :  { %5276 = vmatpush3.msk.msra.mxu0 %vm1709_vm14, %v2424_v6 }
 0x8c8   :  { %5278 = vmatmul.mubr.msk.f32.vlgmr.msra.gmra.mrb[38].mxu0 %vm1657_vm15, %v2414_v47  ;;  %5704 = vmatprep.subr.bf16.mxu0 %v6087_v58 }
 0x8c9   :  { %5280 = vmatprep.mubr.msk.f32.mxu0 %vm6088_vm9, %v6089_v62 }
 0x8cc   :  { %5281 = vmatmul.mubr.msk.f32.gmra.mrb[40].mxu0 %vm1657_vm15, %v2416_v27 }
 0x8cd   :  { %v6005_v17 = vpop.eup %6004  ;;  %5283 = vmatprep.mubr.msk.f32.mxu0 %vm6088_vm9, %v6089_v62 }
 0x8ce   :  { %v2418_v55 = vmul.f32 %v6005_v17, %v6902_v23  ;;  %v2568_v23 = vld [vmem:[%s7718_s1 + $0xf0] sm:$0xff]  ;;  %v2574_v17 = vsub.s32 2, %v6245_v29 }
 0x8cf   :  { %v5699_v8 = vpack.c.bf16 %v2569_v18, %v2568_v23 }
 0x8d0   :  { %5284 = vmatmul.mubr.msk.f32.gmra.mrb[42].mxu0 %vm1657_vm15, %v2418_v55  ;;  %v7024_v55 = vld [vmem:[%s7718_s1 + $0x230] sm:$0xff] }
 0x8d1   :  { %5311 = vmatprep.mubr.msk.f32.mxu0 %vm6088_vm9, %v6089_v62  ;;  %5700 = vmatpush3.bf16.msra.mxu1 %v5699_v8 }
 0x8d2   :  { %5701 = vmatprep.subr.bf16.mxu1 %v6087_v58 }
 0x8d5   :  { %5703 = vmatpush3.bf16.msra.mxu1 %v5702_v44 }
 0x8d6   :  { %5710 = vmatprep.subr.bf16.mxu1 %v6087_v58 }
 0x94a   :  { %v1778_v7 = vpop.f32.mrb[20].mxu0 }
 0x94b   :  { %v5189_v14 = vpop.f32.mrb[21].mxu0 }
 0x94e   :  { %v1783_v28 = vpop.f32.mrb[22].mxu0 }
 0x94f   :  { %v5192_v12 = vpop.f32.mrb[23].mxu0 }
 0x97f   :  { %v6967_v33 = vpop.f32.mrb[24].mxu0 }
 0x980   :  { %v5195_v22 = vpop.f32.mrb[25].mxu0 }
 0x983   :  { %v2020_v16 = vpop.f32.mrb[26].mxu0 }
 0x984   :  { %2521 = vrot.lane.b32.xlu0 %v2020_v16, %s6100_s6  ;;  %v5219_v0 = vpop.f32.mrb[27].mxu0 }
 0x987   :  { %v2025_v10 = vpop.f32.mrb[28].mxu0 }
 0x988   :  { %2523 = vrot.lane.b32.xlu0 %v2025_v10, %s6100_s6  ;;  %v5222_v31 = vpop.f32.mrb[29].mxu0 }
 0x98b   :  { %v2030_v40 = vpop.f32.mrb[30].mxu0 }
 0x98c   :  { %v5225_v21 = vpop.f32.mrb[31].mxu0 }
 0x98f   :  { %v2262_v51 = vpop.f32.mrb[32].mxu0 }
 0x990   :  { %2533 = vrot.lane.b32.xlu0 %v2262_v51, %s6101_s17  ;;  %v5249_v26 = vpop.f32.mrb[33].mxu0 }
 0x993   :  { %v2267_v46 = vpop.f32.mrb[34].mxu0 }
 0x994   :  { %2535 = vrot.lane.b32.xlu1 %v2267_v46, %s6101_s17  ;;  %v5252_v50 = vpop.f32.mrb[35].mxu0 }
 0x997   :  { %v2272_v35 = vpop.f32.mrb[36].mxu0 }
 0x998   :  { %v5255_v52 = vpop.f32.mrb[37].mxu0 }
 0x99b   :  { %v2504_v39 = vpop.f32.mrb[38].mxu0 }
 0x99c   :  { %2545 = vrot.lane.b32.xlu0 %v2504_v39, %s6102_s22  ;;  %v5279_v54 = vpop.f32.mrb[39].mxu0 }
 0x99f   :  { %v2509_v48 = vpop.f32.mrb[40].mxu0 }
 0x9a0   :  { %2547 = vrot.lane.b32.xlu0 %v2509_v48, %s6102_s22  ;;  %v5282_v56 = vpop.f32.mrb[41].mxu0 }
 0x9a3   :  { %v2514_v57 = vpop.f32.mrb[42].mxu0 }
 0x9a4   :  { %2525 = vrot.lane.b32.xlu0 %v2030_v40, %s6100_s6  ;;  %v5285_v37 = vpop.f32.mrb[43].mxu0 }
 0x9a5   :  { %v2708_v37 = vld [vmem:[%s7721_s2 + $0x48] sm:$0xff] }
 0x9a8   :  { %2537 = vrot.lane.b32.xlu0 %v2272_v35, %s6101_s17 }
 0x9ac   :  { %2549 = vrot.lane.b32.xlu0 %v2514_v57, %s6102_s22  ;;  %v2707_v57 = vld [vmem:[%s7721_s2 + $0x40] sm:$0xff] }
 0x9f6   :  { %v2522_v59 = vpop.permute.xlu0 %2521 }
 0x9f7   :  { %v2554_v2 = vsel %vm1558_vm12, %v1778_v7, %v2522_v59  ;;  %v2575_v7 = vrot.slane %v7024_v55, %v2574_v17  ;;  %v5705_v59 = vpack.c.bf16 %v2708_v37, %v2707_v57 }
 0x9f9   :  { %5706 = vmatpush3.bf16.msra.mxu0 %v5705_v59 }
 0x9fa   :  { %v2524_v61 = vpop.permute.xlu0 %2523  ;;  %5707 = vmatprep.subr.bf16.mxu0 %v6087_v58 }
 0x9fb   :  { %v2555_v20 = vsel %vm1558_vm12, %v1783_v28, %v2524_v61  ;;  %v2709_v61 = vld [vmem:[%s7721_s2 + $0x50] sm:$0xff] }
 0xa02   :  { %v2534_v1 = vpop.permute.xlu0 %2533 }
 0xa03   :  { %v2558_v36 = vsel %vm2557_vm1, %v2554_v2, %v2534_v1  ;;  %v2710_v1 = vld [vmem:[%s7721_s2 + $0x58] sm:$0xff] }
 0xa04   :  { %v5708_v2 = vpack.c.bf16 %v2710_v1, %v2709_v61  ;;  %v2825_v1 = vsub.s32 3, %v6245_v29 }
 0xa06   :  { %v2536_v38 = vpop.permute.xlu1 %2535  ;;  %5709 = vmatpush3.bf16.msra.mxu0 %v5708_v2  ;;  %v2826_v2 = vrot.slane %v7024_v55, %v2825_v1 }
 0xa07   :  { %v2559_v19 = vsel %vm2557_vm1, %v2555_v20, %v2536_v38  ;;  %5734 = vmatprep.subr.bf16.mxu0 %v6087_v58  ;;  %v2811_v20 = vld [vmem:[%s7718_s1 + $0x150] sm:$0xff] }
 0xa0e   :  { %v2546_v60 = vpop.permute.xlu0 %2545 }
 0xa0f   :  { %v2562_v3 = vsel %vm2561_vm2, %v2558_v36, %v2546_v60  ;;  %v2808_v36 = vld [vmem:[%s7718_s1 + $0x138] sm:$0xff]  ;;  %v2809_v60 = vld [vmem:[%s7718_s1 + $0x140] sm:$0xff] }
 0xa10   :  { %v2565_v15 = vmul.f32 %v4576_v4, %v2562_v3  ;;  %v2807_v4 = vld [vmem:[%s7718_s1 + $0x130] sm:$0xff]  ;;  %v2810_v3 = vld [vmem:[%s7718_s1 + $0x148] sm:$0xff] }
 0xa11   :  { %v5711_v38 = vpack.c.bf16 %v2808_v36, %v2807_v4 }
 0xa12   :  { %5295 = vmatmul.mubr.msk.f32.vlgmr.msra.gmra.mrb[44].mxu1 %vm278_vm4, %v2565_v15  ;;  %v2548_v45 = vpop.permute.xlu0 %2547  ;;  %v5714_v15 = vpack.c.bf16 %v2810_v3, %v2809_v60 }
 0xa13   :  { %v2563_v13 = vsel %vm2561_vm2, %v2559_v19, %v2548_v45  ;;  %5297 = vmatprep.mubr.msk.f32.mxu1 %vm6088_vm9, %v6089_v62  ;;  %5712 = vmatpush3.bf16.msra.mxu1 %v5711_v38  ;;  %v2813_v45 = vld [vmem:[%s7718_s1 + $0x160] sm:$0xff] }
 0xa14   :  { %v2566_v42 = vmul.f32 %v4577_v5, %v2563_v13  ;;  %5713 = vmatprep.subr.bf16.mxu1 %v6087_v58  ;;  %v2812_v5 = vld [vmem:[%s7718_s1 + $0x158] sm:$0xff]  ;;  %v2814_v13 = vld [vmem:[%s7718_s1 + $0x168] sm:$0xff] }
 0xa15   :  { %v5717_v19 = vpack.c.bf16 %v2812_v5, %v2811_v20 }
 0xa16   :  { %v2526_v49 = vpop.permute.xlu0 %2525  ;;  %5298 = vmatmul.mubr.msk.f32.gmra.mrb[46].mxu1 %vm278_vm4, %v2566_v42  ;;  %v5720_v42 = vpack.c.bf16 %v2814_v13, %v2813_v45 }
 0xa17   :  { %5300 = vmatprep.mubr.msk.f32.mxu1 %vm6088_vm9, %v6089_v62  ;;  %v2556_v53 = vsel %vm1558_vm12, %v6967_v33, %v2526_v49  ;;  %5715 = vmatpush3.bf16.msra.mxu1 %v5714_v15  ;;  %v2815_v49 = vld [vmem:[%s7718_s1 + $0x170] sm:$0xff] }
 0xa18   :  { %5716 = vmatprep.subr.bf16.mxu1 %v6087_v58 }
 0xa1a   :  { %v2538_v11 = vpop.permute.xlu0 %2537 }
 0xa1b   :  { %v2560_v47 = vsel %vm2557_vm1, %v2556_v53, %v2538_v11  ;;  %5718 = vmatpush3.bf16.msra.mxu1 %v5717_v19  ;;  %v2816_v11 = vld [vmem:[%s7718_s1 + $0x178] sm:$0xff] }
 0xa1c   :  { %5719 = vmatprep.subr.bf16.mxu1 %v6087_v58  ;;  %v5723_v53 = vpack.c.bf16 %v2816_v11, %v2815_v49 }
 0xa1e   :  { %v2550_v6 = vpop.permute.xlu0 %2549 }
 0xa1f   :  { %v2564_v30 = vsel %vm2561_vm2, %v2560_v47, %v2550_v6  ;;  %5721 = vmatpush3.bf16.msra.mxu1 %v5720_v42  ;;  %v2818_v47 = vld [vmem:[%s7718_s1 + $0x188] sm:$0xff] }
 0xa20   :  { %v2567_v27 = vmul.f32 %v4578_v24, %v2564_v30  ;;  %5722 = vmatprep.subr.bf16.mxu1 %v6087_v58  ;;  %v2817_v24 = vld [vmem:[%s7718_s1 + $0x180] sm:$0xff]  ;;  %v2819_v30 = vld [vmem:[%s7718_s1 + $0x190] sm:$0xff] }
 0xa21   :  { %v5726_v6 = vpack.c.bf16 %v2818_v47, %v2817_v24 }
 0xa22   :  { %5301 = vmatmul.mubr.msk.f32.gmra.mrb[48].mxu1 %vm278_vm4, %v2567_v27  ;;  %v2820_v27 = vld [vmem:[%s7718_s1 + $0x198] sm:$0xff] }
 0xa23   :  { %5352 = vmatprep.mubr.msk.f32.mxu1 %vm6088_vm9, %v6089_v62  ;;  %5724 = vmatpush3.bf16.msra.mxu1 %v5723_v53 }
 0xa24   :  { %5725 = vmatprep.subr.bf16.mxu1 %v6087_v58 }
 0xa27   :  { %5727 = vmatpush3.bf16.msra.mxu1 %v5726_v6 }
 0xa28   :  { %5728 = vmatprep.subr.bf16.mxu1 %v6087_v58 }
 0xae5   :  { %v2651_v14 = vpop.f32.mrb[44].mxu1 }
 0xae6   :  { %v2652_v28 = vadd.f32 %v2651_v14, %v2575_v7  ;;  %v5296_v12 = vpop.f32.mrb[45].mxu1 }
 0xae8   :  { %v7030_v33 = vadd.f32 %v2652_v28, %v6614_v25 }
 0xae9   :  { %v2656_v22 = vpop.f32.mrb[46].mxu1 }
 0xaea   :  { %v2657_v16 = vadd.f32 %v2656_v22, %v2575_v7  ;;  %v5299_v0 = vpop.f32.mrb[47].mxu1  ;;  %v2668_v10 = vsel %vm278_vm4, %v7030_v33, 0.0 }
 0xaeb   :  { %2669 = vadd.xlane.f32.xlu1 %v2668_v10 }
 0xaec   :  { %v7035_v23 = vadd.f32 %v2657_v16, %v6621_v32 }
 0xaee   :  { %v2671_v18 = vsel %vm278_vm4, %v7035_v23, 0.0 }
 0xaef   :  { %2672 = vadd.xlane.f32.xlu0 %v2671_v18 }
 0xaf5   :  { %v2661_v31 = vpop.f32.mrb[48].mxu1 }
 0xaf6   :  { %v2662_v8 = vadd.f32 %v2661_v31, %v2575_v7  ;;  %v5302_v40 = vpop.f32.mrb[49].mxu1  ;;  %v5729_v7 = vpack.c.bf16 %v2820_v27, %v2819_v30 }
 0xaf8   :  { %v7040_v25 = vadd.f32 %v2662_v8, %v6628_v34  ;;  %5730 = vmatpush3.bf16.msra.mxu1 %v5729_v7 }
 0xaf9   :  { %5731 = vmatprep.subr.bf16.mxu1 %v6087_v58 }
 0xafa   :  { %v2674_v21 = vsel %vm1417_vm11, %v7040_v25, 0.0 }
 0xafb   :  { %2675 = vadd.xlane.f32.xlu0 %v2674_v21 }
 0xb78   :  { %v2670_v51 = vpop.xlane.xlu1 %2669 }
 0xb79   :  { %v2677_v26 = vmul.f32 0.03125, %v2670_v51 }
 0xb7b   :  { %v7045_v43 = vsub.f32 %v7030_v33, %v2677_v26 }
 0xb7c   :  { %v2673_v32 = vpop.xlane.xlu0 %2672 }
 0xb7d   :  { %v2678_v41 = vmul.f32 0.03125, %v2673_v32  ;;  %v2683_v44 = vmul.f32 %v7045_v43, %v7045_v43  ;;  %v2821_v32 = vld [vmem:[%s7718_s1 + $0x1a0] sm:$0xff] }
 0xb7f   :  { %v7050_v46 = vsub.f32 %v7035_v23, %v2678_v41  ;;  %v2686_v34 = vsel %vm278_vm4, %v2683_v44, 0.0  ;;  %v2822_v41 = vld [vmem:[%s7718_s1 + $0x1a8] sm:$0xff] }
 0xb80   :  { %2687 = vadd.xlane.f32.xlu1 %v2686_v34  ;;  %v5732_v44 = vpack.c.bf16 %v2822_v41, %v2821_v32 }
 0xb81   :  { %v2684_v50 = vmul.f32 %v7050_v46, %v7050_v46 }
 0xb82   :  { %5733 = vmatpush3.bf16.msra.mxu1 %v5732_v44 }
 0xb83   :  { %v2689_v35 = vsel %vm278_vm4, %v2684_v50, 0.0  ;;  %5747 = vmatprep.subr.bf16.mxu1 %v6087_v58 }
 0xb84   :  { %2690 = vadd.xlane.f32.xlu0 %v2689_v35 }
 0xb88   :  { %v2676_v52 = vpop.xlane.xlu0 %2675 }
 0xb89   :  { %v2679_v39 = vmul.f32 0.03125, %v2676_v52 }
 0xb8b   :  { %v7057_v54 = vsub.f32 %v7040_v25, %v2679_v39 }
 0xb8d   :  { %v2685_v48 = vmul.f32 %v7057_v54, %v7057_v54 }
 0xb8f   :  { %v2692_v56 = vsel %vm1417_vm11, %v2685_v48, 0.0 }
 0xb90   :  { %2693 = vadd.xlane.f32.xlu1 %v2692_v56 }
 0xc0d   :  { %v2688_v14 = vpop.xlane.xlu1 %2687 }
 0xc0e   :  { %v2695_v28 = vmul.f32 0.03125, %v2688_v14 }
 0xc10   :  { %v2698_v12 = vadd.f32 1e-05, %v2695_v28 }
 0xc11   :  { %v2691_v22 = vpop.xlane.xlu0 %2690 }
 0xc12   :  { %6006 = vrsqrt.f32 %v2698_v12  ;;  %v2696_v16 = vmul.f32 0.03125, %v2691_v22 }
 0xc14   :  { %v2699_v0 = vadd.f32 1e-05, %v2696_v16 }
 0xc16   :  { %6008 = vrsqrt.f32 %v2699_v0  ;;  %v2949_v0 = vld [vmem:[%s7721_s2 + $0x20] sm:$0xff] }
 0xc1c   :  { %v6007_v10 = vpop.eup %6006 }
 0xc1d   :  { %v2704_v18 = vmul.f32 %v6007_v10, %v7045_v43  ;;  %v2694_v31 = vpop.xlane.xlu1 %2693  ;;  %v2950_v10 = vld [vmem:[%s7721_s2 + $0x28] sm:$0xff] }
 0xc1e   :  { %v2697_v8 = vmul.f32 0.03125, %v2694_v31  ;;  %v2951_v31 = vld [vmem:[%s7721_s2 + $0x30] sm:$0xff] }
 0xc1f   :  { %5312 = vmatmul.mubr.msk.f32.vlgmr.msra.gmra.mrb[44].mxu0 %vm278_vm4, %v2704_v18  ;;  %v5735_v18 = vpack.c.bf16 %v2950_v10, %v2949_v0 }
 0xc20   :  { %v6009_v40 = vpop.eup %6008  ;;  %v2700_v21 = vadd.f32 1e-05, %v2697_v8  ;;  %5314 = vmatprep.mubr.msk.f32.mxu0 %vm6088_vm9, %v6089_v62  ;;  %v2952_v8 = vld [vmem:[%s7721_s2 + $0x38] sm:$0xff] }
 0xc21   :  { %v2705_v51 = vmul.f32 %v6009_v40, %v7050_v46  ;;  %v7147_v46 = vld [vmem:[%s7721_s2 + $0xa0] sm:$0xff]  ;;  %5736 = vmatpush3.bf16.msra.mxu0 %v5735_v18  ;;  %v5738_v40 = vpack.c.bf16 %v2952_v8, %v2951_v31 }
 0xc22   :  { %6010 = vrsqrt.f32 %v2700_v21  ;;  %v2714_v34 = vrot.slane %v7147_v46, %v680_v9  ;;  %5737 = vmatprep.subr.bf16.mxu0 %v6087_v58 }
 0xc23   :  { %5315 = vmatmul.mubr.msk.f32.gmra.mrb[46].mxu0 %vm278_vm4, %v2705_v51 }
 0xc24   :  { %5317 = vmatprep.mubr.msk.f32.mxu0 %vm6088_vm9, %v6089_v62 }
 0xc25   :  { %5739 = vmatpush3.bf16.msra.mxu0 %v5738_v40  ;;  %v6074_v40 = vld [vmem:[%s7722_s4] sm:$0xff] }
 0xc26   :  { %5740 = vmatprep.subr.bf16.mxu0 %v6087_v58 }
 0xc2c   :  { %v6011_v26 = vpop.eup %6010 }
 0xc2d   :  { %v2706_v43 = vmul.f32 %v6011_v26, %v7057_v54 }
 0xc2f   :  { %5318 = vmatmul.mubr.msk.f32.gmra.mrb[48].mxu0 %vm278_vm4, %v2706_v43 }
 0xc30   :  { %5369 = vmatprep.mubr.msk.f32.mxu0 %vm6088_vm9, %v6089_v62 }
 0xcf2   :  { %v2790_v50 = vpop.f32.mrb[44].mxu0 }
 0xcf3   :  { %v2791_v35 = vadd.f32 %v2790_v50, %v2714_v34  ;;  %v5313_v52 = vpop.f32.mrb[45].mxu0 }
 0xcf5   :  { %v2804_v39 = vmax.f32 %v2791_v35, 0.0 }
 0xcf6   :  { %v2795_v54 = vpop.f32.mrb[46].mxu0 }
 0xcf7   :  { %v2796_v48 = vadd.f32 %v2795_v54, %v2714_v34  ;;  %v5316_v56 = vpop.f32.mrb[47].mxu0  ;;  %5353 = vmatmul.mubr.f32.vlgmr.msra.gmra.mrb[50].mxu1 %v2804_v39 }
 0xcf8   :  { %5355 = vmatprep.mubr.msk.f32.mxu1 %vm6088_vm9, %v6089_v62 }
 0xcf9   :  { %v2805_v57 = vmax.f32 %v2796_v48, 0.0 }
 0xcfb   :  { %5356 = vmatmul.mubr.f32.gmra.mrb[52].mxu1 %v2805_v57 }
 0xcfc   :  { %5358 = vmatprep.mubr.msk.f32.mxu1 %vm6088_vm9, %v6089_v62 }
 0xd02   :  { %v2800_v37 = vpop.f32.mrb[48].mxu0 }
 0xd03   :  { %v2801_v59 = vadd.f32 %v2800_v37, %v2714_v34  ;;  %v5319_v61 = vpop.f32.mrb[49].mxu0  ;;  %v2956_v37 = vrot.slane %v7147_v46, %v2574_v17 }
 0xd05   :  { %v2806_v9 = vmax.f32 %v2801_v59, 0.0 }
 0xd07   :  { %5359 = vmatmul.mubr.f32.gmra.mrb[54].mxu1 %v2806_v9 }
 0xd08   :  { %5414 = vmatprep.mubr.msk.f32.mxu1 %vm6088_vm9, %v6089_v62 }
 0xdca   :  { %v2893_v4 = vpop.f32.mrb[50].mxu1 }
 0xdcb   :  { %v2894_v36 = vadd.f32 %v2893_v4, %v2826_v2  ;;  %v5354_v60 = vpop.f32.mrb[51].mxu1 }
 0xdcd   :  { %v7163_v38 = vadd.f32 %v2894_v36, %v7030_v33 }
 0xdce   :  { %v2898_v3 = vpop.f32.mrb[52].mxu1 }
 0xdcf   :  { %v2899_v15 = vadd.f32 %v2898_v3, %v2826_v2  ;;  %v5357_v20 = vpop.f32.mrb[53].mxu1  ;;  %v2910_v5 = vsel %vm278_vm4, %v7163_v38, 0.0 }
 0xdd0   :  { %2911 = vadd.xlane.f32.xlu0 %v2910_v5 }
 0xdd1   :  { %v7168_v19 = vadd.f32 %v2899_v15, %v7035_v23 }
 0xdd3   :  { %v2913_v45 = vsel %vm278_vm4, %v7168_v19, 0.0 }
 0xdd4   :  { %2914 = vadd.xlane.f32.xlu1 %v2913_v45 }
 0xdda   :  { %v2903_v55 = vpop.f32.mrb[54].mxu1 }
 0xddb   :  { %v2904_v13 = vadd.f32 %v2903_v55, %v2826_v2  ;;  %v5360_v42 = vpop.f32.mrb[55].mxu1 }
 0xddd   :  { %v7173_v33 = vadd.f32 %v2904_v13, %v7040_v25 }
 0xddf   :  { %v2916_v49 = vsel %vm1417_vm11, %v7173_v33, 0.0 }
 0xde0   :  { %2917 = vadd.xlane.f32.xlu0 %v2916_v49 }
 0xe5d   :  { %v2912_v11 = vpop.xlane.xlu0 %2911 }
 0xe5e   :  { %v2919_v53 = vmul.f32 0.03125, %v2912_v11 }
 0xe60   :  { %v2922_v24 = vsub.f32 %v7163_v38, %v2919_v53 }
 0xe61   :  { %v2915_v23 = vpop.xlane.xlu1 %2914 }
 0xe62   :  { %v2920_v47 = vmul.f32 0.03125, %v2915_v23  ;;  %v2925_v6 = vmul.f32 %v2922_v24, %v2922_v24 }
 0xe64   :  { %v2923_v30 = vsub.f32 %v7168_v19, %v2920_v47  ;;  %v2928_v27 = vsel %vm278_vm4, %v2925_v6, 0.0 }
 0xe65   :  { %2929 = vadd.xlane.f32.xlu1 %v2928_v27 }
 0xe66   :  { %v2926_v7 = vmul.f32 %v2923_v30, %v2923_v30 }
 0xe68   :  { %v2931_v25 = vsel %vm278_vm4, %v2926_v7, 0.0 }
 0xe69   :  { %2932 = vadd.xlane.f32.xlu0 %v2931_v25 }
 0xe6d   :  { %v2918_v14 = vpop.xlane.xlu0 %2917 }
 0xe6e   :  { %v2921_v28 = vmul.f32 0.03125, %v2918_v14 }
 0xe70   :  { %v2924_v12 = vsub.f32 %v7173_v33, %v2921_v28 }
 0xe72   :  { %v2927_v22 = vmul.f32 %v2924_v12, %v2924_v12 }
 0xe74   :  { %v2934_v16 = vsel %vm1417_vm11, %v2927_v22, 0.0 }
 0xe75   :  { %2935 = vadd.xlane.f32.xlu1 %v2934_v16 }
 0xef2   :  { %v2930_v21 = vpop.xlane.xlu1 %2929 }
 0xef3   :  { %v2937_v51 = vmul.f32 0.03125, %v2930_v21 }
 0xef5   :  { %v2940_v26 = vadd.f32 1e-05, %v2937_v51 }
 0xef6   :  { %v2933_v43 = vpop.xlane.xlu0 %2932 }
 0xef7   :  { %6012 = vrsqrt.f32 %v2940_v26  ;;  %v2938_v32 = vmul.f32 0.03125, %v2933_v43  ;;  %v6075_v26 = vld [vmem:[%s7722_s4 + $0x18] sm:$0xff] }
 0xef9   :  { %v2941_v41 = vadd.f32 1e-05, %v2938_v32 }
 0xefb   :  { %6014 = vrsqrt.f32 %v2941_v41  ;;  %v6076_v41 = vld [vmem:[%s7722_s4 + $0x8] sm:$0xff] }
 0xf01   :  { %v6013_v44 = vpop.eup %6012 }
 0xf02   :  { %v2946_v34 = vmul.f32 %v6013_v44, %v2922_v24  ;;  %v2936_v50 = vpop.xlane.xlu1 %2935 }
 0xf03   :  { %v2939_v35 = vmul.f32 0.03125, %v2936_v50 }
 0xf04   :  { %5370 = vmatmul.mubr.msk.f32.vlgmr.msra.gmra.mrb[50].mxu0 %vm278_vm4, %v2946_v34 }
 0xf05   :  { %v6015_v52 = vpop.eup %6014  ;;  %v2942_v39 = vadd.f32 1e-05, %v2939_v35  ;;  %5372 = vmatprep.mubr.msk.f32.mxu0 %vm6088_vm9, %v6089_v62  ;;  %v6077_v35 = vld [vmem:[%s7722_s4 + $0x20] sm:$0xff] }
 0xf06   :  { %v2947_v54 = vmul.f32 %v6015_v52, %v2923_v30 }
 0xf07   :  { %6016 = vrsqrt.f32 %v2942_v39 }
 0xf08   :  { %5373 = vmatmul.mubr.msk.f32.gmra.mrb[52].mxu0 %vm278_vm4, %v2947_v54 }
 0xf09   :  { %5375 = vmatprep.mubr.msk.f32.mxu0 %vm6088_vm9, %v6089_v62 }
 0xf11   :  { %v6017_v48 = vpop.eup %6016 }
 0xf12   :  { %v2948_v56 = vmul.f32 %v6017_v48, %v2924_v12 }
 0xf14   :  { %5376 = vmatmul.mubr.msk.f32.gmra.mrb[54].mxu0 %vm278_vm4, %v2948_v56 }
 0xf15   :  { %5384 = vmatprep.mubr.msk.f32.mxu0 %vm6088_vm9, %v6089_v62 }
 0xfd7   :  { %v3032_v57 = vpop.f32.mrb[50].mxu0 }
 0xfd8   :  { %v5371_v59 = vpop.f32.mrb[51].mxu0  ;;  %v3033_v9 = vadd.f32 %v3032_v57, %v2956_v37  ;;  %v6078_v57 = vld [vmem:[%s7722_s4 + $0x10] sm:$0x3] }
 0xfdb   :  { %v3037_v61 = vpop.f32.mrb[52].mxu0 }
 0xfdc   :  { %v3038_v2 = vadd.f32 %v3037_v61, %v2956_v37  ;;  %v5374_v4 = vpop.f32.mrb[53].mxu0 }
 0xfdd   :  { %v6079_v4 = vld [vmem:[%s7722_s4 + $0x28] sm:$0x3] }
 0xfde   :  { %v7209_v36 = vpack.i.bf16 %v3038_v2, %v3033_v9 }
 0xfe0   :  { %5913 = vrot.lane.b32.xlu0 %v7209_v36, %s6086_s28 }
 0xfe7   :  { %v3042_v60 = vpop.f32.mrb[54].mxu0 }
 0xfe8   :  { %v7213_v3 = vadd.f32 %v3042_v60, %v2956_v37  ;;  %v5377_v15 = vpop.f32.mrb[55].mxu0 }
 0xfea   :  { %3295 = vrot.lane.b32.xlu0 %v7213_v3, %s6090_s10  ;;  %3053 = vrot.lane.b32.xlu1 %v7213_v3, %s6086_s28 }
 0xfee   :  { %3285 = vrot.lane.b32.xlu0 %v3033_v9, %s6092_s12  ;;  %5918 = vrot.lane.b32.xlu1 %v7209_v36, %s6090_s10 }
 0xff2   :  { %3289 = vrot.lane.b32.xlu0 %v7213_v3, %s6092_s12  ;;  %5923 = vrot.lane.b32.xlu1 %v7209_v36, %s6091_s11 }
 0xff6   :  { %5928 = vrot.lane.b32.xlu0 %v7209_v36, %s6094_s0  ;;  %3287 = vrot.lane.b32.xlu1 %v3038_v2, %s6092_s12 }
 0xffa   :  { %3529 = vrot.lane.b32.xlu0 %v3038_v2, %s6093_s13  ;;  %3537 = vrot.lane.b32.xlu1 %v7213_v3, %s6091_s11 }
 0xffe   :  { %3779 = vrot.lane.b32.xlu0 %v7213_v3, %s6094_s0  ;;  %3527 = vrot.lane.b32.xlu1 %v3033_v9, %s6093_s13 }
0x1002   :  { %3771 = vrot.lane.b32.xlu0 %v3038_v2, %s6095_s14  ;;  %3531 = vrot.lane.b32.xlu1 %v7213_v3, %s6093_s13 }
0x1006   :  { %3769 = vrot.lane.b32.xlu1 %v3033_v9, %s6095_s14 }
0x100a   :  { %3773 = vrot.lane.b32.xlu1 %v7213_v3, %s6095_s14 }
0x1052   :  { %v5914_v17 = vpop.permute.xlu0 %5913 }
0x1053   :  { %v5916_v46 = vunpack.i.h.bf16 %v5914_v17  ;;  %v5915_v20 = vunpack.i.l.bf16 %v5914_v17 }
0x1055   :  { %v5741_v5 = vpack.c.bf16 %v5916_v46, %v5915_v20 }
0x1057   :  { %5743 = vmatpush3.bf16.xpose.msk.msra.mxu0 %vm6704_vm13, %v5741_v5 }
0x1058   :  { %5382 = vmatprep.subr.mxu0 %v6089_v62 }
0x105c   :  { %v3054_v45 = vpop.permute.xlu1 %3053  ;;  %v3296_v49 = vpop.permute.xlu0 %3295 }
0x105f   :  { %5383 = vmatpush3.xpose.msk.msra.mxu0 %vm1558_vm12, %v3054_v45 }
0x1060   :  { %v5919_v55 = vpop.permute.xlu1 %5918  ;;  %5744 = vmatprep.subr.bf16.mxu0 %v6087_v58  ;;  %v3286_v53 = vpop.permute.xlu0 %3285 }
0x1061   :  { %v5921_v13 = vunpack.i.h.bf16 %v5919_v55  ;;  %v5920_v42 = vunpack.i.l.bf16 %v5919_v55 }
0x1062   :  { %5385 = vmatmul.mubr.msk.f32.vlgmr.msra.gmra.mrb[56].mxu0 %vm1558_vm12, %v3033_v9 }
0x1063   :  { %v5748_v11 = vpack.c.bf16 %v5921_v13, %v5920_v42  ;;  %5387 = vmatprep.mubr.msk.f32.mxu0 %vm6088_vm9, %v6089_v62 }
0x1064   :  { %v5924_v24 = vpop.permute.xlu1 %5923  ;;  %v3290_v6 = vpop.permute.xlu0 %3289 }
0x1065   :  { %5750 = vmatpush3.bf16.xpose.msk.msra.mxu1 %vm6704_vm13, %v5748_v11  ;;  %v5926_v23 = vunpack.i.h.bf16 %v5924_v24  ;;  %v5925_v47 = vunpack.i.l.bf16 %v5924_v24 }
0x1066   :  { %5388 = vmatmul.mubr.msk.f32.gmra.mrb[58].mxu0 %vm1558_vm12, %v3038_v2  ;;  %5412 = vmatprep.subr.mxu1 %v6089_v62 }
0x1067   :  { %5390 = vmatprep.mubr.msk.f32.mxu0 %vm6088_vm9, %v6089_v62  ;;  %v5755_v30 = vpack.c.bf16 %v5926_v23, %v5925_v47 }
0x1068   :  { %v3288_v27 = vpop.permute.xlu1 %3287  ;;  %v5929_v7 = vpop.permute.xlu0 %5928 }
0x1069   :  { %v5931_v14 = vunpack.i.h.bf16 %v5929_v7  ;;  %v5930_v28 = vunpack.i.l.bf16 %v5929_v7 }
0x106a   :  { %5391 = vmatmul.mubr.msk.f32.gmra.mrb[60].mxu0 %vm1558_vm12, %v7213_v3 }
0x106b   :  { %5399 = vmatprep.mubr.msk.f32.mxu0 %vm6088_vm9, %v6089_v62  ;;  %v5762_v12 = vpack.c.bf16 %v5931_v14, %v5930_v28 }
0x106c   :  { %v3538_v25 = vpop.permute.xlu1 %3537  ;;  %v3530_v16 = vpop.permute.xlu0 %3529 }
0x106d   :  { %5413 = vmatpush3.xpose.msk.msra.mxu1 %vm1558_vm12, %v3296_v49 }
0x106e   :  { %5754 = vmatprep.subr.bf16.mxu1 %v6087_v58 }
0x1070   :  { %5415 = vmatmul.mubr.msk.f32.vlgmr.msra.gmra.mrb[56].mxu1 %vm1558_vm12, %v3286_v53  ;;  %v3528_v22 = vpop.permute.xlu1 %3527  ;;  %v3780_v10 = vpop.permute.xlu0 %3779 }
0x1071   :  { %5757 = vmatpush3.bf16.xpose.msk.msra.mxu1 %vm6704_vm13, %v5755_v30  ;;  %5417 = vmatprep.mubr.msk.f32.mxu1 %vm6088_vm9, %v6089_v62 }
0x1072   :  { %5442 = vmatprep.subr.mxu1 %v6089_v62 }
0x1074   :  { %5418 = vmatmul.mubr.msk.f32.gmra.mrb[58].mxu1 %vm1558_vm12, %v3288_v27  ;;  %v3532_v0 = vpop.permute.xlu1 %3531  ;;  %v3772_v18 = vpop.permute.xlu0 %3771 }
0x1075   :  { %5420 = vmatprep.mubr.msk.f32.mxu1 %vm6088_vm9, %v6089_v62 }
0x1078   :  { %5421 = vmatmul.mubr.msk.f32.gmra.mrb[60].mxu1 %vm1558_vm12, %v3290_v6  ;;  %v3770_v63 = vpop.permute.xlu1 %3769 }
0x1079   :  { %5443 = vmatpush3.xpose.msk.msra.mxu1 %vm1558_vm12, %v3538_v25  ;;  %5444 = vmatprep.mubr.msk.f32.mxu1 %vm6088_vm9, %v6089_v62 }
0x107a   :  { %5761 = vmatprep.subr.bf16.mxu1 %v6087_v58 }
0x107c   :  { %5445 = vmatmul.mubr.msk.f32.vlgmr.msra.gmra.mrb[62].mxu1 %vm1558_vm12, %v3528_v22  ;;  %v3774_v31 = vpop.permute.xlu1 %3773 }
0x107d   :  { %5764 = vmatpush3.bf16.xpose.msk.msra.mxu1 %vm6704_vm13, %v5762_v12  ;;  %5447 = vmatprep.mubr.msk.f32.mxu1 %vm6088_vm9, %v6089_v62 }
0x107e   :  { %5472 = vmatprep.subr.mxu1 %v6089_v62 }
0x1080   :  { %5448 = vmatmul.mubr.msk.f32.gmra.mrb[64].mxu1 %vm1558_vm12, %v3530_v16 }
0x1081   :  { %5450 = vmatprep.mubr.msk.f32.mxu1 %vm6088_vm9, %v6089_v62 }
0x1084   :  { %5451 = vmatmul.mubr.msk.f32.gmra.mrb[66].mxu1 %vm1558_vm12, %v3532_v0 }
0x1085   :  { %5473 = vmatpush3.xpose.msk.msra.mxu1 %vm1558_vm12, %v3780_v10  ;;  %5474 = vmatprep.mubr.msk.f32.mxu1 %vm6088_vm9, %v6089_v62 }
0x1086   :  { %5768 = vmatprep.subr.bf16.mxu1 %v6087_v58 }
0x1088   :  { %5475 = vmatmul.mubr.msk.f32.vlgmr.msra.gmra.mrb[68].mxu1 %vm1558_vm12, %v3770_v63 }
0x1089   :  { %5477 = vmatprep.mubr.msk.f32.mxu1 %vm6088_vm9, %v6089_v62 }
0x108c   :  { %5478 = vmatmul.mubr.msk.f32.gmra.mrb[70].mxu1 %vm1558_vm12, %v3772_v18 }
0x108d   :  { %5480 = vmatprep.mubr.msk.f32.mxu1 %vm6088_vm9, %v6089_v62 }
0x1090   :  { %5481 = vmatmul.mubr.msk.f32.gmra.mrb[72].mxu1 %vm1558_vm12, %v3774_v31 }
0x1091   :  { %5506 = vmatprep.mubr.msk.f32.mxu1 %vm6088_vm9, %v6089_v62 }
0x1135   :  { %v3133_v8 = vpop.f32.mrb[56].mxu0 }
0x1136   :  { %v3147_v21 = vmul.f32 %v6074_v40, %v3133_v8  ;;  %v5386_v51 = vpop.f32.mrb[57].mxu0 }
0x1138   :  { %v7304_v43 = vadd.f32 %v6075_v26, %v3147_v21 }
0x1139   :  { %v3138_v32 = vpop.f32.mrb[58].mxu0 }
0x113a   :  { %v3148_v44 = vmul.f32 %v6076_v41, %v3138_v32  ;;  %v5389_v34 = vpop.f32.mrb[59].mxu0  ;;  %v3153_v50 = vsel %vm1657_vm15, %v7304_v43, -inf }
0x113b   :  { %3154 = vmax.xlane.f32.xlu0 %v3153_v50 }
0x113c   :  { %v7314_v52 = vadd.f32 %v6077_v35, %v3148_v44 }
0x113d   :  { %v3143_v39 = vpop.f32.mrb[60].mxu0 }
0x113e   :  { %v5392_v54 = vpop.f32.mrb[61].mxu0  ;;  %v3156_v48 = vsel %vm1657_vm15, %v7314_v52, -inf  ;;  %v3149_v37 = vmul.f32 %v6078_v57, %v3143_v39 }
0x113f   :  { %3157 = vmax.xlane.f32.xlu1 %v3156_v48 }
0x1140   :  { %v7326_v60 = vadd.f32 %v6079_v4, %v3149_v37 }
0x1142   :  { %v3159_v13 = vsel %vm1664_vm0, %v7326_v60, -inf }
0x1143   :  { %v3375_v56 = vpop.f32.mrb[56].mxu1 }
0x1144   :  { %v3389_v59 = vmul.f32 %v6074_v40, %v3375_v56  ;;  %v5416_v61 = vpop.f32.mrb[57].mxu1 }
0x1146   :  { %v7321_v9 = vadd.f32 %v6075_v26, %v3389_v59 }
0x1147   :  { %v3380_v2 = vpop.f32.mrb[58].mxu1 }
0x1148   :  { %v3390_v15 = vmul.f32 %v6076_v41, %v3380_v2  ;;  %v5419_v17 = vpop.f32.mrb[59].mxu1  ;;  %v3395_v46 = vsel %vm1657_vm15, %v7321_v9, -inf }
0x1149   :  { %3396 = vmax.xlane.f32.xlu0 %v3395_v46 }
0x114a   :  { %v7330_v20 = vadd.f32 %v6077_v35, %v3390_v15 }
0x114b   :  { %v3385_v5 = vpop.f32.mrb[60].mxu1 }
0x114c   :  { %v3391_v45 = vmul.f32 %v6078_v57, %v3385_v5  ;;  %v5422_v55 = vpop.f32.mrb[61].mxu1  ;;  %v3398_v42 = vsel %vm1657_vm15, %v7330_v20, -inf }
0x114d   :  { %3160 = vmax.xlane.f32.xlu0 %v3159_v13  ;;  %3399 = vmax.xlane.f32.xlu1 %v3398_v42 }
0x114e   :  { %v7336_v49 = vadd.f32 %v6079_v4, %v3391_v45 }
0x114f   :  { %v3617_v11 = vpop.f32.mrb[62].mxu1 }
0x1150   :  { %v3631_v53 = vmul.f32 %v6074_v40, %v3617_v11  ;;  %v5446_v24 = vpop.f32.mrb[63].mxu1  ;;  %v3401_v23 = vsel %vm1664_vm0, %v7336_v49, -inf }
0x1151   :  { %3402 = vmax.xlane.f32.xlu0 %v3401_v23 }
0x1152   :  { %v7340_v47 = vadd.f32 %v6075_v26, %v3631_v53 }
0x1153   :  { %v3622_v6 = vpop.f32.mrb[64].mxu1 }
0x1154   :  { %v3632_v30 = vmul.f32 %v6076_v41, %v3622_v6  ;;  %v5449_v27 = vpop.f32.mrb[65].mxu1  ;;  %v3637_v7 = vsel %vm1657_vm15, %v7340_v47, -inf }
0x1155   :  { %3638 = vmax.xlane.f32.xlu1 %v3637_v7 }
0x1156   :  { %v7344_v25 = vadd.f32 %v6077_v35, %v3632_v30 }
0x1157   :  { %v3627_v14 = vpop.f32.mrb[66].mxu1 }
0x1158   :  { %v3633_v28 = vmul.f32 %v6078_v57, %v3627_v14  ;;  %v5452_v12 = vpop.f32.mrb[67].mxu1  ;;  %v3640_v22 = vsel %vm1657_vm15, %v7344_v25, -inf }
0x1159   :  { %3641 = vmax.xlane.f32.xlu0 %v3640_v22 }
0x115a   :  { %v7348_v16 = vadd.f32 %v6079_v4, %v3633_v28 }
0x115b   :  { %v3859_v0 = vpop.f32.mrb[68].mxu1 }
0x115c   :  { %v3873_v10 = vmul.f32 %v6074_v40, %v3859_v0  ;;  %v5476_v63 = vpop.f32.mrb[69].mxu1  ;;  %v3643_v18 = vsel %vm1664_vm0, %v7348_v16, -inf }
0x115d   :  { %3644 = vmax.xlane.f32.xlu1 %v3643_v18 }
0x115e   :  { %v7352_v31 = vadd.f32 %v6075_v26, %v3873_v10 }
0x115f   :  { %v3864_v8 = vpop.f32.mrb[70].mxu1 }
0x1160   :  { %v3874_v21 = vmul.f32 %v6076_v41, %v3864_v8  ;;  %v5479_v51 = vpop.f32.mrb[71].mxu1  ;;  %v3879_v32 = vsel %vm1657_vm15, %v7352_v31, -inf }
0x1161   :  { %3880 = vmax.xlane.f32.xlu0 %v3879_v32 }
0x1162   :  { %v7356_v44 = vadd.f32 %v6077_v35, %v3874_v21 }
0x1163   :  { %v3869_v34 = vpop.f32.mrb[72].mxu1 }
0x1164   :  { %v3875_v50 = vmul.f32 %v6078_v57, %v3869_v34  ;;  %v5482_v39 = vpop.f32.mrb[73].mxu1  ;;  %v3882_v40 = vsel %vm1657_vm15, %v7356_v44, -inf }
0x1165   :  { %3883 = vmax.xlane.f32.xlu1 %v3882_v40 }
0x1166   :  { %v7360_v54 = vadd.f32 %v6079_v4, %v3875_v50 }
0x1168   :  { %v3885_v26 = vsel %vm1664_vm0, %v7360_v54, -inf }
0x1169   :  { %3886 = vmax.xlane.f32.xlu0 %v3885_v26 }
0x1176   :  { %3190 = vrot.lane.b32.xlu1 %v7213_v3, %s6096_s15 }
0x117a   :  { %5938 = vrot.lane.b32.xlu1 %v7209_v36, %s6097_s27 }
0x117f   :  { %5933 = vrot.lane.b32.xlu0 %v7209_v36, %s6096_s15 }
0x11c8   :  { %v3155_v41 = vpop.xlane.xlu0 %3154 }
0x11c9   :  { %v3162_v35 = vsub.f32 %v7304_v43, %v3155_v41 }
0x11cb   :  { %v3165_v48 = vmul.f32 1.442695, %v3162_v35 }
0x11cc   :  { %v3158_v56 = vpop.xlane.xlu1 %3157 }
0x11cd   :  { %6018 = vpow2.f32 %v3165_v48  ;;  %v3163_v57 = vsub.f32 %v7314_v52, %v3158_v56 }
0x11cf   :  { %v3167_v4 = vmul.f32 1.442695, %v3163_v57 }
0x11d6   :  { %v3397_v37 = vpop.xlane.xlu0 %3396 }
0x11d7   :  { %v7372_v59 = vpop.eup %6018  ;;  %v3404_v61 = vsub.f32 %v7321_v9, %v3397_v37 }
0x11d8   :  { %v3171_v2 = vsel %vm1657_vm15, %v7372_v59, 0.0 }
0x11d9   :  { %v3407_v15 = vmul.f32 1.442695, %v3404_v61  ;;  %3172 = vadd.xlane.f32.xlu1 %v3171_v2 }
0x11da   :  { %v3161_v17 = vpop.xlane.xlu0 %3160  ;;  %v3400_v46 = vpop.xlane.xlu1 %3399 }
0x11db   :  { %6020 = vpow2.f32 %v3407_v15  ;;  %v3164_v43 = vsub.f32 %v7326_v60, %v3161_v17  ;;  %v3405_v5 = vsub.f32 %v7330_v20, %v3400_v46 }
0x11dc   :  { %6022 = vpow2.f32 %v3167_v4 }
0x11dd   :  { %v3409_v52 = vmul.f32 1.442695, %v3405_v5  ;;  %v3169_v45 = vmul.f32 1.442695, %v3164_v43 }
0x11de   :  { %v3403_v55 = vpop.xlane.xlu0 %3402 }
0x11df   :  { %v3406_v13 = vsub.f32 %v7336_v49, %v3403_v55  ;;  %6024 = vpow2.f32 %v3409_v52 }
0x11e0   :  { %6026 = vpow2.f32 %v3169_v45 }
0x11e1   :  { %v3411_v9 = vmul.f32 1.442695, %v3406_v13 }
0x11e2   :  { %v3639_v42 = vpop.xlane.xlu1 %3638 }
0x11e3   :  { %v3646_v11 = vsub.f32 %v7340_v47, %v3639_v42  ;;  %6028 = vpow2.f32 %v3411_v9 }
0x11e5   :  { %v7381_v53 = vpop.eup %6020  ;;  %v3649_v24 = vmul.f32 1.442695, %v3646_v11 }
0x11e6   :  { %v3642_v23 = vpop.xlane.xlu0 %3641  ;;  %v3413_v60 = vsel %vm1657_vm15, %v7381_v53, 0.0  ;;  %v7385_v20 = vpop.eup %6022 }
0x11e7   :  { %v3647_v6 = vsub.f32 %v7344_v25, %v3642_v23  ;;  %3414 = vadd.xlane.f32.xlu0 %v3413_v60  ;;  %6030 = vpow2.f32 %v3649_v24  ;;  %v3174_v47 = vsel %vm1657_vm15, %v7385_v20, 0.0 }
0x11e9   :  { %v3651_v49 = vmul.f32 1.442695, %v3647_v6  ;;  %v7388_v30 = vpop.eup %6024 }
0x11ea   :  { %v3645_v27 = vpop.xlane.xlu1 %3644  ;;  %v3416_v14 = vsel %vm1657_vm15, %v7388_v30, 0.0  ;;  %v7395_v28 = vpop.eup %6026 }
0x11eb   :  { %6032 = vpow2.f32 %v3651_v49  ;;  %v3648_v7 = vsub.f32 %v7348_v16, %v3645_v27  ;;  %3175 = vadd.xlane.f32.xlu0 %v3174_v47  ;;  %3417 = vadd.xlane.f32.xlu1 %v3416_v14  ;;  %v3177_v0 = vsel %vm1664_vm0, %v7395_v28, 0.0 }
0x11ed   :  { %v3653_v25 = vmul.f32 1.442695, %v3648_v7  ;;  %v7400_v10 = vpop.eup %6028 }
0x11ee   :  { %v3881_v12 = vpop.xlane.xlu0 %3880  ;;  %v3419_v16 = vsel %vm1664_vm0, %v7400_v10, 0.0 }
0x11ef   :  { %6034 = vpow2.f32 %v3653_v25  ;;  %v3888_v22 = vsub.f32 %v7352_v31, %v3881_v12  ;;  %3178 = vadd.xlane.f32.xlu1 %v3177_v0 }
0x11f1   :  { %v3891_v63 = vmul.f32 1.442695, %v3888_v22  ;;  %v7404_v18 = vpop.eup %6030 }
0x11f2   :  { %v3655_v51 = vsel %vm1657_vm15, %v7404_v18, 0.0  ;;  %v3884_v41 = vpop.xlane.xlu1 %3883 }
0x11f3   :  { %6036 = vpow2.f32 %v3891_v63  ;;  %3420 = vadd.xlane.f32.xlu1 %v3419_v16  ;;  %v3889_v57 = vsub.f32 %v7356_v44, %v3884_v41 }
0x11f5   :  { %v7406_v8 = vpop.eup %6032  ;;  %v3893_v61 = vmul.f32 1.442695, %v3889_v57 }
0x11f6   :  { %v3887_v21 = vpop.xlane.xlu0 %3886  ;;  %v3658_v31 = vsel %vm1657_vm15, %v7406_v8, 0.0  ;;  %v3191_v56 = vpop.permute.xlu1 %3190 }
0x11f7   :  { %3659 = vadd.xlane.f32.xlu0 %v3658_v31  ;;  %3656 = vadd.xlane.f32.xlu1 %v3655_v51  ;;  %v3890_v37 = vsub.f32 %v7360_v54, %v3887_v21  ;;  %6038 = vpow2.f32 %v3893_v61 }
0x11f9   :  { %v7412_v32 = vpop.eup %6034  ;;  %v3895_v2 = vmul.f32 1.442695, %v3890_v37 }
0x11fa   :  { %v5934_v34 = vpop.permute.xlu0 %5933  ;;  %v3661_v50 = vsel %vm1664_vm0, %v7412_v32, 0.0  ;;  %v5939_v44 = vpop.permute.xlu1 %5938 }
0x11fb   :  { %v5936_v39 = vunpack.i.h.bf16 %v5934_v34  ;;  %v5935_v40 = vunpack.i.l.bf16 %v5934_v34  ;;  %3662 = vadd.xlane.f32.xlu1 %v3661_v50  ;;  %6040 = vpow2.f32 %v3895_v2  ;;  %v5941_v43 = vunpack.i.h.bf16 %v5939_v44 }
0x11fc   :  { %v5940_v5 = vunpack.i.l.bf16 %v5939_v44 }
0x11fd   :  { %v7416_v26 = vpop.eup %6036  ;;  %v5745_v35 = vpack.c.bf16 %v5936_v39, %v5935_v40 }
0x11fe   :  { %v3897_v48 = vsel %vm1657_vm15, %v7416_v26, 0.0  ;;  %v5752_v55 = vpack.c.bf16 %v5941_v43, %v5940_v5 }
0x11ff   :  { %3898 = vadd.xlane.f32.xlu0 %v3897_v48  ;;  %5746 = vmatpush3.bf16.msra.mxu0 %v5745_v35 }
0x1200   :  { %5397 = vmatprep.subr.mxu0 %v6089_v62 }
0x1201   :  { %v7429_v4 = vpop.eup %6038 }
0x1202   :  { %v3900_v17 = vsel %vm1657_vm15, %v7429_v4, 0.0 }
0x1203   :  { %5398 = vmatpush3.msk.msra.mxu0 %vm1709_vm14, %v3191_v56 }
0x1204   :  { %5751 = vmatprep.subr.bf16.mxu0 %v6087_v58 }
0x1205   :  { %v7431_v15 = vpop.eup %6040 }
0x1206   :  { %v3903_v46 = vsel %vm1664_vm0, %v7431_v15, 0.0 }
0x120c   :  { %5943 = vrot.lane.b32.xlu1 %v7209_v36, %s6098_s29 }
0x1215   :  { %3432 = vrot.lane.b32.xlu0 %v7213_v3, %s6097_s27 }
0x1230   :  { %3901 = vadd.xlane.f32.xlu1 %v3900_v17 }
0x1234   :  { %3904 = vadd.xlane.f32.xlu0 %v3903_v46 }
0x1241   :  { %3674 = vrot.lane.b32.xlu1 %v7213_v3, %s6098_s29 }
0x1245   :  { %5948 = vrot.lane.b32.xlu1 %v7209_v36, %s6099_s30 }
0x1249   :  { %3916 = vrot.lane.b32.xlu1 %v7213_v3, %s6099_s30 }
0x1266   :  { %v3173_v54 = vpop.xlane.xlu1 %3172 }
0x1267   :  { %6042 = vrcp.f32 %v3173_v54 }
0x1271   :  { %v6043_v52 = vpop.eup %6042 }
0x1272   :  { %v3181_v45 = vmul.f32 %v6043_v52, %v7372_v59 }
0x1274   :  { %v3415_v13 = vpop.xlane.xlu0 %3414  ;;  %5400 = vmatmul.mubr.msk.f32.vlgmr.msra.gmra.mrb[62].mxu0 %vm1657_vm15, %v3181_v45 }
0x1275   :  { %5753 = vmatpush3.bf16.msra.mxu0 %v5752_v55  ;;  %5402 = vmatprep.mubr.msk.f32.mxu0 %vm6088_vm9, %v6089_v62  ;;  %v4059_v55 = vld [vmem:[%s7718_s1 + $0x110] sm:$0xff] }
0x1276   :  { %5427 = vmatprep.subr.mxu0 %v6089_v62 }
0x1278   :  { %v3176_v36 = vpop.xlane.xlu0 %3175  ;;  %v3418_v3 = vpop.xlane.xlu1 %3417 }
0x1279   :  { %6044 = vrcp.f32 %v3176_v36 }
0x127c   :  { %v3179_v9 = vpop.xlane.xlu1 %3178 }
0x127d   :  { %6046 = vrcp.f32 %v3179_v9 }
0x127e   :  { %6048 = vrcp.f32 %v3415_v13  ;;  %v4060_v13 = vld [vmem:[%s7718_s1 + $0x118] sm:$0xff] }
0x127f   :  { %6050 = vrcp.f32 %v3418_v3  ;;  %v5769_v36 = vpack.c.bf16 %v4060_v13, %v4059_v55 }
0x1280   :  { %v3421_v42 = vpop.xlane.xlu1 %3420 }
0x1281   :  { %6052 = vrcp.f32 %v3421_v42  ;;  %5770 = vmatpush3.bf16.msra.mxu1 %v5769_v36  ;;  %v4061_v42 = vld [vmem:[%s7718_s1 + $0x120] sm:$0xff] }
0x1282   :  { %5771 = vmatprep.subr.bf16.mxu1 %v6087_v58 }
0x1283   :  { %v6045_v11 = vpop.eup %6044 }
0x1284   :  { %v3183_v59 = vmul.f32 %v6045_v11, %v7385_v20  ;;  %v3657_v24 = vpop.xlane.xlu1 %3656  ;;  %v3660_v60 = vpop.xlane.xlu0 %3659  ;;  %v4062_v11 = vld [vmem:[%s7718_s1 + $0x128] sm:$0xff] }
0x1285   :  { %6054 = vrcp.f32 %v3657_v24 }
0x1286   :  { %5403 = vmatmul.mubr.msk.f32.gmra.mrb[64].mxu0 %vm1657_vm15, %v3183_v59  ;;  %6056 = vrcp.f32 %v3660_v60  ;;  %v5772_v59 = vpack.c.bf16 %v4062_v11, %v4061_v42 }
0x1287   :  { %5405 = vmatprep.mubr.msk.f32.mxu0 %vm6088_vm9, %v6089_v62  ;;  %v6047_v23 = vpop.eup %6046 }
0x1288   :  { %v3663_v6 = vpop.xlane.xlu1 %3662  ;;  %v3185_v49 = vmul.f32 %v6047_v23, %v7395_v28  ;;  %v6049_v20 = vpop.eup %6048  ;;  %5773 = vmatpush3.bf16.msra.mxu1 %v5772_v59 }
0x1289   :  { %v3423_v25 = vmul.f32 %v6049_v20, %v7381_v53  ;;  %v6051_v22 = vpop.eup %6050  ;;  %6058 = vrcp.f32 %v3663_v6  ;;  %5780 = vmatprep.subr.bf16.mxu1 %v6087_v58 }
0x128a   :  { %5406 = vmatmul.mubr.msk.f32.gmra.mrb[66].mxu0 %vm1657_vm15, %v3185_v49  ;;  %v3425_v28 = vmul.f32 %v6051_v22, %v7388_v30 }
0x128b   :  { %5429 = vmatprep.mubr.msk.f32.mxu0 %vm6088_vm9, %v6089_v62  ;;  %v6053_v63 = vpop.eup %6052 }
0x128c   :  { %v3899_v27 = vpop.xlane.xlu0 %3898  ;;  %v5944_v47 = vpop.permute.xlu1 %5943  ;;  %v3427_v53 = vmul.f32 %v6053_v63, %v7400_v10 }
0x128d   :  { %v5946_v7 = vunpack.i.h.bf16 %v5944_v47  ;;  %v5945_v14 = vunpack.i.l.bf16 %v5944_v47  ;;  %6060 = vrcp.f32 %v3899_v27 }
0x128f   :  { %v5759_v0 = vpack.c.bf16 %v5946_v7, %v5945_v14  ;;  %v6055_v30 = vpop.eup %6054 }
0x1290   :  { %v3433_v12 = vpop.permute.xlu0 %3432  ;;  %v3665_v21 = vmul.f32 %v6055_v30, %v7404_v18  ;;  %v6057_v51 = vpop.eup %6056 }
0x1291   :  { %5428 = vmatpush3.msk.msra.mxu0 %vm1709_vm14, %v3433_v12  ;;  %v3667_v50 = vmul.f32 %v6057_v51, %v7406_v8 }
0x1292   :  { %5430 = vmatmul.mubr.msk.f32.vlgmr.msra.gmra.mrb[68].mxu0 %vm1657_vm15, %v3423_v25  ;;  %5758 = vmatprep.subr.bf16.mxu0 %v6087_v58 }
0x1293   :  { %5760 = vmatpush3.bf16.msra.mxu0 %v5759_v0  ;;  %5432 = vmatprep.mubr.msk.f32.mxu0 %vm6088_vm9, %v6089_v62  ;;  %v6059_v39 = vpop.eup %6058 }
0x1294   :  { %5457 = vmatprep.subr.mxu0 %v6089_v62  ;;  %v3669_v35 = vmul.f32 %v6059_v39, %v7412_v32 }
0x1296   :  { %5433 = vmatmul.mubr.msk.f32.gmra.mrb[70].mxu0 %vm1657_vm15, %v3425_v28 }
0x1297   :  { %5435 = vmatprep.mubr.msk.f32.mxu0 %vm6088_vm9, %v6089_v62  ;;  %v6061_v48 = vpop.eup %6060 }
0x1298   :  { %v3907_v8 = vmul.f32 %v6061_v48, %v7416_v26 }
0x129a   :  { %5436 = vmatmul.mubr.msk.f32.gmra.mrb[72].mxu0 %vm1657_vm15, %v3427_v53 }
0x129b   :  { %5459 = vmatprep.mubr.msk.f32.mxu0 %vm6088_vm9, %v6089_v62 }
0x12bd   :  { %v3902_v16 = vpop.xlane.xlu1 %3901 }
0x12be   :  { %6062 = vrcp.f32 %v3902_v16 }
0x12c1   :  { %v3675_v31 = vpop.permute.xlu1 %3674  ;;  %v3905_v10 = vpop.xlane.xlu0 %3904 }
0x12c2   :  { %5458 = vmatpush3.msk.msra.mxu0 %vm1709_vm14, %v3675_v31  ;;  %6064 = vrcp.f32 %v3905_v10  ;;  %v6080_v31 = vld [vmem:[%s7722_s4 + $0x30] sm:$0xff] }
0x12c3   :  { %5460 = vmatmul.mubr.msk.f32.vlgmr.msra.gmra.mrb[74].mxu0 %vm1657_vm15, %v3665_v21  ;;  %5765 = vmatprep.subr.bf16.mxu0 %v6087_v58 }
0x12c4   :  { %5462 = vmatprep.mubr.msk.f32.mxu0 %vm6088_vm9, %v6089_v62 }
0x12c5   :  { %v5949_v34 = vpop.permute.xlu1 %5948 }
0x12c6   :  { %v5951_v40 = vunpack.i.h.bf16 %v5949_v34  ;;  %v5950_v41 = vunpack.i.l.bf16 %v5949_v34 }
0x12c7   :  { %5463 = vmatmul.mubr.msk.f32.gmra.mrb[76].mxu0 %vm1657_vm15, %v3667_v50 }
0x12c8   :  { %v5766_v18 = vpack.c.bf16 %v5951_v40, %v5950_v41  ;;  %5465 = vmatprep.mubr.msk.f32.mxu0 %vm6088_vm9, %v6089_v62  ;;  %v6063_v57 = vpop.eup %6062  ;;  %v6081_v40 = vld [vmem:[%s7722_s4 + $0x38] sm:$0xff] }
0x12c9   :  { %v3917_v56 = vpop.permute.xlu1 %3916  ;;  %v3909_v32 = vmul.f32 %v6063_v57, %v7429_v4 }
0x12ca   :  { %5767 = vmatpush3.bf16.msra.mxu0 %v5766_v18 }
0x12cb   :  { %5466 = vmatmul.mubr.msk.f32.gmra.mrb[78].mxu0 %vm1657_vm15, %v3669_v35  ;;  %5487 = vmatprep.subr.mxu0 %v6089_v62 }
0x12cc   :  { %5489 = vmatprep.mubr.msk.f32.mxu0 %vm6088_vm9, %v6089_v62  ;;  %v6065_v37 = vpop.eup %6064 }
0x12cd   :  { %v3911_v26 = vmul.f32 %v6065_v37, %v7431_v15  ;;  %v7554_v37 = vld [vmem:[%s7718_s1 + $0x230] sm:$0xff] }
0x12ce   :  { %5488 = vmatpush3.msk.msra.mxu0 %vm1709_vm14, %v3917_v56  ;;  %v6082_v56 = vld [vmem:[%s7722_s4 + $0x40] sm:$0x3] }
0x12cf   :  { %5490 = vmatmul.mubr.msk.f32.vlgmr.msra.gmra.mrb[80].mxu0 %vm1657_vm15, %v3907_v8  ;;  %5774 = vmatprep.subr.bf16.mxu0 %v6087_v58 }
0x12d0   :  { %5492 = vmatprep.mubr.msk.f32.mxu0 %vm6088_vm9, %v6089_v62 }
0x12d3   :  { %5493 = vmatmul.mubr.msk.f32.gmra.mrb[82].mxu0 %vm1657_vm15, %v3909_v32  ;;  %v4065_v32 = vsub.s32 4, %v6245_v29 }
0x12d4   :  { %5495 = vmatprep.mubr.msk.f32.mxu0 %vm6088_vm9, %v6089_v62 }
0x12d7   :  { %5496 = vmatmul.mubr.msk.f32.gmra.mrb[84].mxu0 %vm1657_vm15, %v3911_v26  ;;  %v4066_v26 = vrot.slane %v7554_v37, %v4065_v32 }
0x12d8   :  { %5523 = vmatprep.mubr.msk.f32.mxu0 %vm6088_vm9, %v6089_v62 }
0x1347   :  { %v3271_v61 = vpop.f32.mrb[62].mxu0 }
0x1348   :  { %v5401_v2 = vpop.f32.mrb[63].mxu0 }
0x1359   :  { %v3276_v17 = vpop.f32.mrb[64].mxu0 }
0x135a   :  { %v5404_v46 = vpop.f32.mrb[65].mxu0 }
0x135d   :  { %v3281_v44 = vpop.f32.mrb[66].mxu0 }
0x135e   :  { %v5407_v54 = vpop.f32.mrb[67].mxu0 }
0x1365   :  { %v3513_v4 = vpop.f32.mrb[68].mxu0 }
0x1366   :  { %4014 = vrot.lane.b32.xlu1 %v3513_v4, %s6100_s6  ;;  %v5431_v43 = vpop.f32.mrb[69].mxu0 }
0x1369   :  { %v3518_v5 = vpop.f32.mrb[70].mxu0 }
0x136a   :  { %4016 = vrot.lane.b32.xlu0 %v3518_v5, %s6100_s6  ;;  %v5434_v52 = vpop.f32.mrb[71].mxu0 }
0x136d   :  { %v3523_v15 = vpop.f32.mrb[72].mxu0 }
0x136e   :  { %4018 = vrot.lane.b32.xlu1 %v3523_v15, %s6100_s6  ;;  %v5437_v45 = vpop.f32.mrb[73].mxu0 }
0x1396   :  { %v3755_v3 = vpop.f32.mrb[74].mxu0 }
0x1397   :  { %4026 = vrot.lane.b32.xlu1 %v3755_v3, %s6101_s17  ;;  %v5461_v9 = vpop.f32.mrb[75].mxu0 }
0x139a   :  { %v3760_v24 = vpop.f32.mrb[76].mxu0 }
0x139b   :  { %4028 = vrot.lane.b32.xlu1 %v3760_v24, %s6101_s17  ;;  %v5464_v23 = vpop.f32.mrb[77].mxu0 }
0x139e   :  { %v3765_v60 = vpop.f32.mrb[78].mxu0 }
0x139f   :  { %4030 = vrot.lane.b32.xlu1 %v3765_v60, %s6101_s17  ;;  %v5467_v6 = vpop.f32.mrb[79].mxu0 }
0x13a2   :  { %v3997_v49 = vpop.f32.mrb[80].mxu0 }
0x13a3   :  { %4038 = vrot.lane.b32.xlu1 %v3997_v49, %s6102_s22  ;;  %v5491_v27 = vpop.f32.mrb[81].mxu0 }
0x13a6   :  { %v4002_v20 = vpop.f32.mrb[82].mxu0 }
0x13a7   :  { %4040 = vrot.lane.b32.xlu1 %v4002_v20, %s6102_s22  ;;  %v5494_v47 = vpop.f32.mrb[83].mxu0 }
0x13a8   :  { %v4198_v47 = vld [vmem:[%s7721_s2 + $0x60] sm:$0xff] }
0x13aa   :  { %v4007_v7 = vpop.f32.mrb[84].mxu0 }
0x13ab   :  { %4042 = vrot.lane.b32.xlu1 %v4007_v7, %s6102_s22  ;;  %v5497_v14 = vpop.f32.mrb[85].mxu0  ;;  %v4199_v7 = vld [vmem:[%s7721_s2 + $0x68] sm:$0xff] }
0x13ac   :  { %v5775_v14 = vpack.c.bf16 %v4199_v7, %v4198_v47 }
0x13ae   :  { %5776 = vmatpush3.bf16.msra.mxu0 %v5775_v14 }
0x13af   :  { %5777 = vmatprep.subr.bf16.mxu0 %v6087_v58 }
0x13d8   :  { %v4015_v25 = vpop.permute.xlu1 %4014 }
0x13d9   :  { %v4047_v63 = vsel %vm1558_vm12, %v3271_v61, %v4015_v25  ;;  %v4200_v25 = vld [vmem:[%s7721_s2 + $0x70] sm:$0xff] }
0x13dc   :  { %v4017_v53 = vpop.permute.xlu0 %4016 }
0x13dd   :  { %v4048_v10 = vsel %vm1558_vm12, %v3276_v17, %v4017_v53 }
0x13e0   :  { %v4019_v12 = vpop.permute.xlu1 %4018 }
0x13e1   :  { %v4049_v18 = vsel %vm1558_vm12, %v3281_v44, %v4019_v12  ;;  %v4201_v12 = vld [vmem:[%s7721_s2 + $0x78] sm:$0xff] }
0x1409   :  { %v4027_v22 = vpop.permute.xlu1 %4026 }
0x140a   :  { %v4050_v16 = vsel %vm2557_vm1, %v4047_v63, %v4027_v22  ;;  %v5778_v22 = vpack.c.bf16 %v4201_v12, %v4200_v25  ;;  %v4300_v63 = vld [vmem:[%s7718_s1 + $0x1c0] sm:$0xff] }
0x140c   :  { %5779 = vmatpush3.bf16.msra.mxu0 %v5778_v22  ;;  %v4403_v22 = vld [vmem:[%s7721_s2 + $0x90] sm:$0xff] }
0x140d   :  { %v4029_v0 = vpop.permute.xlu1 %4028  ;;  %5804 = vmatprep.subr.bf16.mxu0 %v6087_v58 }
0x140e   :  { %v4051_v34 = vsel %vm2557_vm1, %v4048_v10, %v4029_v0  ;;  %v4298_v0 = vld [vmem:[%s7718_s1 + $0x1b0] sm:$0xff]  ;;  %v4304_v10 = vld [vmem:[%s7718_s1 + $0x1e0] sm:$0xff] }
0x1411   :  { %v4031_v28 = vpop.permute.xlu1 %4030 }
0x1412   :  { %v4052_v35 = vsel %vm2557_vm1, %v4049_v18, %v4031_v28  ;;  %v4299_v28 = vld [vmem:[%s7718_s1 + $0x1b8] sm:$0xff]  ;;  %v4308_v18 = vld [vmem:[%s7718_s1 + $0x200] sm:$0xff] }
0x1413   :  { %v5781_v53 = vpack.c.bf16 %v4299_v28, %v4298_v0  ;;  %v4404_v0 = vld [vmem:[%s7721_s2 + $0x98] sm:$0xff] }
0x1414   :  { %v5808_v28 = vpack.c.bf16 %v4404_v0, %v4403_v22 }
0x1415   :  { %v4039_v30 = vpop.permute.xlu1 %4038 }
0x1416   :  { %v4053_v21 = vsel %vm2561_vm2, %v4050_v16, %v4039_v30  ;;  %v4301_v16 = vld [vmem:[%s7718_s1 + $0x1c8] sm:$0xff] }
0x1417   :  { %v4056_v51 = vmul.f32 %v6080_v31, %v4053_v21  ;;  %v5784_v30 = vpack.c.bf16 %v4301_v16, %v4300_v63  ;;  %v4302_v21 = vld [vmem:[%s7718_s1 + $0x1d0] sm:$0xff]  ;;  %v4303_v31 = vld [vmem:[%s7718_s1 + $0x1d8] sm:$0xff]  ;;  %v4316_v63 = vsub.s32 5, %v6245_v29 }
0x1419   :  { %5507 = vmatmul.mubr.msk.f32.vlgmr.msra.gmra.mrb[74].mxu1 %vm278_vm4, %v4056_v51  ;;  %v4041_v50 = vpop.permute.xlu1 %4040  ;;  %v5787_v51 = vpack.c.bf16 %v4303_v31, %v4302_v21 }
0x141a   :  { %v4054_v39 = vsel %vm2561_vm2, %v4051_v34, %v4041_v50  ;;  %5509 = vmatprep.mubr.msk.f32.mxu1 %vm6088_vm9, %v6089_v62  ;;  %5782 = vmatpush3.bf16.msra.mxu1 %v5781_v53  ;;  %v4305_v34 = vld [vmem:[%s7718_s1 + $0x1e8] sm:$0xff]  ;;  %v4317_v53 = vrot.slane %v7554_v37, %v4316_v63 }
0x141b   :  { %v4057_v41 = vmul.f32 %v6081_v40, %v4054_v39  ;;  %5783 = vmatprep.subr.bf16.mxu1 %v6087_v58  ;;  %v5790_v50 = vpack.c.bf16 %v4305_v34, %v4304_v10  ;;  %v4306_v39 = vld [vmem:[%s7718_s1 + $0x1f0] sm:$0xff]  ;;  %v4307_v40 = vld [vmem:[%s7718_s1 + $0x1f8] sm:$0xff] }
0x141d   :  { %5510 = vmatmul.mubr.msk.f32.gmra.mrb[76].mxu1 %vm278_vm4, %v4057_v41  ;;  %v4043_v48 = vpop.permute.xlu1 %4042  ;;  %v5793_v41 = vpack.c.bf16 %v4307_v40, %v4306_v39 }
0x141e   :  { %v4055_v8 = vsel %vm2561_vm2, %v4052_v35, %v4043_v48  ;;  %5512 = vmatprep.mubr.msk.f32.mxu1 %vm6088_vm9, %v6089_v62  ;;  %5785 = vmatpush3.bf16.msra.mxu1 %v5784_v30  ;;  %v4309_v35 = vld [vmem:[%s7718_s1 + $0x208] sm:$0xff] }
0x141f   :  { %v4058_v57 = vmul.f32 %v6082_v56, %v4055_v8  ;;  %5786 = vmatprep.subr.bf16.mxu1 %v6087_v58  ;;  %v5796_v48 = vpack.c.bf16 %v4309_v35, %v4308_v18  ;;  %v4310_v8 = vld [vmem:[%s7718_s1 + $0x210] sm:$0xff]  ;;  %v4311_v56 = vld [vmem:[%s7718_s1 + $0x218] sm:$0xff] }
0x1421   :  { %5513 = vmatmul.mubr.msk.f32.gmra.mrb[78].mxu1 %vm278_vm4, %v4058_v57  ;;  %v5799_v57 = vpack.c.bf16 %v4311_v56, %v4310_v8 }
0x1422   :  { %5564 = vmatprep.mubr.msk.f32.mxu1 %vm6088_vm9, %v6089_v62  ;;  %5788 = vmatpush3.bf16.msra.mxu1 %v5787_v51 }
0x1423   :  { %5789 = vmatprep.subr.bf16.mxu1 %v6087_v58 }
0x1426   :  { %5791 = vmatpush3.bf16.msra.mxu1 %v5790_v50 }
0x1427   :  { %5792 = vmatprep.subr.bf16.mxu1 %v6087_v58 }
0x142a   :  { %5794 = vmatpush3.bf16.msra.mxu1 %v5793_v41 }
0x142b   :  { %5795 = vmatprep.subr.bf16.mxu1 %v6087_v58 }
0x142e   :  { %5797 = vmatpush3.bf16.msra.mxu1 %v5796_v48 }
0x142f   :  { %5798 = vmatprep.subr.bf16.mxu1 %v6087_v58 }
0x1432   :  { %5800 = vmatpush3.bf16.msra.mxu1 %v5799_v57 }
0x1433   :  { %5801 = vmatprep.subr.bf16.mxu1 %v6087_v58 }
0x14ec   :  { %v4142_v61 = vpop.f32.mrb[74].mxu1 }
0x14ed   :  { %v4143_v2 = vadd.f32 %v4142_v61, %v4066_v26  ;;  %v5508_v17 = vpop.f32.mrb[75].mxu1 }
0x14ef   :  { %v7560_v46 = vadd.f32 %v4143_v2, %v7163_v38 }
0x14f0   :  { %v4147_v44 = vpop.f32.mrb[76].mxu1 }
0x14f1   :  { %v4148_v54 = vadd.f32 %v4147_v44, %v4066_v26  ;;  %v5511_v4 = vpop.f32.mrb[77].mxu1  ;;  %v4159_v43 = vsel %vm278_vm4, %v7560_v46, 0.0 }
0x14f2   :  { %4160 = vadd.xlane.f32.xlu0 %v4159_v43 }
0x14f3   :  { %v7565_v5 = vadd.f32 %v4148_v54, %v7168_v19 }
0x14f4   :  { %v4152_v52 = vpop.f32.mrb[78].mxu1 }
0x14f5   :  { %v4153_v15 = vadd.f32 %v4152_v52, %v4066_v26  ;;  %v5514_v45 = vpop.f32.mrb[79].mxu1  ;;  %v4162_v55 = vsel %vm278_vm4, %v7565_v5, 0.0 }
0x14f6   :  { %4163 = vadd.xlane.f32.xlu1 %v4162_v55 }
0x14f7   :  { %v7570_v38 = vadd.f32 %v4153_v15, %v7173_v33 }
0x14f9   :  { %v4165_v13 = vsel %vm1417_vm11, %v7570_v38, 0.0 }
0x14fa   :  { %4166 = vadd.xlane.f32.xlu0 %v4165_v13 }
0x157f   :  { %v4161_v36 = vpop.xlane.xlu0 %4160 }
0x1580   :  { %v4168_v3 = vmul.f32 0.03125, %v4161_v36 }
0x1582   :  { %v7575_v9 = vsub.f32 %v7560_v46, %v4168_v3 }
0x1583   :  { %v4164_v19 = vpop.xlane.xlu1 %4163 }
0x1584   :  { %v4169_v42 = vmul.f32 0.03125, %v4164_v19  ;;  %v4174_v11 = vmul.f32 %v7575_v9, %v7575_v9  ;;  %v4313_v19 = vld [vmem:[%s7718_s1 + $0x228] sm:$0xff] }
0x1586   :  { %v7580_v59 = vsub.f32 %v7565_v5, %v4169_v42  ;;  %v4177_v33 = vsel %vm278_vm4, %v4174_v11, 0.0  ;;  %v4401_v11 = vld [vmem:[%s7721_s2 + $0x80] sm:$0xff] }
0x1587   :  { %4178 = vadd.xlane.f32.xlu0 %v4177_v33  ;;  %v4167_v24 = vpop.xlane.xlu0 %4166 }
0x1588   :  { %v4170_v23 = vmul.f32 0.03125, %v4167_v24  ;;  %v4175_v60 = vmul.f32 %v7580_v59, %v7580_v59  ;;  %v6084_v24 = vld [vmem:[%s7721_s2 + $0xa0] sm:$0xff] }
0x158a   :  { %v7586_v6 = vsub.f32 %v7570_v38, %v4170_v23  ;;  %v4180_v49 = vsel %vm278_vm4, %v4175_v60, 0.0  ;;  %v4205_v23 = vrot.slane %v6084_v24, %v2825_v1 }
0x158b   :  { %4181 = vadd.xlane.f32.xlu1 %v4180_v49 }
0x158c   :  { %v4176_v27 = vmul.f32 %v7586_v6, %v7586_v6 }
0x158e   :  { %v4183_v20 = vsel %vm1417_vm11, %v4176_v27, 0.0 }
0x158f   :  { %4184 = vadd.xlane.f32.xlu0 %v4183_v20 }
0x1614   :  { %v4179_v26 = vpop.xlane.xlu0 %4178 }
0x1615   :  { %v4186_v61 = vmul.f32 0.03125, %v4179_v26 }
0x1617   :  { %v4189_v2 = vadd.f32 1e-05, %v4186_v61 }
0x1618   :  { %v4182_v17 = vpop.xlane.xlu1 %4181 }
0x1619   :  { %6066 = vrsqrt.f32 %v4189_v2  ;;  %v4187_v44 = vmul.f32 0.03125, %v4182_v17 }
0x161b   :  { %v4190_v54 = vadd.f32 1e-05, %v4187_v44 }
0x161c   :  { %v4185_v4 = vpop.xlane.xlu0 %4184 }
0x161d   :  { %6068 = vrsqrt.f32 %v4190_v54  ;;  %v4188_v43 = vmul.f32 0.03125, %v4185_v4 }
0x161f   :  { %v4191_v52 = vadd.f32 1e-05, %v4188_v43 }
0x1621   :  { %6070 = vrsqrt.f32 %v4191_v52 }
0x1623   :  { %v6067_v15 = vpop.eup %6066 }
0x1624   :  { %v4195_v45 = vmul.f32 %v6067_v15, %v7575_v9  ;;  %v4312_v9 = vld [vmem:[%s7718_s1 + $0x220] sm:$0xff] }
0x1625   :  { %v5802_v42 = vpack.c.bf16 %v4313_v19, %v4312_v9 }
0x1626   :  { %5524 = vmatmul.mubr.msk.f32.vlgmr.msra.gmra.mrb[86].mxu0 %vm278_vm4, %v4195_v45 }
0x1627   :  { %v6069_v55 = vpop.eup %6068  ;;  %5526 = vmatprep.mubr.msk.f32.mxu0 %vm6088_vm9, %v6089_v62  ;;  %5803 = vmatpush3.bf16.msra.mxu1 %v5802_v42 }
0x1628   :  { %v4196_v13 = vmul.f32 %v6069_v55, %v7580_v59  ;;  %v4402_v59 = vld [vmem:[%s7721_s2 + $0x88] sm:$0xff] }
0x1629   :  { %v5805_v33 = vpack.c.bf16 %v4402_v59, %v4401_v11 }
0x162a   :  { %5527 = vmatmul.mubr.msk.f32.gmra.mrb[88].mxu0 %vm278_vm4, %v4196_v13 }
0x162b   :  { %v6071_v36 = vpop.eup %6070  ;;  %5529 = vmatprep.mubr.msk.f32.mxu0 %vm6088_vm9, %v6089_v62  ;;  %5806 = vmatpush3.bf16.msra.mxu0 %v5805_v33 }
0x162c   :  { %v4197_v3 = vmul.f32 %v6071_v36, %v7586_v6  ;;  %5807 = vmatprep.subr.bf16.mxu0 %v6087_v58 }
0x162e   :  { %5530 = vmatmul.mubr.msk.f32.gmra.mrb[90].mxu0 %vm278_vm4, %v4197_v3 }
0x162f   :  { %5581 = vmatprep.mubr.msk.f32.mxu0 %vm6088_vm9, %v6089_v62  ;;  %5809 = vmatpush3.bf16.msra.mxu0 %v5808_v28 }
0x16f9   :  { %v4281_v60 = vpop.f32.mrb[86].mxu0 }
0x16fa   :  { %v4282_v6 = vadd.f32 %v4281_v60, %v4205_v23  ;;  %v5525_v49 = vpop.f32.mrb[87].mxu0 }
0x16fc   :  { %v4295_v27 = vmax.f32 %v4282_v6, 0.0 }
0x16fd   :  { %v4286_v20 = vpop.f32.mrb[88].mxu0 }
0x16fe   :  { %v4287_v47 = vadd.f32 %v4286_v20, %v4205_v23  ;;  %v5528_v7 = vpop.f32.mrb[89].mxu0  ;;  %5565 = vmatmul.mubr.f32.vlgmr.msra.gmra.mrb[80].mxu1 %v4295_v27 }
0x16ff   :  { %5567 = vmatprep.mubr.msk.f32.mxu1 %vm6088_vm9, %v6089_v62 }
0x1700   :  { %v4296_v14 = vmax.f32 %v4287_v47, 0.0 }
0x1701   :  { %v4291_v58 = vpop.f32.mrb[90].mxu0 }
0x1702   :  { %v4292_v25 = vadd.f32 %v4291_v58, %v4205_v23  ;;  %v5531_v12 = vpop.f32.mrb[91].mxu0  ;;  %5568 = vmatmul.mubr.f32.gmra.mrb[82].mxu1 %v4296_v14 }
0x1703   :  { %5570 = vmatprep.mubr.msk.f32.mxu1 %vm6088_vm9, %v6089_v62 }
0x1704   :  { %v4297_v1 = vmax.f32 %v4292_v25, 0.0 }
0x1706   :  { %5571 = vmatmul.mubr.f32.gmra.mrb[84].mxu1 %v4297_v1 }
0x17d1   :  { %v4384_v16 = vpop.f32.mrb[80].mxu1 }
0x17d2   :  { %v4385_v30 = vadd.f32 %v4384_v16, %v4317_v53  ;;  %v5566_v21 = vpop.f32.mrb[81].mxu1 }
0x17d4   :  { %v4398_v31 = vadd.f32 %v4385_v30, %v7560_v46  ;;  %v4408_v46 = vrot.slane %v6084_v24, %v4065_v32 }
0x17d5   :  { %v4389_v51 = vpop.f32.mrb[82].mxu1 }
0x17d6   :  { %v4390_v10 = vadd.f32 %v4389_v51, %v4317_v53  ;;  %v5569_v34 = vpop.f32.mrb[83].mxu1  ;;  %5582 = vmatmul.mubr.msk.f32.vlgmr.msra.gmra.mrb[92].mxu0 %vm278_vm4, %v4398_v31 }
0x17d7   :  { %5584 = vmatprep.mubr.msk.f32.mxu0 %vm6088_vm9, %v6089_v62 }
0x17d8   :  { %v4399_v50 = vadd.f32 %v4390_v10, %v7565_v5 }
0x17d9   :  { %v4394_v39 = vpop.f32.mrb[84].mxu1 }
0x17da   :  { %v4395_v40 = vadd.f32 %v4394_v39, %v4317_v53  ;;  %v5572_v41 = vpop.f32.mrb[85].mxu1  ;;  %5585 = vmatmul.mubr.msk.f32.gmra.mrb[94].mxu0 %vm278_vm4, %v4399_v50 }
0x17db   :  { %5587 = vmatprep.mubr.msk.f32.mxu0 %vm6088_vm9, %v6089_v62 }
0x17dc   :  { %v4400_v37 = vadd.f32 %v4395_v40, %v7570_v38 }
0x17de   :  { %5588 = vmatmul.mubr.msk.f32.gmra.mrb[96].mxu0 %vm278_vm4, %v4400_v37 }
0x18a9   :  { %v4484_v18 = vpop.f32.mrb[92].mxu0 }
0x18aa   :  { %v4485_v35 = vadd.f32 %v4484_v18, %v4408_v46  ;;  %v5583_v48 = vpop.f32.mrb[93].mxu0 }
0x18ac   :  { %4498 = vst [vmem:[%s7723_s5] sm:$0xff] %v4485_v35 }
0x18ad   :  { %v4489_v5 = vpop.f32.mrb[94].mxu0 }
0x18ae   :  { %v4490_v8 = vadd.f32 %v4489_v5, %v4408_v46  ;;  %v5586_v56 = vpop.f32.mrb[95].mxu0 }
0x18b0   :  { %4499 = vst [vmem:[%s7723_s5 + $0x8] sm:$0xff] %v4490_v8 }
0x18b1   :  { %v4494_v62 = vpop.f32.mrb[96].mxu0 }
0x18b2   :  { %v4495_v38 = vadd.f32 %v4494_v62, %v4408_v46  ;;  %v5589_v57 = vpop.f32.mrb[97].mxu0 }
0x18b4   :  { %4500 = vst [vmem:[%s7723_s5 + $0x10] sm:$0x3] %v4495_v38 }

</bundles_post_ra>
